<compile_context>
chip_gen: v6e
topology: v6e:2x2x1
jax: 0.10.0
libtpu: 0.0.40
codegen_flags: <defaults>
</compile_context>

<pallas_src>
import functools

import jax
import jax.numpy as jnp
from jax import lax
from jax.experimental import pallas as pl
from jax.experimental.pallas import tpu as pltpu


def _gup_kernel(xe_ref, w_ref, o_ref):
    # xe_ref: (1, H+2, W+2, Cin)  edge-padded ORIGINAL-resolution input (NHWC)
    # w_ref:  (4, 4*Cin, Cout)    parity filters, p = py*2+px, K order (a, b, ci)
    # o_ref:  (1, 4*H, W, Cout)   parity planes stacked along rows (plane p at
    #                             rows [p*H, (p+1)*H)); one batch element.
    W, Cout = o_ref.shape[2], o_ref.shape[3]
    H = o_ref.shape[1] // 4
    Cin = xe_ref.shape[3]

    xe = xe_ref[0]                               # (H+2, W+2, Cin)

    s = jnp.zeros((1, Cout), jnp.float32)        # per-channel sum
    ss = jnp.zeros((1, Cout), jnp.float32)       # per-channel sum of squares

    # ---- Pass 1: conv (one im2col matmul per parity) + one-pass IN stats ----
    # Conv bias intentionally omitted: it cancels exactly under InstanceNorm2d
    # (affine=False) — mean shifts by the bias, variance is unchanged.
    for py in range(2):
        for px in range(2):
            p = py * 2 + px
            parts = []
            for a in range(2):
                for bb in range(2):
                    parts.append(xe[py + a: py + a + H, px + bb: px + bb + W, :])
            patch = jnp.concatenate(parts, axis=-1).reshape(H * W, 4 * Cin)
            y = jnp.dot(patch, w_ref[p],
                        preferred_element_type=jnp.float32)          # (H*W, Cout)
            s = s + jnp.sum(y, axis=0, keepdims=True)
            ss = ss + jnp.sum(y * y, axis=0, keepdims=True)
            o_ref[0, p * H:(p + 1) * H] = y.reshape(H, W, Cout).astype(o_ref.dtype)

    # ---- InstanceNorm2d (affine=False, eps=1e-5) over all 4 parity planes ----
    n = jnp.float32(4 * H * W)
    mean = s / n
    var = ss / n - mean * mean                   # E[x^2] - E[x]^2, single pass
    scale = lax.rsqrt(var + 1e-5)
    shift = mean * scale
    scale3 = scale.reshape(1, 1, Cout)           # hoisted (no CSE inside loops)
    shift3 = shift.reshape(1, 1, Cout)

    # ---- Pass 2: normalize + LeakyReLU(0.2) in place, one plane at a time ----
    for p in range(4):
        z = o_ref[0, p * H:(p + 1) * H].astype(jnp.float32) * scale3 - shift3
        o_ref[0, p * H:(p + 1) * H] = jnp.where(z >= 0, z, 0.2 * z).astype(o_ref.dtype)


@functools.partial(jax.jit, static_argnames=("use_bf16_matmul",))
def g_up_block(x_nchw, weight_oihw, bias, *, use_bf16_matmul=False):
    """Forward pass of G_up_block (act='leaky-relu', dropout=False).

    x_nchw:      (B, Cin, H, W)   float32
    weight_oihw: (Cout, Cin, 3, 3)
    bias:        (Cout,)   accepted for API fidelity; it cancels exactly under
                           InstanceNorm2d(affine=False) and is not used.
    returns:     (B, Cout, 2H, 2W)
    """
    del bias  # cancels under InstanceNorm (per-channel constant shift).
    B, Cin, H, W = x_nchw.shape
    Cout = weight_oihw.shape[0]

    # Cheap original-resolution prep (one fused XLA pass — NOT the 4x upsampled
    # tensor): reflect-pad after 2x nearest upsample == edge replication, so the
    # kernel only needs the edge-padded original image.
    x_nhwc = jnp.transpose(x_nchw, (0, 2, 3, 1))                       # (B,H,W,Cin)
    xe = jnp.pad(x_nhwc, ((0, 0), (1, 1), (1, 1), (0, 0)), mode="edge")

    # Fold the 3x3 taps into four 2x2 parity filters:
    #   A[py,px,a,b] = sum over taps (ky,kx) that map to row/col offset (a,b).
    wk = jnp.transpose(weight_oihw, (2, 3, 1, 0))                      # (3,3,Cin,Cout)
    sel = jnp.array([[[1., 0., 0.], [0., 1., 1.]],      # parity 0: ky -> offset a
                     [[1., 1., 0.], [0., 0., 1.]]],     # parity 1
                    dtype=wk.dtype)                                     # (2,2,3)
    a4 = jnp.einsum("yak,xbl,klio->yxabio", sel, sel, wk)              # (2,2,2,2,Cin,Cout)
    w4 = a4.reshape(4, 4 * Cin, Cout)                                  # K order (a,b,ci)

    if use_bf16_matmul:
        # v6e/v7x MXU rate + half the matmul-input VMEM/DMA (relaxes tolerance).
        xe = xe.astype(jnp.bfloat16)
        w4 = w4.astype(jnp.bfloat16)

    out_dtype = x_nchw.dtype

    # Explicit scoped-VMEM budget: double-buffered in/out/weight blocks plus the
    # im2col patch and f32 matmul-result temporaries, with headroom; capped
    # below v7x's 64 MiB physical VMEM (v5e's scoped default is only 16 MiB).
    in_item = xe.dtype.itemsize
    in_bytes = (H + 2) * (W + 2) * Cin * in_item
    out_bytes = 4 * H * W * Cout * jnp.dtype(out_dtype).itemsize
    w_bytes = w4.size * w4.dtype.itemsize
    patch_bytes = H * W * 4 * Cin * in_item
    y_bytes = H * W * Cout * 4
    vmem_limit = int(min(max(2 * in_bytes + 2 * out_bytes + 2 * w_bytes
                             + patch_bytes + y_bytes + (8 << 20),
                             32 << 20),
                         64 << 20))

    out4 = pl.pallas_call(
        _gup_kernel,
        out_shape=jax.ShapeDtypeStruct((B, 4 * H, W, Cout), out_dtype),
        grid_spec=pltpu.PrefetchScalarGridSpec(
            num_scalar_prefetch=0,
            grid=(B,),
            in_specs=[
                pl.BlockSpec((1, H + 2, W + 2, Cin), lambda bi: (bi, 0, 0, 0)),
                pl.BlockSpec((4, 4 * Cin, Cout), lambda bi: (0, 0, 0)),
            ],
            out_specs=pl.BlockSpec((1, 4 * H, W, Cout), lambda bi: (bi, 0, 0, 0)),
        ),
        compiler_params=pltpu.CompilerParams(
            dimension_semantics=("parallel",),
            vmem_limit_bytes=vmem_limit),
    )(xe, w4)

    # Pixel-shuffle the parity planes and go back to NCHW in ONE transpose pass
    # (this replaces the NHWC->NCHW transpose we would need anyway):
    # out4[b, (py*2+px)*H + i, j, c] -> final[b, c, 2i+py, 2j+px]
    out6 = out4.reshape(B, 2, 2, H, W, Cout)           # (b, py, px, i, j, c)
    out = jnp.transpose(out6, (0, 5, 3, 1, 4, 2))      # (b, c, i, py, j, px)
    return out.reshape(B, Cout, 2 * H, 2 * W)


def _reference(x_nchw, weight_oihw, bias):
    """Pure-JAX reference (upsample -> reflect pad -> conv(+bias) -> IN -> LeakyReLU)."""
    x_up = jnp.repeat(jnp.repeat(x_nchw, 2, axis=2), 2, axis=3)
    x_pad = jnp.pad(x_up, ((0, 0), (0, 0), (1, 1), (1, 1)), mode="reflect")
    y = lax.conv_general_dilated(
        x_pad, weight_oihw, window_strides=(1, 1), padding="VALID",
        dimension_numbers=("NCHW", "OIHW", "NCHW"))
    y = y + bias[None, :, None, None]
    mean = jnp.mean(y, axis=(2, 3), keepdims=True)
    var = jnp.mean((y - mean) ** 2, axis=(2, 3), keepdims=True)
    y = (y - mean) * lax.rsqrt(var + 1e-5)
    return jnp.where(y >= 0, y, 0.2 * y)


if __name__ == "__main__":
    B, Cin, Cout, H, W = 2, 4, 8, 16, 16

    key = jax.random.PRNGKey(0)
    k_x, k_w, k_b = jax.random.split(key, 3)
    x = jax.random.normal(k_x, (B, Cin, H, W), dtype=jnp.float32)
    weight = 0.1 * jax.random.normal(k_w, (Cout, Cin, 3, 3), dtype=jnp.float32)
    bias = 0.1 * jax.random.normal(k_b, (Cout,), dtype=jnp.float32)

    out = g_up_block(x, weight, bias)
    out = jax.block_until_ready(out)

    ref = _reference(x, weight, bias)
    assert out.shape == (B, Cout, 2 * H, 2 * W), out.shape
    max_err = float(jnp.max(jnp.abs(out - ref)))
    assert jnp.allclose(out, ref, atol=1e-4, rtol=1e-4), max_err

    print("KERNEL_OK")
</pallas_src>

<mosaic_0001>
module attributes {stable_mosaic.version = 11 : i64} {
  func.func @_gup_kernel(%arg0: i32, %arg1: memref<1x18x18x4xf32, #tpu.memory_space<vmem>>, %arg2: memref<4x16x8xf32, #tpu.memory_space<vmem>>, %arg3: memref<1x64x16x8xf32, #tpu.memory_space<vmem>>) attributes {dimension_semantics = [#tpu.dimension_semantics<parallel>], iteration_bounds = array<i64: 2>, scalar_prefetch = 0 : i64, scratch_operands = 0 : i64, tpu.core_type = #tpu.core_type<tc>, window_params = [{transform_indices = @transform_0, window_bounds = array<i64: 1, 18, 18, 4>}, {pipeline_mode = #tpu.pipeline_mode<synchronous>, transform_indices = @transform_1, window_bounds = array<i64: 4, 16, 8>}, {transform_indices = @transform_2, window_bounds = array<i64: 1, 64, 16, 8>}]} {
    %c0 = arith.constant 0 : index
    %c0_0 = arith.constant 0 : index
    %c0_1 = arith.constant 0 : index
    %c0_2 = arith.constant 0 : index
    %0 = vector.load %arg1[%c0, %c0_0, %c0_1, %c0_2] : memref<1x18x18x4xf32, #tpu.memory_space<vmem>>, vector<1x18x18x4xf32>
    %1 = vector.shape_cast %0 : vector<1x18x18x4xf32> to vector<18x18x4xf32>
    %cst = arith.constant 0.000000e+00 : f32
    %2 = vector.broadcast %cst : f32 to vector<1x8xf32>
    %cst_3 = arith.constant 0.000000e+00 : f32
    %3 = vector.broadcast %cst_3 : f32 to vector<1x8xf32>
    %4 = vector.extract_strided_slice %1 {offsets = [0, 0, 0], sizes = [16, 16, 4], strides = [1, 1, 1]} : vector<18x18x4xf32> to vector<16x16x4xf32>
    %5 = vector.extract_strided_slice %1 {offsets = [0, 1, 0], sizes = [16, 16, 4], strides = [1, 1, 1]} : vector<18x18x4xf32> to vector<16x16x4xf32>
    %6 = vector.extract_strided_slice %1 {offsets = [1, 0, 0], sizes = [16, 16, 4], strides = [1, 1, 1]} : vector<18x18x4xf32> to vector<16x16x4xf32>
    %7 = vector.extract_strided_slice %1 {offsets = [1, 1, 0], sizes = [16, 16, 4], strides = [1, 1, 1]} : vector<18x18x4xf32> to vector<16x16x4xf32>
    %8 = tpu.concatenate %4, %5, %6, %7 in 2 : vector<16x16x4xf32>, vector<16x16x4xf32>, vector<16x16x4xf32>, vector<16x16x4xf32> -> vector<16x16x16xf32>
    %9 = vector.shape_cast %8 : vector<16x16x16xf32> to vector<256x16xf32>
    %c0_4 = arith.constant 0 : index
    %c0_5 = arith.constant 0 : index
    %c0_6 = arith.constant 0 : index
    %10 = vector.load %arg2[%c0_4, %c0_5, %c0_6] : memref<4x16x8xf32, #tpu.memory_space<vmem>>, vector<1x16x8xf32>
    %11 = vector.shape_cast %10 : vector<1x16x8xf32> to vector<16x8xf32>
    %cst_7 = arith.constant dense<0.000000e+00> : vector<256x8xf32>
    %12 = tpu.matmul %9, %11, %cst_7 {dimension_numbers = #tpu.dot_dimension_numbers<[1], [0], [0], [1], [0, 0, 1, 1], [], []>} : vector<256x16xf32>, vector<16x8xf32>, vector<256x8xf32> -> vector<256x8xf32>
    %cst_8 = arith.constant dense<0.000000e+00> : vector<8xf32>
    %13 = vector.multi_reduction <add>, %12, %cst_8 [0] : vector<256x8xf32> to vector<8xf32>
    %14 = vector.shape_cast %13 : vector<8xf32> to vector<1x8xf32>
    %15 = arith.addf %2, %14 : vector<1x8xf32>
    %16 = arith.mulf %12, %12 : vector<256x8xf32>
    %cst_9 = arith.constant dense<0.000000e+00> : vector<8xf32>
    %17 = vector.multi_reduction <add>, %16, %cst_9 [0] : vector<256x8xf32> to vector<8xf32>
    %18 = vector.shape_cast %17 : vector<8xf32> to vector<1x8xf32>
    %19 = arith.addf %3, %18 : vector<1x8xf32>
    %20 = vector.shape_cast %12 : vector<256x8xf32> to vector<16x16x8xf32>
    %c0_10 = arith.constant 0 : index
    %c0_11 = arith.constant 0 : index
    %c0_12 = arith.constant 0 : index
    %c0_13 = arith.constant 0 : index
    %21 = vector.load %arg3[%c0_10, %c0_11, %c0_12, %c0_13] : memref<1x64x16x8xf32, #tpu.memory_space<vmem>>, vector<1x16x16x8xf32>
    %22 = vector.shape_cast %21 : vector<1x16x16x8xf32> to vector<16x16x8xf32>
    %23 = vector.shape_cast %20 : vector<16x16x8xf32> to vector<1x16x16x8xf32>
    tpu.vector_store %arg3[%c0_10, %c0_11, %c0_12, %c0_13], %23 {strides = array<i32>} : memref<1x64x16x8xf32, #tpu.memory_space<vmem>>, vector<1x16x16x8xf32>,
    %24 = vector.extract_strided_slice %1 {offsets = [0, 1, 0], sizes = [16, 16, 4], strides = [1, 1, 1]} : vector<18x18x4xf32> to vector<16x16x4xf32>
    %25 = vector.extract_strided_slice %1 {offsets = [0, 2, 0], sizes = [16, 16, 4], strides = [1, 1, 1]} : vector<18x18x4xf32> to vector<16x16x4xf32>
    %26 = vector.extract_strided_slice %1 {offsets = [1, 1, 0], sizes = [16, 16, 4], strides = [1, 1, 1]} : vector<18x18x4xf32> to vector<16x16x4xf32>
    %27 = vector.extract_strided_slice %1 {offsets = [1, 2, 0], sizes = [16, 16, 4], strides = [1, 1, 1]} : vector<18x18x4xf32> to vector<16x16x4xf32>
    %28 = tpu.concatenate %24, %25, %26, %27 in 2 : vector<16x16x4xf32>, vector<16x16x4xf32>, vector<16x16x4xf32>, vector<16x16x4xf32> -> vector<16x16x16xf32>
    %29 = vector.shape_cast %28 : vector<16x16x16xf32> to vector<256x16xf32>
    %c1 = arith.constant 1 : index
    %c0_14 = arith.constant 0 : index
    %c0_15 = arith.constant 0 : index
    %30 = vector.load %arg2[%c1, %c0_14, %c0_15] : memref<4x16x8xf32, #tpu.memory_space<vmem>>, vector<1x16x8xf32>
    %31 = vector.shape_cast %30 : vector<1x16x8xf32> to vector<16x8xf32>
    %cst_16 = arith.constant dense<0.000000e+00> : vector<256x8xf32>
    %32 = tpu.matmul %29, %31, %cst_16 {dimension_numbers = #tpu.dot_dimension_numbers<[1], [0], [0], [1], [0, 0, 1, 1], [], []>} : vector<256x16xf32>, vector<16x8xf32>, vector<256x8xf32> -> vector<256x8xf32>
    %cst_17 = arith.constant dense<0.000000e+00> : vector<8xf32>
    %33 = vector.multi_reduction <add>, %32, %cst_17 [0] : vector<256x8xf32> to vector<8xf32>
    %34 = vector.shape_cast %33 : vector<8xf32> to vector<1x8xf32>
    %35 = arith.addf %15, %34 : vector<1x8xf32>
    %36 = arith.mulf %32, %32 : vector<256x8xf32>
    %cst_18 = arith.constant dense<0.000000e+00> : vector<8xf32>
    %37 = vector.multi_reduction <add>, %36, %cst_18 [0] : vector<256x8xf32> to vector<8xf32>
    %38 = vector.shape_cast %37 : vector<8xf32> to vector<1x8xf32>
    %39 = arith.addf %19, %38 : vector<1x8xf32>
    %40 = vector.shape_cast %32 : vector<256x8xf32> to vector<16x16x8xf32>
    %c0_19 = arith.constant 0 : index
    %c16 = arith.constant 16 : index
    %c0_20 = arith.constant 0 : index
    %c0_21 = arith.constant 0 : index
    %41 = vector.load %arg3[%c0_19, %c16, %c0_20, %c0_21] : memref<1x64x16x8xf32, #tpu.memory_space<vmem>>, vector<1x16x16x8xf32>
    %42 = vector.shape_cast %41 : vector<1x16x16x8xf32> to vector<16x16x8xf32>
    %43 = vector.shape_cast %40 : vector<16x16x8xf32> to vector<1x16x16x8xf32>
    tpu.vector_store %arg3[%c0_19, %c16, %c0_20, %c0_21], %43 {strides = array<i32>} : memref<1x64x16x8xf32, #tpu.memory_space<vmem>>, vector<1x16x16x8xf32>,
    %44 = vector.extract_strided_slice %1 {offsets = [1, 0, 0], sizes = [16, 16, 4], strides = [1, 1, 1]} : vector<18x18x4xf32> to vector<16x16x4xf32>
    %45 = vector.extract_strided_slice %1 {offsets = [1, 1, 0], sizes = [16, 16, 4], strides = [1, 1, 1]} : vector<18x18x4xf32> to vector<16x16x4xf32>
    %46 = vector.extract_strided_slice %1 {offsets = [2, 0, 0], sizes = [16, 16, 4], strides = [1, 1, 1]} : vector<18x18x4xf32> to vector<16x16x4xf32>
    %47 = vector.extract_strided_slice %1 {offsets = [2, 1, 0], sizes = [16, 16, 4], strides = [1, 1, 1]} : vector<18x18x4xf32> to vector<16x16x4xf32>
    %48 = tpu.concatenate %44, %45, %46, %47 in 2 : vector<16x16x4xf32>, vector<16x16x4xf32>, vector<16x16x4xf32>, vector<16x16x4xf32> -> vector<16x16x16xf32>
    %49 = vector.shape_cast %48 : vector<16x16x16xf32> to vector<256x16xf32>
    %c2 = arith.constant 2 : index
    %c0_22 = arith.constant 0 : index
    %c0_23 = arith.constant 0 : index
    %50 = vector.load %arg2[%c2, %c0_22, %c0_23] : memref<4x16x8xf32, #tpu.memory_space<vmem>>, vector<1x16x8xf32>
    %51 = vector.shape_cast %50 : vector<1x16x8xf32> to vector<16x8xf32>
    %cst_24 = arith.constant dense<0.000000e+00> : vector<256x8xf32>
    %52 = tpu.matmul %49, %51, %cst_24 {dimension_numbers = #tpu.dot_dimension_numbers<[1], [0], [0], [1], [0, 0, 1, 1], [], []>} : vector<256x16xf32>, vector<16x8xf32>, vector<256x8xf32> -> vector<256x8xf32>
    %cst_25 = arith.constant dense<0.000000e+00> : vector<8xf32>
    %53 = vector.multi_reduction <add>, %52, %cst_25 [0] : vector<256x8xf32> to vector<8xf32>
    %54 = vector.shape_cast %53 : vector<8xf32> to vector<1x8xf32>
    %55 = arith.addf %35, %54 : vector<1x8xf32>
    %56 = arith.mulf %52, %52 : vector<256x8xf32>
    %cst_26 = arith.constant dense<0.000000e+00> : vector<8xf32>
    %57 = vector.multi_reduction <add>, %56, %cst_26 [0] : vector<256x8xf32> to vector<8xf32>
    %58 = vector.shape_cast %57 : vector<8xf32> to vector<1x8xf32>
    %59 = arith.addf %39, %58 : vector<1x8xf32>
    %60 = vector.shape_cast %52 : vector<256x8xf32> to vector<16x16x8xf32>
    %c0_27 = arith.constant 0 : index
    %c32 = arith.constant 32 : index
    %c0_28 = arith.constant 0 : index
    %c0_29 = arith.constant 0 : index
    %61 = vector.load %arg3[%c0_27, %c32, %c0_28, %c0_29] : memref<1x64x16x8xf32, #tpu.memory_space<vmem>>, vector<1x16x16x8xf32>
    %62 = vector.shape_cast %61 : vector<1x16x16x8xf32> to vector<16x16x8xf32>
    %63 = vector.shape_cast %60 : vector<16x16x8xf32> to vector<1x16x16x8xf32>
    tpu.vector_store %arg3[%c0_27, %c32, %c0_28, %c0_29], %63 {strides = array<i32>} : memref<1x64x16x8xf32, #tpu.memory_space<vmem>>, vector<1x16x16x8xf32>,
    %64 = vector.extract_strided_slice %1 {offsets = [1, 1, 0], sizes = [16, 16, 4], strides = [1, 1, 1]} : vector<18x18x4xf32> to vector<16x16x4xf32>
    %65 = vector.extract_strided_slice %1 {offsets = [1, 2, 0], sizes = [16, 16, 4], strides = [1, 1, 1]} : vector<18x18x4xf32> to vector<16x16x4xf32>
    %66 = vector.extract_strided_slice %1 {offsets = [2, 1, 0], sizes = [16, 16, 4], strides = [1, 1, 1]} : vector<18x18x4xf32> to vector<16x16x4xf32>
    %67 = vector.extract_strided_slice %1 {offsets = [2, 2, 0], sizes = [16, 16, 4], strides = [1, 1, 1]} : vector<18x18x4xf32> to vector<16x16x4xf32>
    %68 = tpu.concatenate %64, %65, %66, %67 in 2 : vector<16x16x4xf32>, vector<16x16x4xf32>, vector<16x16x4xf32>, vector<16x16x4xf32> -> vector<16x16x16xf32>
    %69 = vector.shape_cast %68 : vector<16x16x16xf32> to vector<256x16xf32>
    %c3 = arith.constant 3 : index
    %c0_30 = arith.constant 0 : index
    %c0_31 = arith.constant 0 : index
    %70 = vector.load %arg2[%c3, %c0_30, %c0_31] : memref<4x16x8xf32, #tpu.memory_space<vmem>>, vector<1x16x8xf32>
    %71 = vector.shape_cast %70 : vector<1x16x8xf32> to vector<16x8xf32>
    %cst_32 = arith.constant dense<0.000000e+00> : vector<256x8xf32>
    %72 = tpu.matmul %69, %71, %cst_32 {dimension_numbers = #tpu.dot_dimension_numbers<[1], [0], [0], [1], [0, 0, 1, 1], [], []>} : vector<256x16xf32>, vector<16x8xf32>, vector<256x8xf32> -> vector<256x8xf32>
    %cst_33 = arith.constant dense<0.000000e+00> : vector<8xf32>
    %73 = vector.multi_reduction <add>, %72, %cst_33 [0] : vector<256x8xf32> to vector<8xf32>
    %74 = vector.shape_cast %73 : vector<8xf32> to vector<1x8xf32>
    %75 = arith.addf %55, %74 : vector<1x8xf32>
    %76 = arith.mulf %72, %72 : vector<256x8xf32>
    %cst_34 = arith.constant dense<0.000000e+00> : vector<8xf32>
    %77 = vector.multi_reduction <add>, %76, %cst_34 [0] : vector<256x8xf32> to vector<8xf32>
    %78 = vector.shape_cast %77 : vector<8xf32> to vector<1x8xf32>
    %79 = arith.addf %59, %78 : vector<1x8xf32>
    %80 = vector.shape_cast %72 : vector<256x8xf32> to vector<16x16x8xf32>
    %c0_35 = arith.constant 0 : index
    %c48 = arith.constant 48 : index
    %c0_36 = arith.constant 0 : index
    %c0_37 = arith.constant 0 : index
    %81 = vector.load %arg3[%c0_35, %c48, %c0_36, %c0_37] : memref<1x64x16x8xf32, #tpu.memory_space<vmem>>, vector<1x16x16x8xf32>
    %82 = vector.shape_cast %81 : vector<1x16x16x8xf32> to vector<16x16x8xf32>
    %83 = vector.shape_cast %80 : vector<16x16x8xf32> to vector<1x16x16x8xf32>
    tpu.vector_store %arg3[%c0_35, %c48, %c0_36, %c0_37], %83 {strides = array<i32>} : memref<1x64x16x8xf32, #tpu.memory_space<vmem>>, vector<1x16x16x8xf32>,
    %cst_38 = arith.constant 1.024000e+03 : f32
    %84 = vector.broadcast %cst_38 : f32 to vector<1x8xf32>
    %85 = arith.divf %75, %84 : vector<1x8xf32>
    %cst_39 = arith.constant 1.024000e+03 : f32
    %86 = vector.broadcast %cst_39 : f32 to vector<1x8xf32>
    %87 = arith.divf %79, %86 : vector<1x8xf32>
    %88 = arith.mulf %85, %85 : vector<1x8xf32>
    %89 = arith.subf %87, %88 : vector<1x8xf32>
    %cst_40 = arith.constant 9.99999974E-6 : f32
    %90 = vector.broadcast %cst_40 : f32 to vector<1x8xf32>
    %91 = arith.addf %89, %90 : vector<1x8xf32>
    %92 = math.rsqrt %91 : vector<1x8xf32>
    %93 = arith.mulf %85, %92 : vector<1x8xf32>
    %94 = vector.shape_cast %92 : vector<1x8xf32> to vector<1x1x8xf32>
    %95 = vector.shape_cast %93 : vector<1x8xf32> to vector<1x1x8xf32>
    %c0_41 = arith.constant 0 : index
    %c0_42 = arith.constant 0 : index
    %c0_43 = arith.constant 0 : index
    %c0_44 = arith.constant 0 : index
    %96 = vector.load %arg3[%c0_41, %c0_42, %c0_43, %c0_44] : memref<1x64x16x8xf32, #tpu.memory_space<vmem>>, vector<1x16x16x8xf32>
    %97 = vector.shape_cast %96 : vector<1x16x16x8xf32> to vector<16x16x8xf32>
    %98 = vector.broadcast %94 : vector<1x1x8xf32> to vector<16x16x8xf32>
    %99 = arith.mulf %97, %98 : vector<16x16x8xf32>
    %100 = vector.broadcast %95 : vector<1x1x8xf32> to vector<16x16x8xf32>
    %101 = arith.subf %99, %100 : vector<16x16x8xf32>
    %cst_45 = arith.constant 0.000000e+00 : f32
    %102 = vector.broadcast %cst_45 : f32 to vector<16x16x8xf32>
    %103 = arith.cmpf oge, %101, %102 : vector<16x16x8xf32>
    %cst_46 = arith.constant 2.000000e-01 : f32
    %104 = vector.broadcast %cst_46 : f32 to vector<16x16x8xf32>
    %105 = arith.mulf %104, %101 : vector<16x16x8xf32>
    %106 = arith.select %103, %101, %105 : vector<16x16x8xi1>, vector<16x16x8xf32>
    %c0_47 = arith.constant 0 : index
    %c0_48 = arith.constant 0 : index
    %c0_49 = arith.constant 0 : index
    %c0_50 = arith.constant 0 : index
    %107 = vector.load %arg3[%c0_47, %c0_48, %c0_49, %c0_50] : memref<1x64x16x8xf32, #tpu.memory_space<vmem>>, vector<1x16x16x8xf32>
    %108 = vector.shape_cast %107 : vector<1x16x16x8xf32> to vector<16x16x8xf32>
    %109 = vector.shape_cast %106 : vector<16x16x8xf32> to vector<1x16x16x8xf32>
    tpu.vector_store %arg3[%c0_47, %c0_48, %c0_49, %c0_50], %109 {strides = array<i32>} : memref<1x64x16x8xf32, #tpu.memory_space<vmem>>, vector<1x16x16x8xf32>,
    %c0_51 = arith.constant 0 : index
    %c16_52 = arith.constant 16 : index
    %c0_53 = arith.constant 0 : index
    %c0_54 = arith.constant 0 : index
    %110 = vector.load %arg3[%c0_51, %c16_52, %c0_53, %c0_54] : memref<1x64x16x8xf32, #tpu.memory_space<vmem>>, vector<1x16x16x8xf32>
    %111 = vector.shape_cast %110 : vector<1x16x16x8xf32> to vector<16x16x8xf32>
    %112 = vector.broadcast %94 : vector<1x1x8xf32> to vector<16x16x8xf32>
    %113 = arith.mulf %111, %112 : vector<16x16x8xf32>
    %114 = vector.broadcast %95 : vector<1x1x8xf32> to vector<16x16x8xf32>
    %115 = arith.subf %113, %114 : vector<16x16x8xf32>
    %cst_55 = arith.constant 0.000000e+00 : f32
    %116 = vector.broadcast %cst_55 : f32 to vector<16x16x8xf32>
    %117 = arith.cmpf oge, %115, %116 : vector<16x16x8xf32>
    %cst_56 = arith.constant 2.000000e-01 : f32
    %118 = vector.broadcast %cst_56 : f32 to vector<16x16x8xf32>
    %119 = arith.mulf %118, %115 : vector<16x16x8xf32>
    %120 = arith.select %117, %115, %119 : vector<16x16x8xi1>, vector<16x16x8xf32>
    %c0_57 = arith.constant 0 : index
    %c16_58 = arith.constant 16 : index
    %c0_59 = arith.constant 0 : index
    %c0_60 = arith.constant 0 : index
    %121 = vector.load %arg3[%c0_57, %c16_58, %c0_59, %c0_60] : memref<1x64x16x8xf32, #tpu.memory_space<vmem>>, vector<1x16x16x8xf32>
    %122 = vector.shape_cast %121 : vector<1x16x16x8xf32> to vector<16x16x8xf32>
    %123 = vector.shape_cast %120 : vector<16x16x8xf32> to vector<1x16x16x8xf32>
    tpu.vector_store %arg3[%c0_57, %c16_58, %c0_59, %c0_60], %123 {strides = array<i32>} : memref<1x64x16x8xf32, #tpu.memory_space<vmem>>, vector<1x16x16x8xf32>,
    %c0_61 = arith.constant 0 : index
    %c32_62 = arith.constant 32 : index
    %c0_63 = arith.constant 0 : index
    %c0_64 = arith.constant 0 : index
    %124 = vector.load %arg3[%c0_61, %c32_62, %c0_63, %c0_64] : memref<1x64x16x8xf32, #tpu.memory_space<vmem>>, vector<1x16x16x8xf32>
    %125 = vector.shape_cast %124 : vector<1x16x16x8xf32> to vector<16x16x8xf32>
    %126 = vector.broadcast %94 : vector<1x1x8xf32> to vector<16x16x8xf32>
    %127 = arith.mulf %125, %126 : vector<16x16x8xf32>
    %128 = vector.broadcast %95 : vector<1x1x8xf32> to vector<16x16x8xf32>
    %129 = arith.subf %127, %128 : vector<16x16x8xf32>
    %cst_65 = arith.constant 0.000000e+00 : f32
    %130 = vector.broadcast %cst_65 : f32 to vector<16x16x8xf32>
    %131 = arith.cmpf oge, %129, %130 : vector<16x16x8xf32>
    %cst_66 = arith.constant 2.000000e-01 : f32
    %132 = vector.broadcast %cst_66 : f32 to vector<16x16x8xf32>
    %133 = arith.mulf %132, %129 : vector<16x16x8xf32>
    %134 = arith.select %131, %129, %133 : vector<16x16x8xi1>, vector<16x16x8xf32>
    %c0_67 = arith.constant 0 : index
    %c32_68 = arith.constant 32 : index
    %c0_69 = arith.constant 0 : index
    %c0_70 = arith.constant 0 : index
    %135 = vector.load %arg3[%c0_67, %c32_68, %c0_69, %c0_70] : memref<1x64x16x8xf32, #tpu.memory_space<vmem>>, vector<1x16x16x8xf32>
    %136 = vector.shape_cast %135 : vector<1x16x16x8xf32> to vector<16x16x8xf32>
    %137 = vector.shape_cast %134 : vector<16x16x8xf32> to vector<1x16x16x8xf32>
    tpu.vector_store %arg3[%c0_67, %c32_68, %c0_69, %c0_70], %137 {strides = array<i32>} : memref<1x64x16x8xf32, #tpu.memory_space<vmem>>, vector<1x16x16x8xf32>,
    %c0_71 = arith.constant 0 : index
    %c48_72 = arith.constant 48 : index
    %c0_73 = arith.constant 0 : index
    %c0_74 = arith.constant 0 : index
    %138 = vector.load %arg3[%c0_71, %c48_72, %c0_73, %c0_74] : memref<1x64x16x8xf32, #tpu.memory_space<vmem>>, vector<1x16x16x8xf32>
    %139 = vector.shape_cast %138 : vector<1x16x16x8xf32> to vector<16x16x8xf32>
    %140 = vector.broadcast %94 : vector<1x1x8xf32> to vector<16x16x8xf32>
    %141 = arith.mulf %139, %140 : vector<16x16x8xf32>
    %142 = vector.broadcast %95 : vector<1x1x8xf32> to vector<16x16x8xf32>
    %143 = arith.subf %141, %142 : vector<16x16x8xf32>
    %cst_75 = arith.constant 0.000000e+00 : f32
    %144 = vector.broadcast %cst_75 : f32 to vector<16x16x8xf32>
    %145 = arith.cmpf oge, %143, %144 : vector<16x16x8xf32>
    %cst_76 = arith.constant 2.000000e-01 : f32
    %146 = vector.broadcast %cst_76 : f32 to vector<16x16x8xf32>
    %147 = arith.mulf %146, %143 : vector<16x16x8xf32>
    %148 = arith.select %145, %143, %147 : vector<16x16x8xi1>, vector<16x16x8xf32>
    %c0_77 = arith.constant 0 : index
    %c48_78 = arith.constant 48 : index
    %c0_79 = arith.constant 0 : index
    %c0_80 = arith.constant 0 : index
    %149 = vector.load %arg3[%c0_77, %c48_78, %c0_79, %c0_80] : memref<1x64x16x8xf32, #tpu.memory_space<vmem>>, vector<1x16x16x8xf32>
    %150 = vector.shape_cast %149 : vector<1x16x16x8xf32> to vector<16x16x8xf32>
    %151 = vector.shape_cast %148 : vector<16x16x8xf32> to vector<1x16x16x8xf32>
    tpu.vector_store %arg3[%c0_77, %c48_78, %c0_79, %c0_80], %151 {strides = array<i32>} : memref<1x64x16x8xf32, #tpu.memory_space<vmem>>, vector<1x16x16x8xf32>,
    return
  }
  func.func @transform_0(%arg0: i32) -> (i32, i32, i32, i32) {
    %c0_i32 = arith.constant 0 : i32
    %c0_i32_0 = arith.constant 0 : i32
    %c0_i32_1 = arith.constant 0 : i32
    %c0_i32_2 = arith.constant 0 : i32
    return %arg0, %c0_i32, %c0_i32_0, %c0_i32_1 : i32, i32, i32, i32
  }
  func.func @transform_1(%arg0: i32) -> (i32, i32, i32) {
    %c0_i32 = arith.constant 0 : i32
    %c0_i32_0 = arith.constant 0 : i32
    %c0_i32_1 = arith.constant 0 : i32
    %c0_i32_2 = arith.constant 0 : i32
    return %c0_i32, %c0_i32_0, %c0_i32_1 : i32, i32, i32
  }
  func.func @transform_2(%arg0: i32) -> (i32, i32, i32, i32) {
    %c0_i32 = arith.constant 0 : i32
    %c0_i32_0 = arith.constant 0 : i32
    %c0_i32_1 = arith.constant 0 : i32
    %c0_i32_2 = arith.constant 0 : i32
    return %arg0, %c0_i32, %c0_i32_0, %c0_i32_1 : i32, i32, i32, i32
  }
}

</mosaic_0001>

<bundles_post_ra>
// kernel: g_up_block.1
= control target key start
LH: loop header
LB: loop body
LE: loop exit
PB: predicated region body
PF: predicated region fallthrough
CT: control target
= control target key end

     0   :  { %s4737_s9 = smov 0   ;;  %s8202_s0 = inlined_call_operand.vmem [shape: f32[2,18,18,4], index: 0, kind: input, shape index: {}]   ;;  %s8203_s1 = inlined_call_operand.vmem [shape: f32[4,16,8], index: 1, kind: input, shape index: {}]   ;;  %s8204_s2 = inlined_call_operand.vmem [shape: f32[2,64,16,8], index: 2, kind: output, shape index: {}]  }
   0x1 LB: > { %s3920_s10 = sadd.s32 4294967295, %s4717_s9   ;;  %p3924_p0 = scmp.ge.s32.totalorder %s4717_s9, 1  ;;  %s4717_s9 = sphi %s4737_s9, %s12_s9  }
   0x2   : > { %p112_p1 = scmp.lt.s32.totalorder %s4717_s9, 3 }
   0x4   : > { %p113_p2 = pnand %p3924_p0, %p112_p1 }
   0x6   : > { %116 = sbr.rel (%p113_p2) target bundleno = 915 (0x393), region = 28 }
   0xb   : > { %p134_p3 = scmp.lt.s32.totalorder %s3920_s10, 1  ;;  %v723_v0 = vld [vmem:[%s8203_s1 + $0x8] sm:$0xff]  ;;  %s4719_s17 = smov 8   ;;  %vm246_vm0 = vcmask 1046528   ;;  %v722_v16 = vld [vmem:[%s8203_s1] sm:$0xff]  ;;  %v3961_v17 = vld [vmem:[%s8203_s1 + $0x18] sm:$0xff] }
   0xc   : > { %4489 = vmatprep.subr.mxu0 %v723_v0  ;;  %s4720_s18 = smov 4   ;;  %s4721_s21 = smov 12   ;;  %4541 = vmatprep.subr.mxu1 %v3961_v17  ;;  %v3960_v18 = vld [vmem:[%s8203_s1 + $0x10] sm:$0xff]  ;;  %vm656_vm1 = vcmask 64512   ;;  %vm623_vm2 = vcmask 31744   ;;  %vm689_vm3 = vcmask 97280  }
   0xd   : > { %s8326_s10 = smov (!%p134_p3, %s3920_s10), 1  ;;  %4490 = vmatpush3.msra.mxu0 %v723_v0  ;;  %4542 = vmatpush3.msra.mxu1 %v3961_v17  ;;  %vm724_vm4 = vcmask 130048  }
   0xe   : > { %s4697_s11 = smul.u32 432, %s8326_s10  ;;  %4491 = vmatprep.subr.mxu0 %v722_v16  ;;  %4543 = vmatprep.subr.mxu1 %v3960_v18  ;;  %s4352_s6 = sshll.u32 %s8326_s10, 10 }
   0xf   : > { %4492 = vmatpush3.msra.mxu0 %v722_v16  ;;  %4544 = vmatpush3.msra.mxu1 %v3960_v18 }
  0x10   : > { %s4754_s16 = scalar_lea.vmem %s8202_s0, %s4697_s11  ;;  %s5588_s11 = scalar_lea.vmem %s8204_s2, %s4352_s6 }
  0x11   : > { %v4757_v1 = vld [vmem:[%s4754_s16 + $0x18] sm:$0xff]  ;;  %v4760_v2 = vld [vmem:[%s4754_s16 + $0x10] sm:$0x3]  ;;  %v4763_v3 = vld [vmem:[%s4754_s16 + $0x20] sm:$0xff] }
  0x12   : > { %425 = vrot.lane.b32.xlu1 %v4757_v1, %s4719_s17  ;;  %v250_v4 = vrot.slane %v4760_v2, 1  ;;  %v4769_v5 = vld [vmem:[%s4754_s16] sm:$0xff]  ;;  %v4772_v6 = vld [vmem:[%s4754_s16 + $0x8] sm:$0xff]  ;;  %v252_v7 = vrot.slane %v4757_v1, 1  ;;  %v253_v8 = vrot.slane %v4763_v3, 1  ;;  %v4806_v20 = vld [vmem:[%s4754_s16 + $0x30] sm:$0xff] }
  0x13   : > { %v247_v9 = vrot.slane %v4769_v5, 1  ;;  %v248_v10 = vrot.slane %v4772_v6, 1  ;;  %v4783_v12 = vld [vmem:[%s4754_s16 + $0x28] sm:$0x3]  ;;  %v4810_v21 = vld [vmem:[%s4754_s16 + $0x38] sm:$0xff]  ;;  %v257_v25 = vrot.slane %v4806_v20, 1 }
  0x14   : > { %1250 = vrot.lane.b32.xlu0 %v250_v4, %s4720_s18  ;;  %v254_v13 = vsel %vm246_vm0, %v252_v7, %v253_v8  ;;  %v255_v15 = vrot.slane %v4783_v12, 1  ;;  %v4813_v22 = vld [vmem:[%s4754_s16 + $0x40] sm:$0x3]  ;;  %v258_v23 = vrot.slane %v4810_v21, 1  ;;  %v4832_v28 = vld [vmem:[%s4754_s16 + $0x50] sm:$0xff]  ;;  %v4835_v29 = vld [vmem:[%s4754_s16 + $0x48] sm:$0xff] }
  0x15   : > { %v249_v11 = vsel %vm246_vm0, %v247_v9, %v248_v10  ;;  %v251_v14 = vsel %vm246_vm0, %v248_v10, %v250_v4  ;;  %v260_v24 = vrot.slane %v4813_v22, 1  ;;  %v263_v30 = vrot.slane %v4832_v28, 1  ;;  %v4844_v32 = vld [vmem:[%s4754_s16 + $0x58] sm:$0x3]  ;;  %v4858_v36 = vld [vmem:[%s4754_s16 + $0x60] sm:$0xff]  ;;  %v4862_v37 = vld [vmem:[%s4754_s16 + $0x68] sm:$0xff] }
  0x16   : > { %427 = vrot.lane.b32.xlu1 %v4763_v3, %s4719_s17  ;;  %v256_v19 = vsel %vm246_vm0, %v253_v8, %v255_v15  ;;  %v259_v27 = vsel %vm246_vm0, %v257_v25, %v258_v23  ;;  %v262_v31 = vrot.slane %v4835_v29, 1  ;;  %v265_v34 = vrot.slane %v4844_v32, 1  ;;  %v4865_v38 = vld [vmem:[%s4754_s16 + $0x70] sm:$0x3]  ;;  %v4884_v44 = vld [vmem:[%s4754_s16 + $0x80] sm:$0xff]  ;;  %v4887_v45 = vld [vmem:[%s4754_s16 + $0x78] sm:$0xff] }
  0x17   : > { %v261_v26 = vsel %vm246_vm0, %v258_v23, %v260_v24  ;;  %v268_v39 = vrot.slane %v4862_v37, 1  ;;  %v270_v40 = vrot.slane %v4865_v38, 1  ;;  %v267_v41 = vrot.slane %v4858_v36, 1  ;;  %v4896_v48 = vld [vmem:[%s4754_s16 + $0x88] sm:$0x3]  ;;  %v4910_v52 = vld [vmem:[%s4754_s16 + $0x90] sm:$0xff] }
  0x18   : > { %327 = vrot.lane.b32.xlu0 %v249_v11, %s4720_s18  ;;  %v264_v33 = vsel %vm246_vm0, %v262_v31, %v263_v30  ;;  %v266_v35 = vsel %vm246_vm0, %v263_v30, %v265_v34  ;;  %v273_v46 = vrot.slane %v4884_v44, 1  ;;  %v272_v47 = vrot.slane %v4887_v45, 1  ;;  %v4914_v53 = vld [vmem:[%s4754_s16 + $0x98] sm:$0xff]  ;;  %v4917_v54 = vld [vmem:[%s4754_s16 + $0xa0] sm:$0x3]  ;;  %v4936_v60 = vld [vmem:[%s4754_s16 + $0xb0] sm:$0xff] }
  0x19   : > { %v271_v42 = vsel %vm246_vm0, %v268_v39, %v270_v40  ;;  %v269_v43 = vsel %vm246_vm0, %v267_v41, %v268_v39  ;;  %v275_v50 = vrot.slane %v4896_v48, 1  ;;  %v278_v55 = vrot.slane %v4914_v53, 1  ;;  %v4939_v61 = vld [vmem:[%s4754_s16 + $0xa8] sm:$0xff]  ;;  %v4948_v0 = vld [vmem:[%s4754_s16 + $0xb8] sm:$0x3]  ;;  %v4969_v23 = vld [vmem:[%s4754_s16 + $0xc0] sm:$0xff] }
  0x1a   : > { %527 = vrot.lane.b32.xlu1 %v254_v13, %s4721_s21  ;;  %v274_v49 = vsel %vm246_vm0, %v272_v47, %v273_v46  ;;  %v280_v56 = vrot.slane %v4917_v54, 1  ;;  %v277_v57 = vrot.slane %v4910_v52, 1  ;;  %v283_v62 = vrot.slane %v4936_v60, 1  ;;  %v4976_v25 = vld [vmem:[%s4754_s16 + $0xd0] sm:$0x3] }
  0x1b   : > { %v276_v51 = vsel %vm246_vm0, %v273_v46, %v275_v50  ;;  %v282_v63 = vrot.slane %v4939_v61, 1  ;;  %v285_v8 = vrot.slane %v4948_v0, 1 }
  0x1c   : > { %329 = vrot.lane.b32.xlu0 %v251_v14, %s4720_s18  ;;  %v281_v58 = vsel %vm246_vm0, %v278_v55, %v280_v56  ;;  %v279_v59 = vsel %vm246_vm0, %v277_v57, %v278_v55 }
  0x1d   : > { %v284_v4 = vsel %vm246_vm0, %v282_v63, %v283_v62  ;;  %v286_v11 = vsel %vm246_vm0, %v283_v62, %v285_v8 }
  0x1e   : > { %1298 = vrot.lane.b32.xlu1 %v4783_v12, %s4719_s17 }
  0x20   : > { %529 = vrot.lane.b32.xlu0 %v256_v19, %s4721_s21 }
  0x22   : > { %331 = vrot.lane.b32.xlu1 %v254_v13, %s4720_s18 }
  0x24   : > { %1346 = vrot.lane.b32.xlu0 %v255_v15, %s4721_s21 }
  0x26   : > { %429 = vrot.lane.b32.xlu1 %v4806_v20, %s4719_s17 }
  0x28   : > { %333 = vrot.lane.b32.xlu0 %v256_v19, %s4720_s18 }
  0x2a   : > { %1252 = vrot.lane.b32.xlu1 %v255_v15, %s4720_s18 }
  0x2c   : > { %431 = vrot.lane.b32.xlu0 %v4810_v21, %s4719_s17 }
  0x2e   : > { %533 = vrot.lane.b32.xlu1 %v261_v26, %s4721_s21 }
  0x30   : > { %531 = vrot.lane.b32.xlu0 %v259_v27, %s4721_s21 }
  0x32   : > { %1348 = vrot.lane.b32.xlu1 %v260_v24, %s4721_s21 }
  0x34   : > { %1300 = vrot.lane.b32.xlu0 %v4813_v22, %s4719_s17 }
  0x36   : > { %337 = vrot.lane.b32.xlu1 %v261_v26, %s4720_s18 }
  0x38   : > { %335 = vrot.lane.b32.xlu0 %v259_v27, %s4720_s18 }
  0x3a   : > { %435 = vrot.lane.b32.xlu1 %v4832_v28, %s4719_s17 }
  0x3c   : > { %433 = vrot.lane.b32.xlu0 %v4835_v29, %s4719_s17 }
  0x3e   : > { %535 = vrot.lane.b32.xlu1 %v264_v33, %s4721_s21 }
  0x40   : > { %1254 = vrot.lane.b32.xlu0 %v260_v24, %s4720_s18 }
  0x42   : > { %1302 = vrot.lane.b32.xlu1 %v4844_v32, %s4719_s17 }
  0x44   : > { %537 = vrot.lane.b32.xlu0 %v266_v35, %s4721_s21 }
  0x46   : > { %339 = vrot.lane.b32.xlu1 %v264_v33, %s4720_s18 }
  0x48   : > { %1350 = vrot.lane.b32.xlu0 %v265_v34, %s4721_s21 }
  0x4a   : > { %437 = vrot.lane.b32.xlu1 %v4858_v36, %s4719_s17 }
  0x4c   : > { %341 = vrot.lane.b32.xlu0 %v266_v35, %s4720_s18 }
  0x4e   : > { %1256 = vrot.lane.b32.xlu1 %v265_v34, %s4720_s18 }
  0x50   : > { %439 = vrot.lane.b32.xlu0 %v4862_v37, %s4719_s17 }
  0x52   : > { %541 = vrot.lane.b32.xlu1 %v271_v42, %s4721_s21 }
  0x54   : > { %539 = vrot.lane.b32.xlu0 %v269_v43, %s4721_s21 }
  0x56   : > { %1352 = vrot.lane.b32.xlu1 %v270_v40, %s4721_s21 }
  0x58   : > { %1304 = vrot.lane.b32.xlu0 %v4865_v38, %s4719_s17 }
  0x5a   : > { %345 = vrot.lane.b32.xlu1 %v271_v42, %s4720_s18 }
  0x5c   : > { %343 = vrot.lane.b32.xlu0 %v269_v43, %s4720_s18 }
  0x5e   : > { %443 = vrot.lane.b32.xlu1 %v4884_v44, %s4719_s17 }
  0x60   : > { %441 = vrot.lane.b32.xlu0 %v4887_v45, %s4719_s17 }
  0x62   : > { %543 = vrot.lane.b32.xlu1 %v274_v49, %s4721_s21 }
  0x64   : > { %1258 = vrot.lane.b32.xlu0 %v270_v40, %s4720_s18  ;;  %v287_v40 = vrot.slane %v4969_v23, 1 }
  0x66   : > { %1306 = vrot.lane.b32.xlu1 %v4896_v48, %s4719_s17 }
  0x68   : > { %545 = vrot.lane.b32.xlu0 %v276_v51, %s4721_s21 }
  0x6a   : > { %347 = vrot.lane.b32.xlu1 %v274_v49, %s4720_s18 }
  0x6c   : > { %1354 = vrot.lane.b32.xlu0 %v275_v50, %s4721_s21 }
  0x6e   : > { %445 = vrot.lane.b32.xlu1 %v4910_v52, %s4719_s17 }
  0x70   : > { %349 = vrot.lane.b32.xlu0 %v276_v51, %s4720_s18 }
  0x72   : > { %1260 = vrot.lane.b32.xlu1 %v275_v50, %s4720_s18 }
  0x74   : > { %447 = vrot.lane.b32.xlu0 %v4914_v53, %s4719_s17 }
  0x76   : > { %549 = vrot.lane.b32.xlu1 %v281_v58, %s4721_s21 }
  0x78   : > { %547 = vrot.lane.b32.xlu0 %v279_v59, %s4721_s21 }
  0x7a   : > { %1356 = vrot.lane.b32.xlu1 %v280_v56, %s4721_s21 }
  0x7c   : > { %1308 = vrot.lane.b32.xlu0 %v4917_v54, %s4719_s17 }
  0x7e   : > { %353 = vrot.lane.b32.xlu1 %v281_v58, %s4720_s18 }
  0x80   : > { %351 = vrot.lane.b32.xlu0 %v279_v59, %s4720_s18 }
  0x82   : > { %451 = vrot.lane.b32.xlu1 %v4936_v60, %s4719_s17 }
  0x84   : > { %v426_v7 = vpop.permute.xlu1 %425  ;;  %449 = vrot.lane.b32.xlu0 %v4939_v61, %s4719_s17 }
  0x86   : > { %551 = vrot.lane.b32.xlu1 %v284_v4, %s4721_s21  ;;  %v1251_v9 = vpop.permute.xlu0 %1250 }
  0x87   : > { %v1394_v39 = vsel %vm623_vm2, %v4760_v2, %v1251_v9 }
  0x88   : > { %v428_v10 = vpop.permute.xlu1 %427  ;;  %1262 = vrot.lane.b32.xlu0 %v280_v56, %s4720_s18 }
  0x8a   : > { %1310 = vrot.lane.b32.xlu1 %v4948_v0, %s4719_s17  ;;  %v328_v13 = vpop.permute.xlu0 %327 }
  0x8b   : > { %v624_v14 = vsel %vm623_vm2, %v4769_v5, %v328_v13  ;;  %v4973_v5 = vld [vmem:[%s4754_s16 + $0xc8] sm:$0xff] }
  0x8c   : > { %v528_v15 = vpop.permute.xlu1 %527  ;;  %553 = vrot.lane.b32.xlu0 %v286_v11, %s4721_s21  ;;  %v657_v16 = vsel %vm656_vm1, %v624_v14, %v426_v7  ;;  %v288_v31 = vrot.slane %v4973_v5, 1  ;;  %v5018_v7 = vld [vmem:[%s4754_s16 + $0xd8] sm:$0xff] }
  0x8d   : > { %v690_v17 = vsel %vm689_vm3, %v657_v16, %v528_v15 }
  0x8e   : > { %355 = vrot.lane.b32.xlu1 %v284_v4, %s4720_s18  ;;  %4493 = vmatprep.mubr.msk.f32.mxu0 %vm724_vm4, %v690_v17  ;;  %v330_v18 = vpop.permute.xlu0 %329  ;;  %v1458_v33 = vrot.slane %v690_v17, 1  ;;  %v289_v2 = vsel %vm246_vm0, %v287_v40, %v288_v31  ;;  %v5015_v4 = vld [vmem:[%s4754_s16 + $0xe0] sm:$0xff] }
  0x8f   : > { %v625_v19 = vsel %vm623_vm2, %v4772_v6, %v330_v18  ;;  %v4984_v6 = vrot.slane %v4976_v25, 1 }
  0x90   : > { %v1299_v24 = vpop.permute.xlu1 %1298  ;;  %1358 = vrot.lane.b32.xlu0 %v285_v8, %s4721_s21  ;;  %v658_v26 = vsel %vm656_vm1, %v625_v19, %v428_v10  ;;  %v293_v10 = vrot.slane %v5015_v4, 1  ;;  %v5045_v19 = vld [vmem:[%s4754_s16 + $0xe8] sm:$0x3] }
  0x91   : > { %v1410_v41 = vsel %vm656_vm1, %v1394_v39, %v1299_v24  ;;  %v291_v47 = vsel %vm246_vm0, %v288_v31, %v4984_v6  ;;  %v295_v31 = vrot.slane %v5045_v19, 1 }
  0x92   : > { %453 = vrot.lane.b32.xlu1 %v4969_v23, %s4719_s17  ;;  %v530_v27 = vpop.permute.xlu0 %529 }
  0x93   : > { %v691_v30 = vsel %vm689_vm3, %v658_v26, %v530_v27  ;;  %v296_v39 = vsel %vm246_vm0, %v293_v10, %v295_v31 }
  0x94   : > { %v1459_v34 = vrot.slane %v691_v30, 1  ;;  %v332_v35 = vpop.permute.xlu1 %331  ;;  %357 = vrot.lane.b32.xlu0 %v286_v11, %s4720_s18  ;;  %4494 = vmatmul.mubr.msk.f32.vlgmr.msra.gmra.mxu0 %vm724_vm4, %v691_v30  ;;  %v292_v11 = vrot.slane %v5018_v7, 1 }
  0x95   : > { %v626_v59 = vsel %vm623_vm2, %v4757_v1, %v332_v35 }
  0x96   : > { %1264 = vrot.lane.b32.xlu1 %v285_v8, %s4720_s18  ;;  %v1347_v42 = vpop.permute.xlu0 %1346  ;;  %v1460_v43 = vsel %vm246_vm0, %v1458_v33, %v1459_v34  ;;  %v294_v26 = vsel %vm246_vm0, %v292_v11, %v293_v10 }
  0x97   : > { %v1426_v46 = vsel %vm689_vm3, %v1410_v41, %v1347_v42  ;;  %4545 = vmatprep.mubr.msk.f32.mxu1 %vm724_vm4, %v1460_v43 }
  0x98   : > { %v1461_v49 = vrot.slane %v1426_v46, 1  ;;  %v430_v50 = vpop.permute.xlu1 %429  ;;  %455 = vrot.lane.b32.xlu0 %v4973_v5, %s4719_s17 }
  0x9a   : > { %557 = vrot.lane.b32.xlu1 %v291_v47, %s4721_s21  ;;  %v334_v51 = vpop.permute.xlu0 %333  ;;  %v1462_v55 = vsel %vm246_vm0, %v1459_v34, %v1461_v49 }
  0x9b   : > { %4546 = vmatmul.mubr.msk.f32.vlgmr.msra.gmra.mxu1 %vm724_vm4, %v1462_v55  ;;  %v627_v57 = vsel %vm623_vm2, %v4763_v3, %v334_v51  ;;  %v659_v3 = vsel %vm656_vm1, %v626_v59, %v430_v50  ;;  %v5083_v50 = vld [vmem:[%s4754_s16 + $0xf8] sm:$0xff] }
  0x9c   : > { %v1253_v56 = vpop.permute.xlu1 %1252  ;;  %555 = vrot.lane.b32.xlu0 %v289_v2, %s4721_s21 }
  0x9d   : > { %v1395_v16 = vsel %vm623_vm2, %v4783_v12, %v1253_v56 }
  0x9e   : > { %1360 = vrot.lane.b32.xlu1 %v4984_v6, %s4721_s21  ;;  %v432_v58 = vpop.permute.xlu0 %431 }
  0x9f   : > { %v660_v62 = vsel %vm656_vm1, %v627_v57, %v432_v58  ;;  %v298_v57 = vrot.slane %v5083_v50, 1 }
  0xa0   : > { %v534_v63 = vpop.permute.xlu1 %533  ;;  %1312 = vrot.lane.b32.xlu0 %v4976_v25, %s4719_s17 }
  0xa1   : > { %v5021_v8 = vsel %vm689_vm3, %v660_v62, %v534_v63 }
  0xa2   : > { %361 = vrot.lane.b32.xlu1 %v291_v47, %s4720_s18  ;;  %v532_v9 = vpop.permute.xlu0 %531  ;;  %v1464_v13 = vrot.slane %v5021_v8, 1  ;;  %v5079_v47 = vld [vmem:[%s4754_s16 + $0xf0] sm:$0xff] }
  0xa3   : > { %v5026_v1 = vsel %vm689_vm3, %v659_v3, %v532_v9 }
  0xa4   : > { %v1463_v14 = vrot.slane %v5026_v1, 1  ;;  %v1349_v15 = vpop.permute.xlu1 %1348  ;;  %359 = vrot.lane.b32.xlu0 %v289_v2, %s4720_s18  ;;  %4496 = vmatprep.mubr.msk.f32.mxu0 %vm724_vm4, %v5026_v1  ;;  %v5086_v2 = vld [vmem:[%s4754_s16 + $0x100] sm:$0x3] }
  0xa5   : > { %4497 = vmatmul.mubr.msk.f32.gmra.mxu0 %vm724_vm4, %v5021_v8  ;;  %v5098_v58 = vrot.slane %v5086_v2, 1 }
  0xa6   : > { %459 = vrot.lane.b32.xlu1 %v5015_v4, %s4719_s17  ;;  %v1301_v17 = vpop.permute.xlu0 %1300  ;;  %v5042_v18 = vsel %vm246_vm0, %v1463_v14, %v1464_v13 }
  0xa7   : > { %v1411_v24 = vsel %vm656_vm1, %v1395_v16, %v1301_v17  ;;  %4548 = vmatprep.mubr.msk.f32.mxu1 %vm724_vm4, %v5042_v18 }
  0xa8   : > { %v1427_v27 = vsel %vm689_vm3, %v1411_v24, %v1349_v15  ;;  %v338_v30 = vpop.permute.xlu1 %337  ;;  %457 = vrot.lane.b32.xlu0 %v5018_v7, %s4719_s17 }
  0xa9   : > { %v1466_v12 = vrot.slane %v1427_v27, 1 }
  0xaa   : > { %559 = vrot.lane.b32.xlu1 %v294_v26, %s4721_s21  ;;  %v336_v33 = vpop.permute.xlu0 %335 }
  0xab   : > { %v5057_v34 = vsel %vm246_vm0, %v1464_v13, %v1466_v12  ;;  %v628_v40 = vsel %vm623_vm2, %v4806_v20, %v336_v33  ;;  %v629_v20 = vsel %vm623_vm2, %v4810_v21, %v338_v30  ;;  %v301_v13 = vsel %vm246_vm0, %v298_v57, %v5098_v58 }
  0xac   : > { %v436_v35 = vpop.permute.xlu1 %435  ;;  %1266 = vrot.lane.b32.xlu0 %v4984_v6, %s4720_s18  ;;  %4549 = vmatmul.mubr.msk.f32.gmra.mxu1 %vm724_vm4, %v5057_v34 }
  0xad   : > { %v662_v51 = vsel %vm656_vm1, %v629_v20, %v436_v35  ;;  %v5136_v35 = vld [vmem:[%s4754_s16 + $0x110] sm:$0xff] }
  0xae   : > { %1314 = vrot.lane.b32.xlu1 %v5045_v19, %s4719_s17  ;;  %v434_v41 = vpop.permute.xlu0 %433 }
  0xaf   : > { %v661_v42 = vsel %vm656_vm1, %v628_v40, %v434_v41 }
  0xb0   : > { %v536_v43 = vpop.permute.xlu1 %535  ;;  %561 = vrot.lane.b32.xlu0 %v296_v39, %s4721_s21 }
  0xb1   : > { %v5071_v6 = vsel %vm689_vm3, %v661_v42, %v536_v43  ;;  %v303_v42 = vrot.slane %v5136_v35, 1 }
  0xb2   : > { %363 = vrot.lane.b32.xlu1 %v294_v26, %s4720_s18  ;;  %4499 = vmatprep.mubr.msk.f32.mxu0 %vm724_vm4, %v5071_v6  ;;  %v1255_v46 = vpop.permute.xlu0 %1254  ;;  %v1468_v59 = vrot.slane %v5071_v6, 1 }
  0xb3   : > { %v1396_v56 = vsel %vm623_vm2, %v4813_v22, %v1255_v46  ;;  %v297_v22 = vrot.slane %v5079_v47, 1 }
  0xb4   : > { %v1303_v49 = vpop.permute.xlu1 %1302  ;;  %1362 = vrot.lane.b32.xlu0 %v295_v31, %s4721_s21 }
  0xb5   : > { %v1412_v3 = vsel %vm656_vm1, %v1396_v56, %v1303_v49  ;;  %v299_v16 = vsel %vm246_vm0, %v297_v22, %v298_v57  ;;  %v5166_v57 = vld [vmem:[%s4754_s16 + $0x118] sm:$0x3] }
  0xb6   : > { %461 = vrot.lane.b32.xlu1 %v5079_v47, %s4719_s17  ;;  %v538_v55 = vpop.permute.xlu0 %537 }
  0xb7   : > { %v5094_v21 = vsel %vm689_vm3, %v662_v51, %v538_v55 }
  0xb8   : > { %v1469_v62 = vrot.slane %v5094_v21, 1  ;;  %v340_v63 = vpop.permute.xlu1 %339  ;;  %365 = vrot.lane.b32.xlu0 %v296_v39, %s4720_s18  ;;  %4500 = vmatmul.mubr.msk.f32.gmra.mxu0 %vm724_vm4, %v5094_v21  ;;  %v5139_v39 = vld [vmem:[%s4754_s16 + $0x108] sm:$0xff] }
  0xb9   : > { %v630_v12 = vsel %vm623_vm2, %v4835_v29, %v340_v63  ;;  %v302_v43 = vrot.slane %v5139_v39, 1 }
  0xba   : > { %1268 = vrot.lane.b32.xlu1 %v295_v31, %s4720_s18  ;;  %v1351_v9 = vpop.permute.xlu0 %1350  ;;  %v5109_v10 = vsel %vm246_vm0, %v1468_v59, %v1469_v62 }
  0xbb   : > { %v1428_v11 = vsel %vm689_vm3, %v1412_v3, %v1351_v9  ;;  %4551 = vmatprep.mubr.msk.f32.mxu1 %vm724_vm4, %v5109_v10  ;;  %v305_v3 = vrot.slane %v5166_v57, 1 }
  0xbc   : > { %v1471_v14 = vrot.slane %v1428_v11, 1  ;;  %v438_v15 = vpop.permute.xlu1 %437  ;;  %463 = vrot.lane.b32.xlu0 %v5083_v50, %s4719_s17 }
  0xbe   : > { %565 = vrot.lane.b32.xlu1 %v301_v13, %s4721_s21  ;;  %v342_v17 = vpop.permute.xlu0 %341  ;;  %v5121_v24 = vsel %vm246_vm0, %v1469_v62, %v1471_v14  ;;  %v304_v62 = vsel %vm246_vm0, %v302_v43, %v303_v42  ;;  %v306_v14 = vsel %vm246_vm0, %v303_v42, %v305_v3 }
  0xbf   : > { %4552 = vmatmul.mubr.msk.f32.gmra.mxu1 %vm724_vm4, %v5121_v24  ;;  %v631_v27 = vsel %vm623_vm2, %v4832_v28, %v342_v17  ;;  %v663_v28 = vsel %vm656_vm1, %v630_v12, %v438_v15 }
  0xc0   : > { %v1257_v26 = vpop.permute.xlu1 %1256  ;;  %563 = vrot.lane.b32.xlu0 %v299_v16, %s4721_s21 }
  0xc1   : > { %v1397_v51 = vsel %vm623_vm2, %v4844_v32, %v1257_v26 }
  0xc2   : > { %1364 = vrot.lane.b32.xlu1 %v5098_v58, %s4721_s21  ;;  %v440_v30 = vpop.permute.xlu0 %439 }
  0xc3   : > { %v664_v31 = vsel %vm656_vm1, %v631_v27, %v440_v30  ;;  %v5200_v30 = vld [vmem:[%s4754_s16 + $0x120] sm:$0xff] }
  0xc4   : > { %v542_v33 = vpop.permute.xlu1 %541  ;;  %1316 = vrot.lane.b32.xlu0 %v5086_v2, %s4719_s17 }
  0xc5   : > { %v5142_v40 = vsel %vm689_vm3, %v664_v31, %v542_v33  ;;  %v5204_v31 = vld [vmem:[%s4754_s16 + $0x128] sm:$0xff]  ;;  %v5207_v33 = vld [vmem:[%s4754_s16 + $0x130] sm:$0x3] }
  0xc6   : > { %369 = vrot.lane.b32.xlu1 %v301_v13, %s4720_s18  ;;  %v540_v41 = vpop.permute.xlu0 %539  ;;  %v1474_v46 = vrot.slane %v5142_v40, 1  ;;  %v308_v43 = vrot.slane %v5204_v31, 1 }
  0xc7   : > { %v5147_v29 = vsel %vm689_vm3, %v663_v28, %v540_v41 }
  0xc8   : > { %v1473_v20 = vrot.slane %v5147_v29, 1  ;;  %v1353_v49 = vpop.permute.xlu1 %1352  ;;  %367 = vrot.lane.b32.xlu0 %v299_v16, %s4720_s18  ;;  %4502 = vmatprep.mubr.msk.f32.mxu0 %vm724_vm4, %v5147_v29 }
  0xc9   : > { %4503 = vmatmul.mubr.msk.f32.gmra.mxu0 %vm724_vm4, %v5142_v40 }
  0xca   : > { %467 = vrot.lane.b32.xlu1 %v5136_v35, %s4719_s17  ;;  %v1305_v55 = vpop.permute.xlu0 %1304  ;;  %v5163_v56 = vsel %vm246_vm0, %v1473_v20, %v1474_v46 }
  0xcb   : > { %v1413_v59 = vsel %vm656_vm1, %v1397_v51, %v1305_v55  ;;  %4554 = vmatprep.mubr.msk.f32.mxu1 %vm724_vm4, %v5163_v56 }
  0xcc   : > { %v1429_v63 = vsel %vm689_vm3, %v1413_v59, %v1353_v49  ;;  %v346_v22 = vpop.permute.xlu1 %345  ;;  %465 = vrot.lane.b32.xlu0 %v5139_v39, %s4719_s17 }
  0xcd   : > { %v1476_v32 = vrot.slane %v1429_v63, 1 }
  0xce   : > { %567 = vrot.lane.b32.xlu1 %v304_v62, %s4721_s21  ;;  %v344_v9 = vpop.permute.xlu0 %343 }
  0xcf   : > { %v5178_v11 = vsel %vm246_vm0, %v1474_v46, %v1476_v32  ;;  %v632_v15 = vsel %vm623_vm2, %v4858_v36, %v344_v9  ;;  %v633_v36 = vsel %vm623_vm2, %v4862_v37, %v346_v22  ;;  %v5219_v46 = vrot.slane %v5207_v33, 1 }
  0xd0   : > { %v444_v13 = vpop.permute.xlu1 %443  ;;  %1270 = vrot.lane.b32.xlu0 %v5098_v58, %s4720_s18  ;;  %4555 = vmatmul.mubr.msk.f32.gmra.mxu1 %vm724_vm4, %v5178_v11 }
  0xd1   : > { %v666_v28 = vsel %vm656_vm1, %v633_v36, %v444_v13  ;;  %v311_v22 = vsel %vm246_vm0, %v308_v43, %v5219_v46 }
  0xd2   : > { %1318 = vrot.lane.b32.xlu1 %v5166_v57, %s4719_s17  ;;  %v442_v16 = vpop.permute.xlu0 %441 }
  0xd3   : > { %v665_v17 = vsel %vm656_vm1, %v632_v15, %v442_v16 }
  0xd4   : > { %v544_v26 = vpop.permute.xlu1 %543  ;;  %569 = vrot.lane.b32.xlu0 %v306_v14, %s4721_s21 }
  0xd5   : > { %v5192_v58 = vsel %vm689_vm3, %v665_v17, %v544_v26 }
  0xd6   : > { %371 = vrot.lane.b32.xlu1 %v304_v62, %s4720_s18  ;;  %4505 = vmatprep.mubr.msk.f32.mxu0 %vm724_vm4, %v5192_v58  ;;  %v1259_v27 = vpop.permute.xlu0 %1258  ;;  %v1478_v20 = vrot.slane %v5192_v58, 1 }
  0xd7   : > { %v1398_v42 = vsel %vm623_vm2, %v4865_v38, %v1259_v27  ;;  %v307_v38 = vrot.slane %v5200_v30, 1 }
  0xd8   : > { %v1307_v12 = vpop.permute.xlu1 %1306  ;;  %1366 = vrot.lane.b32.xlu0 %v305_v3, %s4721_s21 }
  0xd9   : > { %v1414_v55 = vsel %vm656_vm1, %v1398_v42, %v1307_v12  ;;  %v5257_v12 = vld [vmem:[%s4754_s16 + $0x140] sm:$0xff] }
  0xda   : > { %469 = vrot.lane.b32.xlu1 %v5200_v30, %s4719_s17  ;;  %v546_v41 = vpop.permute.xlu0 %545 }
  0xdb   : > { %v5215_v37 = vsel %vm689_vm3, %v666_v28, %v546_v41  ;;  %v5260_v28 = vld [vmem:[%s4754_s16 + $0x138] sm:$0xff] }
  0xdc   : > { %v1479_v49 = vrot.slane %v5215_v37, 1  ;;  %v348_v51 = vpop.permute.xlu1 %347  ;;  %373 = vrot.lane.b32.xlu0 %v306_v14, %s4720_s18  ;;  %4506 = vmatmul.mubr.msk.f32.gmra.mxu0 %vm724_vm4, %v5215_v37 }
  0xdd   : > { %v634_v26 = vsel %vm623_vm2, %v4887_v45, %v348_v51 }
  0xde   : > { %1272 = vrot.lane.b32.xlu1 %v305_v3, %s4720_s18  ;;  %v1355_v59 = vpop.permute.xlu0 %1354  ;;  %v5230_v62 = vsel %vm246_vm0, %v1478_v20, %v1479_v49  ;;  %v309_v3 = vsel %vm246_vm0, %v307_v38, %v308_v43  ;;  %v313_v43 = vrot.slane %v5257_v12, 1  ;;  %v312_v20 = vrot.slane %v5260_v28, 1 }
  0xdf   : > { %v1430_v63 = vsel %vm689_vm3, %v1414_v55, %v1355_v59  ;;  %4557 = vmatprep.mubr.msk.f32.mxu1 %vm724_vm4, %v5230_v62 }
  0xe0   : > { %v1481_v32 = vrot.slane %v1430_v63, 1  ;;  %v446_v9 = vpop.permute.xlu1 %445  ;;  %471 = vrot.lane.b32.xlu0 %v5204_v31, %s4719_s17 }
  0xe2   : > { %573 = vrot.lane.b32.xlu1 %v311_v22, %s4721_s21  ;;  %v350_v13 = vpop.permute.xlu0 %349  ;;  %v5242_v14 = vsel %vm246_vm0, %v1479_v49, %v1481_v32 }
  0xe3   : > { %4558 = vmatmul.mubr.msk.f32.gmra.mxu1 %vm724_vm4, %v5242_v14  ;;  %v635_v16 = vsel %vm623_vm2, %v4884_v44, %v350_v13  ;;  %v667_v44 = vsel %vm656_vm1, %v634_v26, %v446_v9  ;;  %v314_v9 = vsel %vm246_vm0, %v312_v20, %v313_v43 }
  0xe4   : > { %v1261_v15 = vpop.permute.xlu1 %1260  ;;  %571 = vrot.lane.b32.xlu0 %v309_v3, %s4721_s21 }
  0xe5   : > { %v1399_v55 = vsel %vm623_vm2, %v4896_v48, %v1261_v15  ;;  %v4027_v48 = vld [vmem:[%s8203_s1 + $0x28] sm:$0xff] }
  0xe6   : > { %1368 = vrot.lane.b32.xlu1 %v5219_v46, %s4721_s21  ;;  %v448_v17 = vpop.permute.xlu0 %447  ;;  %4593 = vmatprep.subr.mxu0 %v4027_v48 }
  0xe7   : > { %v668_v27 = vsel %vm656_vm1, %v635_v16, %v448_v17  ;;  %4594 = vmatpush3.msra.mxu0 %v4027_v48 }
  0xe8   : > { %v550_v36 = vpop.permute.xlu1 %549  ;;  %1320 = vrot.lane.b32.xlu0 %v5207_v33, %s4719_s17 }
  0xe9   : > { %v5263_v41 = vsel %vm689_vm3, %v668_v27, %v550_v36 }
  0xea   : > { %377 = vrot.lane.b32.xlu1 %v311_v22, %s4720_s18  ;;  %v548_v42 = vpop.permute.xlu0 %547  ;;  %v1484_v49 = vrot.slane %v5263_v41, 1  ;;  %v5287_v22 = vld [vmem:[%s4754_s16 + $0x148] sm:$0x3] }
  0xeb   : > { %v5268_v45 = vsel %vm689_vm3, %v667_v44, %v548_v42  ;;  %v315_v17 = vrot.slane %v5287_v22, 1 }
  0xec   : > { %v1483_v51 = vrot.slane %v5268_v45, 1  ;;  %v1357_v38 = vpop.permute.xlu1 %1356  ;;  %375 = vrot.lane.b32.xlu0 %v309_v3, %s4720_s18  ;;  %4508 = vmatprep.mubr.msk.f32.mxu0 %vm724_vm4, %v5268_v45  ;;  %v4093_v3 = vld [vmem:[%s8203_s1 + $0x38] sm:$0xff] }
  0xed   : > { %4509 = vmatmul.mubr.msk.f32.gmra.mxu0 %vm724_vm4, %v5263_v41  ;;  %4645 = vmatprep.subr.mxu1 %v4093_v3  ;;  %v316_v44 = vsel %vm246_vm0, %v313_v43, %v315_v17 }
  0xee   : > { %475 = vrot.lane.b32.xlu1 %v5257_v12, %s4719_s17  ;;  %v1309_v59 = vpop.permute.xlu0 %1308  ;;  %v5284_v63 = vsel %vm246_vm0, %v1483_v51, %v1484_v49  ;;  %4646 = vmatpush3.msra.mxu1 %v4093_v3 }
  0xef   : > { %v1415_v32 = vsel %vm656_vm1, %v1399_v55, %v1309_v59  ;;  %4560 = vmatprep.mubr.msk.f32.mxu1 %vm724_vm4, %v5284_v63  ;;  %v5331_v59 = vld [vmem:[%s4754_s16 + $0x158] sm:$0xff] }
  0xf0   : > { %v1431_v13 = vsel %vm689_vm3, %v1415_v32, %v1357_v38  ;;  %v354_v15 = vpop.permute.xlu1 %353  ;;  %473 = vrot.lane.b32.xlu0 %v5260_v28, %s4719_s17  ;;  %v5327_v38 = vld [vmem:[%s4754_s16 + $0x150] sm:$0xff]  ;;  %v5334_v32 = vld [vmem:[%s4754_s16 + $0x160] sm:$0x3] }
  0xf1   : > { %v1486_v16 = vrot.slane %v1431_v13, 1  ;;  %v318_v13 = vrot.slane %v5331_v59, 1 }
  0xf2   : > { %575 = vrot.lane.b32.xlu1 %v314_v9, %s4721_s21  ;;  %v352_v26 = vpop.permute.xlu0 %351 }
  0xf3   : > { %v5305_v27 = vsel %vm246_vm0, %v1484_v49, %v1486_v16  ;;  %v636_v42 = vsel %vm623_vm2, %v4910_v52, %v352_v26  ;;  %v637_v52 = vsel %vm623_vm2, %v4914_v53, %v354_v15  ;;  %v5346_v15 = vrot.slane %v5334_v32, 1 }
  0xf4   : > { %v452_v36 = vpop.permute.xlu1 %451  ;;  %1274 = vrot.lane.b32.xlu0 %v5219_v46, %s4720_s18  ;;  %4561 = vmatmul.mubr.msk.f32.gmra.mxu1 %vm724_vm4, %v5305_v27 }
  0xf5   : > { %v670_v48 = vsel %vm656_vm1, %v637_v52, %v452_v36 }
  0xf6   : > { %1322 = vrot.lane.b32.xlu1 %v5287_v22, %s4719_s17  ;;  %v450_v20 = vpop.permute.xlu0 %449 }
  0xf7   : > { %v669_v49 = vsel %vm656_vm1, %v636_v42, %v450_v20 }
  0xf8   : > { %v552_v51 = vpop.permute.xlu1 %551  ;;  %577 = vrot.lane.b32.xlu0 %v316_v44, %s4721_s21 }
  0xf9   : > { %v5319_v46 = vsel %vm689_vm3, %v669_v49, %v552_v51 }
  0xfa   : > { %379 = vrot.lane.b32.xlu1 %v314_v9, %s4720_s18  ;;  %4511 = vmatprep.mubr.msk.f32.mxu0 %vm724_vm4, %v5319_v46  ;;  %v1263_v43 = vpop.permute.xlu0 %1262  ;;  %v1488_v16 = vrot.slane %v5319_v46, 1 }
  0xfb   : > { %v1400_v3 = vsel %vm623_vm2, %v4917_v54, %v1263_v43  ;;  %v317_v54 = vrot.slane %v5327_v38, 1 }
  0xfc   : > { %v1311_v55 = vpop.permute.xlu1 %1310  ;;  %1370 = vrot.lane.b32.xlu0 %v315_v17, %s4721_s21 }
  0xfd   : > { %v1416_v42 = vsel %vm656_vm1, %v1400_v3, %v1311_v55 }
  0xfe   : > { %477 = vrot.lane.b32.xlu1 %v5327_v38, %s4719_s17  ;;  %v554_v9 = vpop.permute.xlu0 %553 }
  0xff   : > { %v5342_v53 = vsel %vm689_vm3, %v670_v48, %v554_v9 }
 0x100   : > { %v1489_v26 = vrot.slane %v5342_v53, 1  ;;  %v356_v36 = vpop.permute.xlu1 %355  ;;  %381 = vrot.lane.b32.xlu0 %v316_v44, %s4720_s18  ;;  %4512 = vmatmul.mubr.msk.f32.gmra.mxu0 %vm724_vm4, %v5342_v53  ;;  %v321_v44 = vsel %vm246_vm0, %v318_v13, %v5346_v15 }
 0x102   : > { %1276 = vrot.lane.b32.xlu1 %v315_v17, %s4720_s18  ;;  %v1359_v20 = vpop.permute.xlu0 %1358  ;;  %v5357_v49 = vsel %vm246_vm0, %v1488_v16, %v1489_v26  ;;  %v319_v17 = vsel %vm246_vm0, %v317_v54, %v318_v13  ;;  %v638_v13 = vsel %vm623_vm2, %v4939_v61, %v356_v36 }
 0x103   : > { %8225 = vst [vmem:[#allocation2_spill] sm:$0xff] %v5357_v49  ;;  %v1432_v51 = vsel %vm689_vm3, %v1416_v42, %v1359_v20  ;;  %4563 = vmatprep.mubr.msk.f32.mxu1 %vm724_vm4, %v5357_v49  ;;  %v5384_v42 = vld [vmem:[%s4754_s16 + $0x170] sm:$0xff]  ;;  %v5387_v20 = vld [vmem:[%s4754_s16 + $0x168] sm:$0xff] }
 0x104   : > { %v1491_v43 = vrot.slane %v1432_v51, 1  ;;  %v454_v52 = vpop.permute.xlu1 %453  ;;  %479 = vrot.lane.b32.xlu0 %v5331_v59, %s4719_s17  ;;  %v323_v36 = vrot.slane %v5384_v42, 1 }
 0x106   : > { %581 = vrot.lane.b32.xlu1 %v321_v44, %s4721_s21  ;;  %v358_v55 = vpop.permute.xlu0 %357  ;;  %v5369_v48 = vsel %vm246_vm0, %v1489_v26, %v1491_v43 }
 0x107   : > { %8226 = vst [vmem:[#allocation3_spill] sm:$0xff] %v5369_v48  ;;  %4564 = vmatmul.mubr.msk.f32.gmra.mxu1 %vm724_vm4, %v5369_v48  ;;  %v639_v3 = vsel %vm623_vm2, %v4936_v60, %v358_v55  ;;  %v671_v60 = vsel %vm656_vm1, %v638_v13, %v454_v52  ;;  %v322_v55 = vrot.slane %v5387_v20, 1 }
 0x108   : > { %v1265_v9 = vpop.permute.xlu1 %1264  ;;  %579 = vrot.lane.b32.xlu0 %v319_v17, %s4721_s21 }
 0x109   : > { %v1401_v52 = vsel %vm623_vm2, %v4948_v0, %v1265_v9  ;;  %v4092_v0 = vld [vmem:[%s8203_s1 + $0x30] sm:$0xff] }
 0x10a   : > { %1372 = vrot.lane.b32.xlu1 %v5346_v15, %s4721_s21  ;;  %v456_v16 = vpop.permute.xlu0 %455  ;;  %4647 = vmatprep.subr.mxu1 %v4092_v0 }
 0x10b   : > { %v672_v54 = vsel %vm656_vm1, %v639_v3, %v456_v16  ;;  %4648 = vmatpush3.msra.mxu1 %v4092_v0 }
 0x10c   : > { %v558_v26 = vpop.permute.xlu1 %557  ;;  %1324 = vrot.lane.b32.xlu0 %v5334_v32, %s4719_s17 }
 0x10d   : > { %v5390_v51 = vsel %vm689_vm3, %v672_v54, %v558_v26 }
 0x10e   : > { %385 = vrot.lane.b32.xlu1 %v321_v44, %s4720_s18  ;;  %v556_v43 = vpop.permute.xlu0 %555  ;;  %v1494_v3 = vrot.slane %v5390_v51, 1  ;;  %v4026_v44 = vld [vmem:[%s8203_s1 + $0x20] sm:$0xff] }
 0x10f   : > { %v5395_v61 = vsel %vm689_vm3, %v671_v60, %v556_v43  ;;  %4595 = vmatprep.subr.mxu0 %v4026_v44  ;;  %v324_v60 = vsel %vm246_vm0, %v322_v55, %v323_v36 }
 0x110   : > { %v1493_v16 = vrot.slane %v5395_v61, 1  ;;  %v1361_v48 = vpop.permute.xlu1 %1360  ;;  %383 = vrot.lane.b32.xlu0 %v319_v17, %s4720_s18  ;;  %4514 = vmatprep.mubr.msk.f32.mxu0 %vm724_vm4, %v5395_v61  ;;  %v5417_v17 = vld [vmem:[%s4754_s16 + $0x178] sm:$0x3] }
 0x111   : > { %4515 = vmatmul.mubr.msk.f32.gmra.mxu0 %vm724_vm4, %v5390_v51 }
 0x112   : > { %483 = vrot.lane.b32.xlu1 %v5384_v42, %s4719_s17  ;;  %v1313_v13 = vpop.permute.xlu0 %1312  ;;  %v5414_v54 = vsel %vm246_vm0, %v1493_v16, %v1494_v3  ;;  %4596 = vmatpush3.msra.mxu0 %v4026_v44 }
 0x113   : > { %8227 = vst [vmem:[#allocation4_spill] sm:$0xff] %v5414_v54  ;;  %v1417_v26 = vsel %vm656_vm1, %v1401_v52, %v1313_v13  ;;  %4566 = vmatprep.mubr.msk.f32.mxu1 %vm724_vm4, %v5414_v54  ;;  %v325_v52 = vrot.slane %v5417_v17, 1 }
 0x114   : > { %v1433_v9 = vsel %vm689_vm3, %v1417_v26, %v1361_v48  ;;  %v362_v43 = vpop.permute.xlu1 %361  ;;  %481 = vrot.lane.b32.xlu0 %v5387_v20, %s4719_s17 }
 0x115   : > { %v1496_v16 = vrot.slane %v1433_v9, 1  ;;  %v326_v48 = vsel %vm246_vm0, %v323_v36, %v325_v52 }
 0x116   : > { %583 = vrot.lane.b32.xlu1 %v324_v60, %s4721_s21  ;;  %v360_v13 = vpop.permute.xlu0 %359 }
 0x117   : > { %v5432_v55 = vsel %vm246_vm0, %v1494_v3, %v1496_v16  ;;  %v640_v26 = vsel %vm623_vm2, %v4969_v23, %v360_v13  ;;  %v641_v23 = vsel %vm623_vm2, %v4973_v5, %v362_v43  ;;  %v5454_v16 = vld [vmem:[%s4754_s16 + $0x180] sm:$0xff] }
 0x118   : > { %8228 = vst [vmem:[#allocation5_spill] sm:$0xff] %v5432_v55  ;;  %v460_v44 = vpop.permute.xlu1 %459  ;;  %1278 = vrot.lane.b32.xlu0 %v5346_v15, %s4720_s18  ;;  %4567 = vmatmul.mubr.msk.f32.gmra.mxu1 %vm724_vm4, %v5432_v55  ;;  %8230 = vst [vmem:[#allocation7_spill] sm:$0xff] %v5454_v16 }
 0x11a   : > { %1326 = vrot.lane.b32.xlu1 %v5417_v17, %s4719_s17  ;;  %v458_v3 = vpop.permute.xlu0 %457 }
 0x11b   : > { %v673_v0 = vsel %vm656_vm1, %v640_v26, %v458_v3  ;;  %v5458_v26 = vld [vmem:[%s4754_s16 + $0x188] sm:$0xff]  ;;  %v5461_v3 = vld [vmem:[%s4754_s16 + $0x190] sm:$0x3] }
 0x11c   : > { %v560_v9 = vpop.permute.xlu1 %559  ;;  %585 = vrot.lane.b32.xlu0 %v326_v48, %s4721_s21  ;;  %8231 = vst [vmem:[#allocation8_spill] sm:$0xff] %v5458_v26  ;;  %8232 = vst [vmem:[#allocation9_spill] sm:$0xff] %v5461_v3  ;;  %v523_v43 = vrot.slane %v5458_v26, 1  ;;  %v5473_v55 = vrot.slane %v5461_v3, 1 }
 0x11d   : > { %v5446_v15 = vsel %vm689_vm3, %v673_v0, %v560_v9  ;;  %v674_v0 = vsel %vm656_vm1, %v641_v23, %v460_v44 }
 0x11e   : > { %8229 = vst [vmem:[#allocation6_spill] sm:$0xff] %v5446_v15  ;;  %387 = vrot.lane.b32.xlu1 %v324_v60, %s4720_s18  ;;  %4517 = vmatprep.mubr.msk.f32.mxu0 %vm724_vm4, %v5446_v15  ;;  %v1267_v36 = vpop.permute.xlu0 %1266  ;;  %v1498_v54 = vrot.slane %v5446_v15, 1 }
 0x11f   : > { %v1402_v9 = vsel %vm623_vm2, %v4976_v25, %v1267_v36  ;;  %v522_v25 = vrot.slane %v5454_v16, 1 }
 0x120   : > { %v1315_v13 = vpop.permute.xlu1 %1314  ;;  %1374 = vrot.lane.b32.xlu0 %v325_v52, %s4721_s21 }
 0x121   : > { %v1418_v36 = vsel %vm656_vm1, %v1402_v9, %v1315_v13 }
 0x122   : > { %485 = vrot.lane.b32.xlu1 %v5454_v16, %s4719_s17  ;;  %v562_v60 = vpop.permute.xlu0 %561 }
 0x123   : > { %v5469_v5 = vsel %vm689_vm3, %v674_v0, %v562_v60 }
 0x124   : > { %8233 = vst [vmem:[#allocation10_spill] sm:$0xff] %v5469_v5  ;;  %v1499_v49 = vrot.slane %v5469_v5, 1  ;;  %v364_v44 = vpop.permute.xlu1 %363  ;;  %389 = vrot.lane.b32.xlu0 %v326_v48, %s4720_s18  ;;  %4518 = vmatmul.mubr.msk.f32.gmra.mxu0 %vm724_vm4, %v5469_v5  ;;  %v526_v48 = vsel %vm246_vm0, %v523_v43, %v5473_v55 }
 0x126   : > { %1280 = vrot.lane.b32.xlu1 %v325_v52, %s4720_s18  ;;  %v1363_v23 = vpop.permute.xlu0 %1362  ;;  %v5484_v0 = vsel %vm246_vm0, %v1498_v54, %v1499_v49  ;;  %v524_v52 = vsel %vm246_vm0, %v522_v25, %v523_v43  ;;  %v642_v43 = vsel %vm623_vm2, %v5018_v7, %v364_v44  ;;  %v196_v25 = vld [vmem:[%s4754_s16 + $0x1a0] sm:$0xff] }
 0x127   : > { %v1434_v60 = vsel %vm689_vm3, %v1418_v36, %v1363_v23  ;;  %4569 = vmatprep.mubr.msk.f32.mxu1 %vm724_vm4, %v5484_v0  ;;  %v2051_v44 = vrot.slane %v196_v25, 1 }
 0x128   : > { %v1501_v15 = vrot.slane %v1434_v60, 1  ;;  %v462_v5 = vpop.permute.xlu1 %461  ;;  %487 = vrot.lane.b32.xlu0 %v5458_v26, %s4719_s17 }
 0x129   : > { %v675_v26 = vsel %vm656_vm1, %v642_v43, %v462_v5  ;;  %v197_v43 = vld [vmem:[%s4754_s16 + $0x1a8] sm:$0x3] }
 0x12a   : > { %589 = vrot.lane.b32.xlu1 %v526_v48, %s4721_s21  ;;  %v366_v54 = vpop.permute.xlu0 %365  ;;  %v5496_v13 = vsel %vm246_vm0, %v1499_v49, %v1501_v15 }
 0x12b   : > { %8234 = vst [vmem:[#allocation11_spill] sm:$0xff] %v5496_v13  ;;  %4570 = vmatmul.mubr.msk.f32.gmra.mxu1 %vm724_vm4, %v5496_v13  ;;  %v643_v36 = vsel %vm623_vm2, %v5015_v4, %v366_v54  ;;  %v195_v54 = vld [vmem:[%s4754_s16 + $0x198] sm:$0xff] }
 0x12c   : > { %v1269_v9 = vpop.permute.xlu1 %1268  ;;  %587 = vrot.lane.b32.xlu0 %v524_v52, %s4721_s21  ;;  %v2050_v7 = vrot.slane %v195_v54, 1 }
 0x12d   : > { %v1403_v5 = vsel %vm623_vm2, %v5045_v19, %v1269_v9  ;;  %v2053_v9 = vrot.slane %v197_v43, 1 }
 0x12e   : > { %v464_v23 = vpop.permute.xlu0 %463  ;;  %1376 = vrot.lane.b32.xlu1 %v5473_v55, %s4721_s21 }
 0x12f   : > { %v676_v49 = vsel %vm656_vm1, %v643_v36, %v464_v23 }
 0x130   : > { %v566_v15 = vpop.permute.xlu1 %565  ;;  %1328 = vrot.lane.b32.xlu0 %v5461_v3, %s4719_s17 }
 0x131   : > { %v5512_v60 = vsel %vm689_vm3, %v676_v49, %v566_v15 }
 0x132   : > { %v564_v4 = vpop.permute.xlu0 %563  ;;  %2037 = vrot.lane.b32.xlu1 %v526_v48, %s4720_s18  ;;  %v1504_v36 = vrot.slane %v5512_v60, 1 }
 0x133   : > { %v5518_v16 = vsel %vm689_vm3, %v675_v26, %v564_v4 }
 0x134   : > { %v1503_v23 = vrot.slane %v5518_v16, 1  ;;  %v1365_v3 = vpop.permute.xlu1 %1364  ;;  %4520 = vmatprep.mubr.msk.f32.mxu0 %vm724_vm4, %v5518_v16  ;;  %2035 = vrot.lane.b32.xlu0 %v524_v52, %s4720_s18  ;;  %v2052_v52 = vsel %vm246_vm0, %v2050_v7, %v2051_v44 }
 0x135   : > { %4521 = vmatmul.mubr.msk.f32.gmra.mxu0 %vm724_vm4, %v5512_v60 }
 0x136   : > { %v1317_v26 = vpop.permute.xlu0 %1316  ;;  %v5530_v48 = vsel %vm246_vm0, %v1503_v23, %v1504_v36  ;;  %2045 = vrot.lane.b32.xlu1 %v196_v25, %s4719_s17 }
 0x137   : > { %v1419_v49 = vsel %vm656_vm1, %v1403_v5, %v1317_v26  ;;  %4572 = vmatprep.mubr.msk.f32.mxu1 %vm724_vm4, %v5530_v48 }
 0x138   : > { %v1435_v15 = vsel %vm689_vm3, %v1419_v49, %v1365_v3  ;;  %v370_v4 = vpop.permute.xlu1 %369  ;;  %2043 = vrot.lane.b32.xlu0 %v195_v54, %s4719_s17  ;;  %v2054_v3 = vsel %vm246_vm0, %v2051_v44, %v2053_v9 }
 0x139   : > { %v1506_v19 = vrot.slane %v1435_v15, 1  ;;  %v645_v44 = vsel %vm623_vm2, %v5083_v50, %v370_v4 }
 0x13a   : > { %v368_v13 = vpop.permute.xlu0 %367  ;;  %2055 = vrot.lane.b32.xlu1 %v2052_v52, %s4721_s21 }
 0x13b   : > { %v5542_v25 = vsel %vm246_vm0, %v1504_v36, %v1506_v19  ;;  %v644_v54 = vsel %vm623_vm2, %v5079_v47, %v368_v13 }
 0x13c   : > { %8235 = vst [vmem:[#allocation12_spill] sm:$0xff] %v5542_v25  ;;  %v468_v23 = vpop.permute.xlu1 %467  ;;  %4573 = vmatmul.mubr.msk.f32.gmra.mxu1 %vm724_vm4, %v5542_v25  ;;  %2506 = vrot.lane.b32.xlu0 %v5473_v55, %s4720_s18 }
 0x13d   : > { %v678_v47 = vsel %vm656_vm1, %v645_v44, %v468_v23 }
 0x13e   : > { %v466_v7 = vpop.permute.xlu0 %465  ;;  %2509 = vrot.lane.b32.xlu1 %v197_v43, %s4719_s17 }
 0x13f   : > { %v677_v5 = vsel %vm656_vm1, %v644_v54, %v466_v7 }
 0x140   : > { %v568_v26 = vpop.permute.xlu1 %567  ;;  %2057 = vrot.lane.b32.xlu0 %v2054_v3, %s4721_s21 }
 0x141   : > { %v5555_v36 = vsel %vm689_vm3, %v677_v5, %v568_v26 }
 0x142   : > { %4523 = vmatprep.mubr.msk.f32.mxu0 %vm724_vm4, %v5555_v36  ;;  %v1271_v55 = vpop.permute.xlu0 %1270  ;;  %v1508_v15 = vrot.slane %v5555_v36, 1 }
 0x143   : > { %v1404_v43 = vsel %vm623_vm2, %v5086_v2, %v1271_v55 }
 0x144   : > { %v1319_v49 = vpop.permute.xlu1 %1318  ;;  %2512 = vrot.lane.b32.xlu0 %v2053_v9, %s4721_s21 }
 0x145   : > { %v1420_v50 = vsel %vm656_vm1, %v1404_v43, %v1319_v49 }
 0x146   : > { %v570_v13 = vpop.permute.xlu0 %569 }
 0x147   : > { %v5566_v52 = vsel %vm689_vm3, %v678_v47, %v570_v13 }
 0x148   : > { %v1509_v19 = vrot.slane %v5566_v52, 1  ;;  %v372_v3 = vpop.permute.xlu1 %371  ;;  %4524 = vmatmul.mubr.msk.f32.gmra.mxu0 %vm724_vm4, %v5566_v52 }
 0x149   : > { %v646_v49 = vsel %vm623_vm2, %v5139_v39, %v372_v3 }
 0x14a   : > { %v1367_v4 = vpop.permute.xlu0 %1366  ;;  %v5574_v9 = vsel %vm246_vm0, %v1508_v15, %v1509_v19 }
 0x14b   : > { %8236 = vst [vmem:[#allocation13_spill] sm:$0xff] %v5574_v9  ;;  %v1436_v23 = vsel %vm689_vm3, %v1420_v50, %v1367_v4  ;;  %4575 = vmatprep.mubr.msk.f32.mxu1 %vm724_vm4, %v5574_v9 }
 0x14c   : > { %v1511_v2 = vrot.slane %v1436_v23, 1  ;;  %v470_v54 = vpop.permute.xlu1 %469 }
 0x14d   : > { %v679_v50 = vsel %vm656_vm1, %v646_v49, %v470_v54 }
 0x14e   : > { %v374_v7 = vpop.permute.xlu0 %373  ;;  %v5580_v5 = vsel %vm246_vm0, %v1509_v19, %v1511_v2 }
 0x14f   : > { %8237 = vst [vmem:[#allocation14_spill] sm:$0xff] %v5580_v5  ;;  %4576 = vmatmul.mubr.msk.f32.gmra.mxu1 %vm724_vm4, %v5580_v5  ;;  %v647_v55 = vsel %vm623_vm2, %v5136_v35, %v374_v7 }
 0x150   : > { %v1273_v26 = vpop.permute.xlu1 %1272 }
 0x152   : > { %v472_v44 = vpop.permute.xlu0 %471 }
 0x153   : > { %v680_v47 = vsel %vm656_vm1, %v647_v55, %v472_v44 }
 0x154   : > { %v574_v13 = vpop.permute.xlu1 %573  ;;  %v4495_v43 = vpop.f32.mrf.mxu0 }
 0x155   : > { %v5596_v15 = vsel %vm689_vm3, %v680_v47, %v574_v13  ;;  %v1117_v19 = vmul.f32 %v4495_v43, %v4495_v43  ;;  %1219 = vst.msk [vmem:[%s5588_s11 + $0x8] sm:$0xff] %vm656_vm1, %v4495_v43  ;;  %v1047_v35 = vsel %vm656_vm1, %v4495_v43, 0.0  ;;  %v1405_v13 = vsel %vm623_vm2, %v5166_v57, %v1273_v26 }
 0x156   : > { %8238 = vst [vmem:[#allocation15_spill] sm:$0xff] %v5596_v15  ;;  %v887_v4 = vpop.f32.mrf.mxu0  ;;  %v572_v23 = vpop.permute.xlu0 %571  ;;  %v1514_v3 = vrot.slane %v5596_v15, 1 }
 0x157   : > { %v1046_v2 = vsel %vm656_vm1, %v887_v4, 0.0  ;;  %v1116_v7 = vmul.f32 %v887_v4, %v887_v4  ;;  %1218 = vst.msk [vmem:[%s5588_s11] sm:$0xff] %vm656_vm1, %v887_v4  ;;  %v5606_v39 = vsel %vm689_vm3, %v679_v50, %v572_v23  ;;  %v1149_v54 = vsel %vm656_vm1, %v1117_v19, 0.0 }
 0x158   : > { %v1048_v55 = vadd.f32 %v1047_v35, %v1046_v2  ;;  %v1513_v44 = vrot.slane %v5606_v39, 1  ;;  %v1369_v47 = vpop.permute.xlu1 %1368  ;;  %4526 = vmatprep.mubr.msk.f32.mxu0 %vm724_vm4, %v5606_v39 }
 0x159   : > { %v1148_v49 = vsel %vm656_vm1, %v1116_v7, 0.0  ;;  %4527 = vmatmul.mubr.msk.f32.gmra.mxu0 %vm724_vm4, %v5596_v15 }
 0x15a   : > { %v1150_v43 = vadd.f32 %v1149_v54, %v1148_v49  ;;  %v1321_v50 = vpop.permute.xlu0 %1320  ;;  %v5619_v4 = vsel %vm246_vm0, %v1513_v44, %v1514_v3 }
 0x15b   : > { %8239 = vst [vmem:[#allocation16_spill] sm:$0xff] %v5619_v4  ;;  %v1421_v23 = vsel %vm656_vm1, %v1405_v13, %v1321_v50  ;;  %v4547_v35 = vpop.f32.mrf.mxu1  ;;  %4578 = vmatprep.mubr.msk.f32.mxu1 %vm724_vm4, %v5619_v4 }
 0x15c   : > { %v1437_v19 = vsel %vm689_vm3, %v1421_v23, %v1369_v47  ;;  %v1901_v2 = vmul.f32 %v4547_v35, %v4547_v35  ;;  %3995 = vst.msk [vmem:[%s5588_s11 + $0x108] sm:$0xff] %vm656_vm1, %v4547_v35  ;;  %v378_v7 = vpop.permute.xlu1 %377  ;;  %v1831_v26 = vsel %vm656_vm1, %v4547_v35, 0.0 }
 0x15d   : > { %v1516_v5 = vrot.slane %v1437_v19, 1  ;;  %v1671_v57 = vpop.f32.mrf.mxu1 }
 0x15e   : > { %v1830_v54 = vsel %vm656_vm1, %v1671_v57, 0.0  ;;  %v1900_v44 = vmul.f32 %v1671_v57, %v1671_v57  ;;  %3994 = vst.msk [vmem:[%s5588_s11 + $0x100] sm:$0xff] %vm656_vm1, %v1671_v57  ;;  %v376_v49 = vpop.permute.xlu0 %375  ;;  %v1933_v47 = vsel %vm656_vm1, %v1901_v2, 0.0 }
 0x15f   : > { %v1832_v13 = vadd.f32 %v1831_v26, %v1830_v54  ;;  %v5632_v50 = vsel %vm246_vm0, %v1514_v3, %v1516_v5  ;;  %v648_v19 = vsel %vm623_vm2, %v5200_v30, %v376_v49  ;;  %v649_v54 = vsel %vm623_vm2, %v5204_v31, %v378_v7 }
 0x160   : > { %8240 = vst [vmem:[#allocation17_spill] sm:$0xff] %v5632_v50  ;;  %v1932_v23 = vsel %vm656_vm1, %v1900_v44, 0.0  ;;  %v476_v4 = vpop.permute.xlu1 %475  ;;  %4579 = vmatmul.mubr.msk.f32.gmra.mxu1 %vm724_vm4, %v5632_v50 }
 0x161   : > { %v1934_v35 = vadd.f32 %v1933_v47, %v1932_v23 }
 0x162   : > { %v474_v9 = vpop.permute.xlu0 %473 }
 0x163   : > { %v681_v57 = vsel %vm656_vm1, %v648_v19, %v474_v9  ;;  %v682_v19 = vsel %vm656_vm1, %v649_v54, %v476_v4 }
 0x164   : > { %v576_v26 = vpop.permute.xlu1 %575 }
 0x165   : > { %v5642_v5 = vsel %vm689_vm3, %v681_v57, %v576_v26  ;;  %v4498_v3 = vpop.f32.mrf.mxu0 }
 0x166   : > { %8241 = vst [vmem:[#allocation18_spill] sm:$0xff] %v5642_v5  ;;  %1221 = vst.msk [vmem:[%s5588_s11 + $0x18] sm:$0xff] %vm656_vm1, %v4498_v3  ;;  %4529 = vmatprep.mubr.msk.f32.mxu0 %vm724_vm4, %v5642_v5  ;;  %v1275_v2 = vpop.permute.xlu0 %1274  ;;  %v1119_v47 = vmul.f32 %v4498_v3, %v4498_v3  ;;  %v1051_v57 = vsel %vm656_vm1, %v4498_v3, 0.0 }
 0x167   : > { %v897_v44 = vpop.f32.mrf.mxu0  ;;  %v1406_v31 = vsel %vm623_vm2, %v5207_v33, %v1275_v2 }
 0x168   : > { %v1049_v30 = vsel %vm656_vm1, %v897_v44, 0.0  ;;  %v1118_v49 = vmul.f32 %v897_v44, %v897_v44  ;;  %1220 = vst.msk [vmem:[%s5588_s11 + $0x10] sm:$0xff] %vm656_vm1, %v897_v44  ;;  %v1323_v9 = vpop.permute.xlu1 %1322  ;;  %v1518_v44 = vrot.slane %v5642_v5, 1 }
 0x169   : > { %v1050_v23 = vadd.f32 %v1049_v30, %v1048_v55  ;;  %v1153_v55 = vsel %vm656_vm1, %v1119_v47, 0.0 }
 0x16a   : > { %v1151_v26 = vsel %vm656_vm1, %v1118_v49, 0.0  ;;  %v578_v50 = vpop.permute.xlu0 %577 }
 0x16b   : > { %v1152_v7 = vadd.f32 %v1151_v26, %v1150_v43  ;;  %v5659_v15 = vsel %vm689_vm3, %v682_v19, %v578_v50  ;;  %v1052_v25 = vadd.f32 %v1051_v57, %v1050_v23  ;;  %v1422_v43 = vsel %vm656_vm1, %v1406_v31, %v1323_v9 }
 0x16c   : > { %8242 = vst [vmem:[#allocation19_spill] sm:$0xff] %v5659_v15  ;;  %v1519_v4 = vrot.slane %v5659_v15, 1  ;;  %v380_v54 = vpop.permute.xlu1 %379  ;;  %4530 = vmatmul.mubr.msk.f32.gmra.mxu0 %vm724_vm4, %v5659_v15  ;;  %v4550_v3 = vpop.f32.mrf.mxu1 }
 0x16d   : > { %3997 = vst.msk [vmem:[%s5588_s11 + $0x118] sm:$0xff] %vm656_vm1, %v4550_v3  ;;  %v1154_v33 = vadd.f32 %v1153_v55, %v1152_v7  ;;  %v1903_v49 = vmul.f32 %v4550_v3, %v4550_v3  ;;  %v1835_v9 = vsel %vm656_vm1, %v4550_v3, 0.0 }
 0x16e   : > { %v1681_v50 = vpop.f32.mrf.mxu1  ;;  %v1371_v2 = vpop.permute.xlu0 %1370  ;;  %v5670_v30 = vsel %vm246_vm0, %v1518_v44, %v1519_v4 }
 0x16f   : > { %v1833_v47 = vsel %vm656_vm1, %v1681_v50, 0.0  ;;  %v1902_v23 = vmul.f32 %v1681_v50, %v1681_v50  ;;  %3996 = vst.msk [vmem:[%s5588_s11 + $0x110] sm:$0xff] %vm656_vm1, %v1681_v50  ;;  %v1438_v19 = vsel %vm689_vm3, %v1422_v43, %v1371_v2  ;;  %4581 = vmatprep.mubr.msk.f32.mxu1 %vm724_vm4, %v5670_v30  ;;  %v1937_v50 = vsel %vm656_vm1, %v1903_v49, 0.0 }
 0x170   : > { %v1834_v57 = vadd.f32 %v1833_v47, %v1832_v13  ;;  %v1521_v26 = vrot.slane %v1438_v19, 1  ;;  %v478_v7 = vpop.permute.xlu1 %477 }
 0x171   : > { %v1935_v31 = vsel %vm656_vm1, %v1902_v23, 0.0 }
 0x172   : > { %v1936_v44 = vadd.f32 %v1935_v31, %v1934_v35  ;;  %v382_v55 = vpop.permute.xlu0 %381  ;;  %v5681_v15 = vsel %vm246_vm0, %v1519_v4, %v1521_v26  ;;  %v1836_v5 = vadd.f32 %v1835_v9, %v1834_v57  ;;  %v650_v35 = vsel %vm623_vm2, %v5260_v28, %v380_v54 }
 0x173   : > { %4582 = vmatmul.mubr.msk.f32.gmra.mxu1 %vm724_vm4, %v5681_v15  ;;  %v651_v3 = vsel %vm623_vm2, %v5257_v12, %v382_v55  ;;  %v683_v49 = vsel %vm656_vm1, %v650_v35, %v478_v7 }
 0x174   : > { %v1277_v43 = vpop.permute.xlu1 %1276  ;;  %v1938_v13 = vadd.f32 %v1937_v50, %v1936_v44 }
 0x176   : > { %v480_v2 = vpop.permute.xlu0 %479 }
 0x177   : > { %v684_v47 = vsel %vm656_vm1, %v651_v3, %v480_v2  ;;  %v1407_v2 = vsel %vm623_vm2, %v5287_v22, %v1277_v43 }
 0x178   : > { %v582_v4 = vpop.permute.xlu1 %581  ;;  %v4501_v23 = vpop.f32.mrf.mxu0 }
 0x179   : > { %v5692_v19 = vsel %vm689_vm3, %v684_v47, %v582_v4  ;;  %1223 = vst.msk [vmem:[%s5588_s11 + $0x28] sm:$0xff] %vm656_vm1, %v4501_v23  ;;  %v1121_v9 = vmul.f32 %v4501_v23, %v4501_v23  ;;  %v1055_v7 = vsel %vm656_vm1, %v4501_v23, 0.0 }
 0x17a   : > { %v907_v57 = vpop.f32.mrf.mxu0  ;;  %v580_v26 = vpop.permute.xlu0 %579  ;;  %v1524_v54 = vrot.slane %v5692_v19, 1 }
 0x17b   : > { %v1053_v12 = vsel %vm656_vm1, %v907_v57, 0.0  ;;  %v1120_v31 = vmul.f32 %v907_v57, %v907_v57  ;;  %1222 = vst.msk [vmem:[%s5588_s11 + $0x20] sm:$0xff] %vm656_vm1, %v907_v57  ;;  %v5701_v28 = vsel %vm689_vm3, %v683_v49, %v580_v26  ;;  %v1157_v49 = vsel %vm656_vm1, %v1121_v9, 0.0 }
 0x17c   : > { %v1054_v44 = vadd.f32 %v1053_v12, %v1052_v25  ;;  %v1523_v55 = vrot.slane %v5701_v28, 1  ;;  %v1373_v50 = vpop.permute.xlu1 %1372  ;;  %4532 = vmatprep.mubr.msk.f32.mxu0 %vm724_vm4, %v5701_v28 }
 0x17d   : > { %v1155_v3 = vsel %vm656_vm1, %v1120_v31, 0.0  ;;  %4533 = vmatmul.mubr.msk.f32.gmra.mxu0 %vm724_vm4, %v5692_v19 }
 0x17e   : > { %v1156_v35 = vadd.f32 %v1155_v3, %v1154_v33  ;;  %v1325_v47 = vpop.permute.xlu0 %1324  ;;  %v5714_v25 = vsel %vm246_vm0, %v1523_v55, %v1524_v54  ;;  %v1056_v4 = vadd.f32 %v1055_v7, %v1054_v44 }
 0x17f   : > { %8243 = vst [vmem:[#allocation20_spill] sm:$0xff] %v5714_v25  ;;  %v1423_v57 = vsel %vm656_vm1, %v1407_v2, %v1325_v47  ;;  %v4553_v23 = vpop.f32.mrf.mxu1  ;;  %4584 = vmatprep.mubr.msk.f32.mxu1 %vm724_vm4, %v5714_v25 }
 0x180   : > { %v1439_v26 = vsel %vm689_vm3, %v1423_v57, %v1373_v50  ;;  %3999 = vst.msk [vmem:[%s5588_s11 + $0x128] sm:$0xff] %vm656_vm1, %v4553_v23  ;;  %v386_v22 = vpop.permute.xlu1 %385  ;;  %v1158_v33 = vadd.f32 %v1157_v49, %v1156_v35  ;;  %v1905_v31 = vmul.f32 %v4553_v23, %v4553_v23  ;;  %v1839_v50 = vsel %vm656_vm1, %v4553_v23, 0.0 }
 0x181   : > { %v1526_v43 = vrot.slane %v1439_v26, 1  ;;  %v1691_v12 = vpop.f32.mrf.mxu1 }
 0x182   : > { %v1837_v55 = vsel %vm656_vm1, %v1691_v12, 0.0  ;;  %v1904_v44 = vmul.f32 %v1691_v12, %v1691_v12  ;;  %3998 = vst.msk [vmem:[%s5588_s11 + $0x120] sm:$0xff] %vm656_vm1, %v1691_v12  ;;  %v384_v9 = vpop.permute.xlu0 %383  ;;  %v1941_v57 = vsel %vm656_vm1, %v1905_v31, 0.0  ;;  %v653_v31 = vsel %vm623_vm2, %v5331_v59, %v386_v22 }
 0x183   : > { %v1838_v7 = vadd.f32 %v1837_v55, %v1836_v5  ;;  %v5727_v3 = vsel %vm246_vm0, %v1524_v54, %v1526_v43  ;;  %v652_v5 = vsel %vm623_vm2, %v5327_v38, %v384_v9 }
 0x184   : > { %8244 = vst [vmem:[#allocation21_spill] sm:$0xff] %v5727_v3  ;;  %v1939_v2 = vsel %vm656_vm1, %v1904_v44, 0.0  ;;  %v484_v47 = vpop.permute.xlu1 %483  ;;  %4585 = vmatmul.mubr.msk.f32.gmra.mxu1 %vm724_vm4, %v5727_v3 }
 0x185   : > { %v1940_v35 = vadd.f32 %v1939_v2, %v1938_v13  ;;  %v1840_v49 = vadd.f32 %v1839_v50, %v1838_v7 }
 0x186   : > { %v482_v26 = vpop.permute.xlu0 %481 }
 0x187   : > { %v685_v54 = vsel %vm656_vm1, %v652_v5, %v482_v26  ;;  %v1942_v43 = vadd.f32 %v1941_v57, %v1940_v35  ;;  %v686_v35 = vsel %vm656_vm1, %v653_v31, %v484_v47 }
 0x188   : > { %v584_v12 = vpop.permute.xlu1 %583 }
 0x189   : > { %v5738_v23 = vsel %vm689_vm3, %v685_v54, %v584_v12  ;;  %v4504_v55 = vpop.f32.mrf.mxu0 }
 0x18a   : > { %1225 = vst.msk [vmem:[%s5588_s11 + $0x38] sm:$0xff] %vm656_vm1, %v4504_v55  ;;  %4535 = vmatprep.mubr.msk.f32.mxu0 %vm724_vm4, %v5738_v23  ;;  %v1279_v13 = vpop.permute.xlu0 %1278  ;;  %v1123_v38 = vmul.f32 %v4504_v55, %v4504_v55  ;;  %v1059_v57 = vsel %vm656_vm1, %v4504_v55, 0.0 }
 0x18b   : > { %v917_v44 = vpop.f32.mrf.mxu0  ;;  %v1408_v59 = vsel %vm623_vm2, %v5334_v32, %v1279_v13 }
 0x18c   : > { %v1057_v9 = vsel %vm656_vm1, %v917_v44, 0.0  ;;  %v1122_v7 = vmul.f32 %v917_v44, %v917_v44  ;;  %1224 = vst.msk [vmem:[%s5588_s11 + $0x30] sm:$0xff] %vm656_vm1, %v917_v44  ;;  %v1327_v50 = vpop.permute.xlu1 %1326  ;;  %v1528_v44 = vrot.slane %v5738_v23, 1 }
 0x18d   : > { %v1058_v2 = vadd.f32 %v1057_v9, %v1056_v4  ;;  %v1161_v4 = vsel %vm656_vm1, %v1123_v38, 0.0 }
 0x18e   : > { %v1159_v5 = vsel %vm656_vm1, %v1122_v7, 0.0  ;;  %v586_v26 = vpop.permute.xlu0 %585 }
 0x18f   : > { %v1160_v22 = vadd.f32 %v1159_v5, %v1158_v33  ;;  %v5755_v54 = vsel %vm689_vm3, %v686_v35, %v586_v26  ;;  %v1060_v12 = vadd.f32 %v1059_v57, %v1058_v2  ;;  %v1424_v33 = vsel %vm656_vm1, %v1408_v59, %v1327_v50 }
 0x190   : > { %v1529_v47 = vrot.slane %v5755_v54, 1  ;;  %v388_v31 = vpop.permute.xlu1 %387  ;;  %4536 = vmatmul.mubr.msk.f32.gmra.mxu0 %vm724_vm4, %v5755_v54  ;;  %v4556_v55 = vpop.f32.mrf.mxu1 }
 0x191   : > { %4001 = vst.msk [vmem:[%s5588_s11 + $0x138] sm:$0xff] %vm656_vm1, %v4556_v55  ;;  %v1162_v32 = vadd.f32 %v1161_v4, %v1160_v22  ;;  %v1907_v2 = vmul.f32 %v4556_v55, %v4556_v55  ;;  %v1843_v50 = vsel %vm656_vm1, %v4556_v55, 0.0 }
 0x192   : > { %v1701_v13 = vpop.f32.mrf.mxu1  ;;  %v1375_v9 = vpop.permute.xlu0 %1374  ;;  %v5766_v7 = vsel %vm246_vm0, %v1528_v44, %v1529_v47 }
 0x193   : > { %v1841_v38 = vsel %vm656_vm1, %v1701_v13, 0.0  ;;  %v1906_v35 = vmul.f32 %v1701_v13, %v1701_v13  ;;  %4000 = vst.msk [vmem:[%s5588_s11 + $0x130] sm:$0xff] %vm656_vm1, %v1701_v13  ;;  %v1440_v57 = vsel %vm689_vm3, %v1424_v33, %v1375_v9  ;;  %4587 = vmatprep.mubr.msk.f32.mxu1 %vm724_vm4, %v5766_v7  ;;  %v1945_v13 = vsel %vm656_vm1, %v1907_v2, 0.0 }
 0x194   : > { %v1842_v5 = vadd.f32 %v1841_v38, %v1840_v49  ;;  %v1531_v26 = vrot.slane %v1440_v57, 1  ;;  %v486_v22 = vpop.permute.xlu1 %485 }
 0x195   : > { %v1943_v59 = vsel %vm656_vm1, %v1906_v35, 0.0 }
 0x196   : > { %v1944_v44 = vadd.f32 %v1943_v59, %v1942_v43  ;;  %v390_v4 = vpop.permute.xlu0 %389  ;;  %v5777_v3 = vsel %vm246_vm0, %v1529_v47, %v1531_v26  ;;  %v1844_v25 = vadd.f32 %v1843_v50, %v1842_v5  ;;  %v654_v43 = vsel %vm623_vm2, %v5387_v20, %v388_v31 }
 0x197   : > { %4588 = vmatmul.mubr.msk.f32.gmra.mxu1 %vm724_vm4, %v5777_v3  ;;  %v655_v55 = vsel %vm623_vm2, %v5384_v42, %v390_v4  ;;  %v687_v2 = vsel %vm656_vm1, %v654_v43, %v486_v22 }
 0x198   : > { %v1281_v33 = vpop.permute.xlu1 %1280  ;;  %v1946_v49 = vadd.f32 %v1945_v13, %v1944_v44 }
 0x19a   : > { %v488_v9 = vpop.permute.xlu0 %487 }
 0x19b   : > { %v688_v38 = vsel %vm656_vm1, %v655_v55, %v488_v9  ;;  %v1409_v9 = vsel %vm623_vm2, %v5417_v17, %v1281_v33 }
 0x19c   : > { %v590_v47 = vpop.permute.xlu1 %589  ;;  %v4507_v35 = vpop.f32.mrf.mxu0 }
 0x19d   : > { %v5788_v57 = vsel %vm689_vm3, %v688_v38, %v590_v47  ;;  %1227 = vst.msk [vmem:[%s5588_s11 + $0x48] sm:$0xff] %vm656_vm1, %v4507_v35  ;;  %v1125_v50 = vmul.f32 %v4507_v35, %v4507_v35  ;;  %v1063_v22 = vsel %vm656_vm1, %v4507_v35, 0.0 }
 0x19e   : > { %v927_v5 = vpop.f32.mrf.mxu0  ;;  %v588_v26 = vpop.permute.xlu0 %587  ;;  %v1534_v31 = vrot.slane %v5788_v57, 1 }
 0x19f   : > { %v1061_v42 = vsel %vm656_vm1, %v927_v5, 0.0  ;;  %v1124_v59 = vmul.f32 %v927_v5, %v927_v5  ;;  %1226 = vst.msk [vmem:[%s5588_s11 + $0x40] sm:$0xff] %vm656_vm1, %v927_v5  ;;  %v5797_v20 = vsel %vm689_vm3, %v687_v2, %v588_v26  ;;  %v1165_v35 = vsel %vm656_vm1, %v1125_v50, 0.0 }
 0x1a0   : > { %v1062_v44 = vadd.f32 %v1061_v42, %v1060_v12  ;;  %v1533_v4 = vrot.slane %v5797_v20, 1  ;;  %4538 = vmatprep.mubr.msk.f32.mxu0 %vm724_vm4, %v5797_v20  ;;  %v1377_v55 = vpop.permute.xlu1 %1376 }
 0x1a1   : > { %v1163_v13 = vsel %vm656_vm1, %v1124_v59, 0.0  ;;  %4539 = vmatmul.mubr.msk.f32.gmra.mxu0 %vm724_vm4, %v5788_v57 }
 0x1a2   : > { %v1164_v43 = vadd.f32 %v1163_v13, %v1162_v32  ;;  %4597 = vmatprep.mubr.msk.f32.mxu0 %vm724_vm4, %v5026_v1  ;;  %v1329_v12 = vpop.permute.xlu0 %1328  ;;  %v5812_v38 = vsel %vm246_vm0, %v1533_v4, %v1534_v31  ;;  %v1064_v47 = vadd.f32 %v1063_v22, %v1062_v44 }
 0x1a3   : > { %v1425_v2 = vsel %vm656_vm1, %v1409_v9, %v1329_v12  ;;  %v4559_v5 = vpop.f32.mrf.mxu1  ;;  %4590 = vmatprep.mubr.msk.f32.mxu1 %vm724_vm4, %v5812_v38 }
 0x1a4   : > { %v1441_v17 = vsel %vm689_vm3, %v1425_v2, %v1377_v55  ;;  %4003 = vst.msk [vmem:[%s5588_s11 + $0x148] sm:$0xff] %vm656_vm1, %v4559_v5  ;;  %v1166_v32 = vadd.f32 %v1165_v35, %v1164_v43  ;;  %v1909_v26 = vmul.f32 %v4559_v5, %v4559_v5  ;;  %v1847_v4 = vsel %vm656_vm1, %v4559_v5, 0.0  ;;  %v8245_v2 = vld [vmem:[#allocation2_spill] sm:$0xff]  ;;  %v8247_v5 = vld [vmem:[#allocation3_spill] sm:$0xff] }
 0x1a5   : > { %v1536_v1 = vrot.slane %v1441_v17, 1  ;;  %v1711_v33 = vpop.f32.mrf.mxu1  ;;  %4598 = vmatmul.mubr.msk.f32.vlgmr.msra.gmra.mxu0 %vm724_vm4, %v5021_v8 }
 0x1a6   : > { %v1845_v42 = vsel %vm656_vm1, %v1711_v33, 0.0  ;;  %v1908_v50 = vmul.f32 %v1711_v33, %v1711_v33  ;;  %4002 = vst.msk [vmem:[%s5588_s11 + $0x140] sm:$0xff] %vm656_vm1, %v1711_v33  ;;  %4600 = vmatprep.mubr.msk.f32.mxu0 %vm724_vm4, %v5071_v6 }
 0x1a7   : > { %v1846_v59 = vadd.f32 %v1845_v42, %v1844_v25  ;;  %v5829_v44 = vsel %vm246_vm0, %v1534_v31, %v1536_v1  ;;  %v1949_v25 = vsel %vm656_vm1, %v1909_v26, 0.0  ;;  %v8250_v26 = vld [vmem:[#allocation5_spill] sm:$0xff] }
 0x1a8   : > { %v1947_v22 = vsel %vm656_vm1, %v1908_v50, 0.0  ;;  %4591 = vmatmul.mubr.msk.f32.gmra.mxu1 %vm724_vm4, %v5829_v44 }
 0x1a9   : > { %v1948_v8 = vadd.f32 %v1947_v22, %v1946_v49  ;;  %4601 = vmatmul.mubr.msk.f32.gmra.mxu0 %vm724_vm4, %v5094_v21  ;;  %4649 = vmatprep.mubr.msk.f32.mxu1 %vm724_vm4, %v5042_v18  ;;  %v1848_v6 = vadd.f32 %v1847_v4, %v1846_v59 }
 0x1aa   : > { %4603 = vmatprep.mubr.msk.f32.mxu0 %vm724_vm4, %v5147_v29 }
 0x1ab   : > { %v1950_v31 = vadd.f32 %v1949_v25, %v1948_v8  ;;  %v2038_v25 = vpop.permute.xlu1 %2037 }
 0x1ac   : > { %4650 = vmatmul.mubr.msk.f32.vlgmr.msra.gmra.mxu1 %vm724_vm4, %v5057_v34 }
 0x1ad   : > { %v4510_v13 = vpop.f32.mrf.mxu0  ;;  %4604 = vmatmul.mubr.msk.f32.gmra.mxu0 %vm724_vm4, %v5142_v40  ;;  %4652 = vmatprep.mubr.msk.f32.mxu1 %vm724_vm4, %v5109_v10 }
 0x1ae   : > { %1229 = vst.msk [vmem:[%s5588_s11 + $0x58] sm:$0xff] %vm656_vm1, %v4510_v13  ;;  %4606 = vmatprep.mubr.msk.f32.mxu0 %vm724_vm4, %v5192_v58  ;;  %v1127_v21 = vmul.f32 %v4510_v13, %v4510_v13  ;;  %v1067_v10 = vsel %vm656_vm1, %v4510_v13, 0.0 }
 0x1af   : > { %v937_v18 = vpop.f32.mrf.mxu0 }
 0x1b0   : > { %v1065_v29 = vsel %vm656_vm1, %v937_v18, 0.0  ;;  %v1126_v49 = vmul.f32 %v937_v18, %v937_v18  ;;  %1228 = vst.msk [vmem:[%s5588_s11 + $0x50] sm:$0xff] %vm656_vm1, %v937_v18  ;;  %4653 = vmatmul.mubr.msk.f32.gmra.mxu1 %vm724_vm4, %v5121_v24  ;;  %v1169_v9 = vsel %vm656_vm1, %v1127_v21, 0.0 }
 0x1b1   : > { %v1066_v34 = vadd.f32 %v1065_v29, %v1064_v47  ;;  %4607 = vmatmul.mubr.msk.f32.gmra.mxu0 %vm724_vm4, %v5215_v37  ;;  %4655 = vmatprep.mubr.msk.f32.mxu1 %vm724_vm4, %v5163_v56 }
 0x1b2   : > { %v1167_v40 = vsel %vm656_vm1, %v1126_v49, 0.0  ;;  %4609 = vmatprep.mubr.msk.f32.mxu0 %vm724_vm4, %v5268_v45 }
 0x1b3   : > { %v1168_v58 = vadd.f32 %v1167_v40, %v1166_v32  ;;  %v1068_v55 = vadd.f32 %v1067_v10, %v1066_v34  ;;  %v8253_v34 = vld [vmem:[#allocation15_spill] sm:$0xff]  ;;  %v8254_v10 = vld [vmem:[#allocation13_spill] sm:$0xff] }
 0x1b4   : > { %v4562_v24 = vpop.f32.mrf.mxu1  ;;  %4656 = vmatmul.mubr.msk.f32.gmra.mxu1 %vm724_vm4, %v5178_v11 }
 0x1b5   : > { %4005 = vst.msk [vmem:[%s5588_s11 + $0x158] sm:$0xff] %vm656_vm1, %v4562_v24  ;;  %4610 = vmatmul.mubr.msk.f32.gmra.mxu0 %vm724_vm4, %v5263_v41  ;;  %4658 = vmatprep.mubr.msk.f32.mxu1 %vm724_vm4, %v5230_v62  ;;  %v1170_v56 = vadd.f32 %v1169_v9, %v1168_v58  ;;  %v1911_v45 = vmul.f32 %v4562_v24, %v4562_v24  ;;  %v1851_v41 = vsel %vm656_vm1, %v4562_v24, 0.0  ;;  %v8255_v58 = vld [vmem:[#allocation18_spill] sm:$0xff] }
 0x1b6   : > { %v1721_v37 = vpop.f32.mrf.mxu1  ;;  %4612 = vmatprep.mubr.msk.f32.mxu0 %vm724_vm4, %v5319_v46  ;;  %v8256_v24 = vld [vmem:[#allocation14_spill] sm:$0xff] }
 0x1b7   : > { %v1849_v43 = vsel %vm656_vm1, %v1721_v37, 0.0  ;;  %v1910_v12 = vmul.f32 %v1721_v37, %v1721_v37  ;;  %4004 = vst.msk [vmem:[%s5588_s11 + $0x150] sm:$0xff] %vm656_vm1, %v1721_v37  ;;  %v1953_v35 = vsel %vm656_vm1, %v1911_v45, 0.0  ;;  %v8257_v45 = vld [vmem:[#allocation19_spill] sm:$0xff] }
 0x1b8   : > { %v1850_v11 = vadd.f32 %v1849_v43, %v1848_v6  ;;  %4659 = vmatmul.mubr.msk.f32.gmra.mxu1 %vm724_vm4, %v5242_v14  ;;  %v8251_v6 = vld [vmem:[#allocation11_spill] sm:$0xff]  ;;  %v8258_v43 = vld [vmem:[#allocation16_spill] sm:$0xff] }
 0x1b9   : > { %v1951_v62 = vsel %vm656_vm1, %v1910_v12, 0.0  ;;  %4613 = vmatmul.mubr.msk.f32.gmra.mxu0 %vm724_vm4, %v5342_v53  ;;  %4661 = vmatprep.mubr.msk.f32.mxu1 %vm724_vm4, %v5284_v63  ;;  %v8246_v53 = vld [vmem:[#allocation6_spill] sm:$0xff] }
 0x1ba   : > { %v1952_v46 = vadd.f32 %v1951_v62, %v1950_v31  ;;  %4615 = vmatprep.mubr.msk.f32.mxu0 %vm724_vm4, %v5395_v61  ;;  %v1852_v47 = vadd.f32 %v1851_v41, %v1850_v11  ;;  %v8248_v61 = vld [vmem:[#allocation10_spill] sm:$0xff] }
 0x1bc   : > { %4662 = vmatmul.mubr.msk.f32.gmra.mxu1 %vm724_vm4, %v5305_v27  ;;  %v1954_v14 = vadd.f32 %v1953_v35, %v1952_v46  ;;  %v8249_v27 = vld [vmem:[#allocation4_spill] sm:$0xff] }
 0x1bd   : > { %4616 = vmatmul.mubr.msk.f32.gmra.mxu0 %vm724_vm4, %v5390_v51  ;;  %4664 = vmatprep.mubr.msk.f32.mxu1 %vm724_vm4, %v8245_v2 }
 0x1be   : > { %4618 = vmatprep.mubr.msk.f32.mxu0 %vm724_vm4, %v8246_v53 }
 0x1c0   : > { %v4513_v63 = vpop.f32.mrf.mxu0  ;;  %4665 = vmatmul.mubr.msk.f32.gmra.mxu1 %vm724_vm4, %v8247_v5 }
 0x1c1   : > { %1231 = vst.msk [vmem:[%s5588_s11 + $0x68] sm:$0xff] %vm656_vm1, %v4513_v63  ;;  %4619 = vmatmul.mubr.msk.f32.gmra.mxu0 %vm724_vm4, %v8248_v61  ;;  %4667 = vmatprep.mubr.msk.f32.mxu1 %vm724_vm4, %v8249_v27  ;;  %v1129_v51 = vmul.f32 %v4513_v63, %v4513_v63  ;;  %v1071_v42 = vsel %vm656_vm1, %v4513_v63, 0.0  ;;  %v8261_v63 = vld [vmem:[#allocation8_spill] sm:$0xff] }
 0x1c2   : > { %v947_v17 = vpop.f32.mrf.mxu0  ;;  %4621 = vmatprep.mubr.msk.f32.mxu0 %vm724_vm4, %v5518_v16  ;;  %v2036_v16 = vpop.permute.xlu0 %2035  ;;  %v2062_v5 = vsel %vm623_vm2, %v8261_v63, %v2038_v25 }
 0x1c3   : > { %v1069_v32 = vsel %vm656_vm1, %v947_v17, 0.0  ;;  %v1128_v1 = vmul.f32 %v947_v17, %v947_v17  ;;  %1230 = vst.msk [vmem:[%s5588_s11 + $0x60] sm:$0xff] %vm656_vm1, %v947_v17  ;;  %v1173_v22 = vsel %vm656_vm1, %v1129_v51, 0.0 }
 0x1c4   : > { %v1070_v33 = vadd.f32 %v1069_v32, %v1068_v55  ;;  %4668 = vmatmul.mubr.msk.f32.gmra.mxu1 %vm724_vm4, %v8250_v26  ;;  %v2046_v55 = vpop.permute.xlu1 %2045 }
 0x1c5   : > { %v1171_v50 = vsel %vm656_vm1, %v1128_v1, 0.0  ;;  %4622 = vmatmul.mubr.msk.f32.gmra.mxu0 %vm724_vm4, %v5512_v60  ;;  %4670 = vmatprep.mubr.msk.f32.mxu1 %vm724_vm4, %v5484_v0  ;;  %v2064_v1 = vsel %vm656_vm1, %v2062_v5, %v2046_v55 }
 0x1c6   : > { %v1172_v59 = vadd.f32 %v1171_v50, %v1170_v56  ;;  %4624 = vmatprep.mubr.msk.f32.mxu0 %vm724_vm4, %v5555_v36  ;;  %v1072_v4 = vadd.f32 %v1071_v42, %v1070_v33  ;;  %v2044_v21 = vpop.permute.xlu0 %2043  ;;  %v8263_v33 = vld [vmem:[#allocation9_spill] sm:$0xff] }
 0x1c7   : > { %v4565_v8 = vpop.f32.mrf.mxu1 }
 0x1c8   : > { %4007 = vst.msk [vmem:[%s5588_s11 + $0x168] sm:$0xff] %vm656_vm1, %v4565_v8  ;;  %4671 = vmatmul.mubr.msk.f32.gmra.mxu1 %vm724_vm4, %v8251_v6  ;;  %v1174_v60 = vadd.f32 %v1173_v22, %v1172_v59  ;;  %v1913_v0 = vmul.f32 %v4565_v8, %v4565_v8  ;;  %v1855_v29 = vsel %vm656_vm1, %v4565_v8, 0.0  ;;  %v2056_v41 = vpop.permute.xlu1 %2055  ;;  %v8264_v22 = vld [vmem:[#allocation21_spill] sm:$0xff] }
 0x1c9   : > { %v1731_v31 = vpop.f32.mrf.mxu1  ;;  %4625 = vmatmul.mubr.msk.f32.gmra.mxu0 %vm724_vm4, %v5566_v52  ;;  %4673 = vmatprep.mubr.msk.f32.mxu1 %vm724_vm4, %v5530_v48  ;;  %v8252_v52 = vld [vmem:[#allocation12_spill] sm:$0xff] }
 0x1ca   : > { %v1853_v36 = vsel %vm656_vm1, %v1731_v31, 0.0  ;;  %v1912_v13 = vmul.f32 %v1731_v31, %v1731_v31  ;;  %4006 = vst.msk [vmem:[%s5588_s11 + $0x160] sm:$0xff] %vm656_vm1, %v1731_v31  ;;  %4627 = vmatprep.mubr.msk.f32.mxu0 %vm724_vm4, %v5606_v39  ;;  %v1957_v39 = vsel %vm656_vm1, %v1913_v0, 0.0  ;;  %v2507_v56 = vpop.permute.xlu0 %2506 }
 0x1cb   : > { %v1854_v18 = vadd.f32 %v1853_v36, %v1852_v47  ;;  %v8259_v47 = vld [vmem:[#allocation17_spill] sm:$0xff]  ;;  %v2515_v26 = vsel %vm623_vm2, %v8263_v33, %v2507_v56 }
 0x1cc   : > { %v1955_v49 = vsel %vm656_vm1, %v1912_v13, 0.0  ;;  %4674 = vmatmul.mubr.msk.f32.gmra.mxu1 %vm724_vm4, %v8252_v52  ;;  %v2510_v42 = vpop.permute.xlu1 %2509 }
 0x1cd   : > { %v1956_v48 = vadd.f32 %v1955_v49, %v1954_v14  ;;  %4628 = vmatmul.mubr.msk.f32.gmra.mxu0 %vm724_vm4, %v8253_v34  ;;  %4676 = vmatprep.mubr.msk.f32.mxu1 %vm724_vm4, %v8254_v10  ;;  %v1856_v40 = vadd.f32 %v1855_v29, %v1854_v18  ;;  %v2516_v6 = vsel %vm656_vm1, %v2515_v26, %v2510_v42 }
 0x1ce   : > { %4630 = vmatprep.mubr.msk.f32.mxu0 %vm724_vm4, %v8255_v58  ;;  %v2058_v27 = vpop.permute.xlu0 %2057 }
 0x1cf   : > { %v1958_v9 = vadd.f32 %v1957_v39, %v1956_v48  ;;  %v2066_v8 = vsel %vm689_vm3, %v2064_v1, %v2058_v27 }
 0x1d0   : > { %4677 = vmatmul.mubr.msk.f32.gmra.mxu1 %vm724_vm4, %v8256_v24  ;;  %v2520_v18 = vrot.slane %v2066_v8, 1 }
 0x1d1   : > { %v4516_v37 = vpop.f32.mrf.mxu0  ;;  %4631 = vmatmul.mubr.msk.f32.gmra.mxu0 %vm724_vm4, %v8257_v45  ;;  %4679 = vmatprep.mubr.msk.f32.mxu1 %vm724_vm4, %v8258_v43 }
 0x1d2   : > { %1233 = vst.msk [vmem:[%s5588_s11 + $0x78] sm:$0xff] %vm656_vm1, %v4516_v37  ;;  %4633 = vmatprep.mubr.msk.f32.mxu0 %vm724_vm4, %v5701_v28  ;;  %v1131_v11 = vmul.f32 %v4516_v37, %v4516_v37  ;;  %v8260_v28 = vld [vmem:[#allocation7_spill] sm:$0xff]  ;;  %v1075_v2 = vsel %vm656_vm1, %v4516_v37, 0.0 }
 0x1d3   : > { %v957_v12 = vpop.f32.mrf.mxu0  ;;  %v2061_v14 = vsel %vm623_vm2, %v8260_v28, %v2036_v16 }
 0x1d4   : > { %v1073_v62 = vsel %vm656_vm1, %v957_v12, 0.0  ;;  %v1130_v46 = vmul.f32 %v957_v12, %v957_v12  ;;  %1232 = vst.msk [vmem:[%s5588_s11 + $0x70] sm:$0xff] %vm656_vm1, %v957_v12  ;;  %4680 = vmatmul.mubr.msk.f32.gmra.mxu1 %vm724_vm4, %v8259_v47  ;;  %v2063_v51 = vsel %vm656_vm1, %v2061_v14, %v2044_v21 }
 0x1d5   : > { %v1074_v35 = vadd.f32 %v1073_v62, %v1072_v4  ;;  %4634 = vmatmul.mubr.msk.f32.gmra.mxu0 %vm724_vm4, %v5692_v19  ;;  %4682 = vmatprep.mubr.msk.f32.mxu1 %vm724_vm4, %v5670_v30  ;;  %v1177_v19 = vsel %vm656_vm1, %v1131_v11, 0.0 }
 0x1d6   : > { %v1175_v53 = vsel %vm656_vm1, %v1130_v46, 0.0  ;;  %4636 = vmatprep.mubr.msk.f32.mxu0 %vm724_vm4, %v5738_v23  ;;  %v8262_v23 = vld [vmem:[#allocation20_spill] sm:$0xff] }
 0x1d7   : > { %v1176_v61 = vadd.f32 %v1175_v53, %v1174_v60  ;;  %v1076_v17 = vadd.f32 %v1075_v2, %v1074_v35  ;;  %v2513_v60 = vpop.permute.xlu0 %2512 }
 0x1d8   : > { %v4568_v30 = vpop.f32.mrf.mxu1  ;;  %4683 = vmatmul.mubr.msk.f32.gmra.mxu1 %vm724_vm4, %v5681_v15  ;;  %v2517_v21 = vsel %vm689_vm3, %v2516_v6, %v2513_v60 }
 0x1d9   : > { %4009 = vst.msk [vmem:[%s5588_s11 + $0x178] sm:$0xff] %vm656_vm1, %v4568_v30  ;;  %4637 = vmatmul.mubr.msk.f32.gmra.mxu0 %vm724_vm4, %v5755_v54  ;;  %4685 = vmatprep.mubr.msk.f32.mxu1 %vm724_vm4, %v8262_v23  ;;  %v1178_v32 = vadd.f32 %v1177_v19, %v1176_v61  ;;  %v1915_v15 = vmul.f32 %v4568_v30, %v4568_v30  ;;  %v1859_v25 = vsel %vm656_vm1, %v4568_v30, 0.0 }
 0x1da   : > { %v1741_v50 = vpop.f32.mrf.mxu1  ;;  %4639 = vmatprep.mubr.msk.f32.mxu0 %vm724_vm4, %v5797_v20  ;;  %v2065_v54 = vsel %vm689_vm3, %v2063_v51, %v2056_v41 }
 0x1db   : > { %v1857_v16 = vsel %vm656_vm1, %v1741_v50, 0.0  ;;  %v1914_v59 = vmul.f32 %v1741_v50, %v1741_v50  ;;  %4008 = vst.msk [vmem:[%s5588_s11 + $0x170] sm:$0xff] %vm656_vm1, %v1741_v50  ;;  %v1961_v36 = vsel %vm656_vm1, %v1915_v15, 0.0  ;;  %v2519_v13 = vrot.slane %v2065_v54, 1 }
 0x1dc   : > { %v1858_v4 = vadd.f32 %v1857_v16, %v1856_v40  ;;  %4686 = vmatmul.mubr.msk.f32.gmra.mxu1 %vm724_vm4, %v8264_v22 }
 0x1dd   : > { %v1959_v20 = vsel %vm656_vm1, %v1914_v59, 0.0  ;;  %4640 = vmatmul.mubr.msk.f32.gmra.mxu0 %vm724_vm4, %v5788_v57  ;;  %4688 = vmatprep.mubr.msk.f32.mxu1 %vm724_vm4, %v5766_v7  ;;  %v2522_v7 = vrot.slane %v2517_v21, 1  ;;  %v2521_v49 = vsel %vm246_vm0, %v2519_v13, %v2520_v18 }
 0x1de   : > { %v1960_v31 = vadd.f32 %v1959_v20, %v1958_v9  ;;  %4642 = vmatprep.mubr.msk.f32.mxu0 %vm724_vm4, %v2065_v54  ;;  %v1860_v0 = vadd.f32 %v1859_v25, %v1858_v4 }
 0x1e0   : > { %4689 = vmatmul.mubr.msk.f32.gmra.mxu1 %vm724_vm4, %v5777_v3  ;;  %v1962_v29 = vadd.f32 %v1961_v36, %v1960_v31 }
 0x1e1   : > { %4643 = vmatmul.mubr.msk.f32.gmra.mxu0 %vm724_vm4, %v2066_v8  ;;  %4691 = vmatprep.mubr.msk.f32.mxu1 %vm724_vm4, %v5812_v38  ;;  %v2523_v38 = vsel %vm246_vm0, %v2520_v18, %v2522_v7 }
 0x1e4   : > { %v4519_v57 = vpop.f32.mrf.mxu0  ;;  %4692 = vmatmul.mubr.msk.f32.gmra.mxu1 %vm724_vm4, %v5829_v44 }
 0x1e5   : > { %1235 = vst.msk [vmem:[%s5588_s11 + $0x88] sm:$0xff] %vm656_vm1, %v4519_v57  ;;  %4694 = vmatprep.mubr.msk.f32.mxu1 %vm724_vm4, %v2521_v49  ;;  %v1133_v3 = vmul.f32 %v4519_v57, %v4519_v57  ;;  %v1079_v44 = vsel %vm656_vm1, %v4519_v57, 0.0 }
 0x1e6   : > { %v967_v52 = vpop.f32.mrf.mxu0 }
 0x1e7   : > { %v1077_v48 = vsel %vm656_vm1, %v967_v52, 0.0  ;;  %v1132_v34 = vmul.f32 %v967_v52, %v967_v52  ;;  %1234 = vst.msk [vmem:[%s5588_s11 + $0x80] sm:$0xff] %vm656_vm1, %v967_v52  ;;  %v1181_v55 = vsel %vm656_vm1, %v1133_v3, 0.0 }
 0x1e8   : > { %v1078_v10 = vadd.f32 %v1077_v48, %v1076_v17  ;;  %4695 = vmatmul.mubr.msk.f32.gmra.mxu1 %vm724_vm4, %v2523_v38 }
 0x1e9   : > { %v1179_v40 = vsel %vm656_vm1, %v1132_v34, 0.0 }
 0x1ea   : > { %v1180_v39 = vadd.f32 %v1179_v40, %v1178_v32  ;;  %v1080_v58 = vadd.f32 %v1079_v44, %v1078_v10 }
 0x1eb   : > { %v4571_v9 = vpop.f32.mrf.mxu1 }
 0x1ec   : > { %4011 = vst.msk [vmem:[%s5588_s11 + $0x188] sm:$0xff] %vm656_vm1, %v4571_v9  ;;  %v1182_v24 = vadd.f32 %v1181_v55, %v1180_v39  ;;  %v1917_v37 = vmul.f32 %v4571_v9, %v4571_v9  ;;  %v1863_v11 = vsel %vm656_vm1, %v4571_v9, 0.0 }
 0x1ed   : > { %v1751_v56 = vpop.f32.mrf.mxu1 }
 0x1ee   : > { %v1861_v45 = vsel %vm656_vm1, %v1751_v56, 0.0  ;;  %v1916_v43 = vmul.f32 %v1751_v56, %v1751_v56  ;;  %4010 = vst.msk [vmem:[%s5588_s11 + $0x180] sm:$0xff] %vm656_vm1, %v1751_v56  ;;  %v1965_v47 = vsel %vm656_vm1, %v1917_v37, 0.0 }
 0x1ef   : > { %v1862_v12 = vadd.f32 %v1861_v45, %v1860_v0 }
 0x1f0   : > { %v1963_v41 = vsel %vm656_vm1, %v1916_v43, 0.0 }
 0x1f1   : > { %v1964_v62 = vadd.f32 %v1963_v41, %v1962_v29  ;;  %v1864_v46 = vadd.f32 %v1863_v11, %v1862_v12 }
 0x1f3   : > { %v1966_v35 = vadd.f32 %v1965_v47, %v1964_v62 }
 0x1f5   : > { %v4522_v28 = vpop.f32.mrf.mxu0 }
 0x1f6   : > { %1237 = vst.msk [vmem:[%s5588_s11 + $0x98] sm:$0xff] %vm656_vm1, %v4522_v28  ;;  %v1135_v2 = vmul.f32 %v4522_v28, %v4522_v28  ;;  %v1083_v61 = vsel %vm656_vm1, %v4522_v28, 0.0 }
 0x1f7   : > { %v977_v14 = vpop.f32.mrf.mxu0 }
 0x1f8   : > { %v1081_v53 = vsel %vm656_vm1, %v977_v14, 0.0  ;;  %v1134_v63 = vmul.f32 %v977_v14, %v977_v14  ;;  %1236 = vst.msk [vmem:[%s5588_s11 + $0x90] sm:$0xff] %vm656_vm1, %v977_v14  ;;  %v1185_v30 = vsel %vm656_vm1, %v1135_v2, 0.0 }
 0x1f9   : > { %v1082_v5 = vadd.f32 %v1081_v53, %v1080_v58 }
 0x1fa   : > { %v1183_v27 = vsel %vm656_vm1, %v1134_v63, 0.0 }
 0x1fb   : > { %v1184_v17 = vadd.f32 %v1183_v27, %v1182_v24  ;;  %v1084_v19 = vadd.f32 %v1083_v61, %v1082_v5 }
 0x1fc   : > { %v4574_v51 = vpop.f32.mrf.mxu1 }
 0x1fd   : > { %4013 = vst.msk [vmem:[%s5588_s11 + $0x198] sm:$0xff] %vm656_vm1, %v4574_v51  ;;  %v1186_v23 = vadd.f32 %v1185_v30, %v1184_v17  ;;  %v1919_v1 = vmul.f32 %v4574_v51, %v4574_v51  ;;  %v1867_v50 = vsel %vm656_vm1, %v4574_v51, 0.0 }
 0x1fe   : > { %v1761_v32 = vpop.f32.mrf.mxu1 }
 0x1ff   : > { %v1865_v33 = vsel %vm656_vm1, %v1761_v32, 0.0  ;;  %v1918_v26 = vmul.f32 %v1761_v32, %v1761_v32  ;;  %4012 = vst.msk [vmem:[%s5588_s11 + $0x190] sm:$0xff] %vm656_vm1, %v1761_v32  ;;  %v1969_v54 = vsel %vm656_vm1, %v1919_v1, 0.0 }
 0x200   : > { %v1866_v42 = vadd.f32 %v1865_v33, %v1864_v46 }
 0x201   : > { %v1967_v15 = vsel %vm656_vm1, %v1918_v26, 0.0 }
 0x202   : > { %v1968_v16 = vadd.f32 %v1967_v15, %v1966_v35  ;;  %v1868_v59 = vadd.f32 %v1867_v50, %v1866_v42 }
 0x204   : > { %v1970_v4 = vadd.f32 %v1969_v54, %v1968_v16 }
 0x208   : > { %v4525_v22 = vpop.f32.mrf.mxu0 }
 0x209   : > { %1239 = vst.msk [vmem:[%s5588_s11 + $0xa8] sm:$0xff] %vm656_vm1, %v4525_v22  ;;  %v1137_v6 = vmul.f32 %v4525_v22, %v4525_v22  ;;  %v1087_v31 = vsel %vm656_vm1, %v4525_v22, 0.0 }
 0x20a   : > { %v987_v8 = vpop.f32.mrf.mxu0 }
 0x20b   : > { %v1085_v25 = vsel %vm656_vm1, %v987_v8, 0.0  ;;  %v1136_v60 = vmul.f32 %v987_v8, %v987_v8  ;;  %1238 = vst.msk [vmem:[%s5588_s11 + $0xa0] sm:$0xff] %vm656_vm1, %v987_v8  ;;  %v1189_v18 = vsel %vm656_vm1, %v1137_v6, 0.0 }
 0x20c   : > { %v1086_v20 = vadd.f32 %v1085_v25, %v1084_v19 }
 0x20d   : > { %v1187_v0 = vsel %vm656_vm1, %v1136_v60, 0.0 }
 0x20e   : > { %v1188_v36 = vadd.f32 %v1187_v0, %v1186_v23  ;;  %v1088_v13 = vadd.f32 %v1087_v31, %v1086_v20 }
 0x20f   : > { %v4577_v21 = vpop.f32.mrf.mxu1 }
 0x210   : > { %4015 = vst.msk [vmem:[%s5588_s11 + $0x1a8] sm:$0xff] %vm656_vm1, %v4577_v21  ;;  %v1190_v29 = vadd.f32 %v1189_v18, %v1188_v36  ;;  %v1921_v57 = vmul.f32 %v4577_v21, %v4577_v21  ;;  %v1871_v48 = vsel %vm656_vm1, %v4577_v21, 0.0 }
 0x211   : > { %v1771_v7 = vpop.f32.mrf.mxu1 }
 0x212   : > { %v1869_v49 = vsel %vm656_vm1, %v1771_v7, 0.0  ;;  %v1920_v52 = vmul.f32 %v1771_v7, %v1771_v7  ;;  %4014 = vst.msk [vmem:[%s5588_s11 + $0x1a0] sm:$0xff] %vm656_vm1, %v1771_v7  ;;  %v1973_v44 = vsel %vm656_vm1, %v1921_v57, 0.0 }
 0x213   : > { %v1870_v3 = vadd.f32 %v1869_v49, %v1868_v59 }
 0x214   : > { %v1971_v34 = vsel %vm656_vm1, %v1920_v52, 0.0 }
 0x215   : > { %v1972_v38 = vadd.f32 %v1971_v34, %v1970_v4  ;;  %v1872_v10 = vadd.f32 %v1871_v48, %v1870_v3 }
 0x217   : > { %v1974_v40 = vadd.f32 %v1973_v44, %v1972_v38 }
 0x219   : > { %v4528_v39 = vpop.f32.mrf.mxu0 }
 0x21a   : > { %1241 = vst.msk [vmem:[%s5588_s11 + $0xb8] sm:$0xff] %vm656_vm1, %v4528_v39  ;;  %v1139_v55 = vmul.f32 %v4528_v39, %v4528_v39  ;;  %v1091_v37 = vsel %vm656_vm1, %v4528_v39, 0.0 }
 0x21b   : > { %v997_v58 = vpop.f32.mrf.mxu0 }
 0x21c   : > { %v1089_v9 = vsel %vm656_vm1, %v997_v58, 0.0  ;;  %v1138_v24 = vmul.f32 %v997_v58, %v997_v58  ;;  %1240 = vst.msk [vmem:[%s5588_s11 + $0xb0] sm:$0xff] %vm656_vm1, %v997_v58  ;;  %v1193_v11 = vsel %vm656_vm1, %v1139_v55, 0.0 }
 0x21d   : > { %v1090_v56 = vadd.f32 %v1089_v9, %v1088_v13 }
 0x21e   : > { %v1191_v45 = vsel %vm656_vm1, %v1138_v24, 0.0 }
 0x21f   : > { %v1192_v43 = vadd.f32 %v1191_v45, %v1190_v29  ;;  %v1092_v12 = vadd.f32 %v1091_v37, %v1090_v56 }
 0x220   : > { %v4580_v41 = vpop.f32.mrf.mxu1 }
 0x221   : > { %4017 = vst.msk [vmem:[%s5588_s11 + $0x1b8] sm:$0xff] %vm656_vm1, %v4580_v41  ;;  %v1194_v62 = vadd.f32 %v1193_v11, %v1192_v43  ;;  %v1923_v47 = vmul.f32 %v4580_v41, %v4580_v41  ;;  %v1875_v2 = vsel %vm656_vm1, %v4580_v41, 0.0 }
 0x222   : > { %v1781_v46 = vpop.f32.mrf.mxu1 }
 0x223   : > { %v1873_v35 = vsel %vm656_vm1, %v1781_v46, 0.0  ;;  %v1922_v28 = vmul.f32 %v1781_v46, %v1781_v46  ;;  %4016 = vst.msk [vmem:[%s5588_s11 + $0x1b0] sm:$0xff] %vm656_vm1, %v1781_v46  ;;  %v1977_v61 = vsel %vm656_vm1, %v1923_v47, 0.0 }
 0x224   : > { %v1874_v14 = vadd.f32 %v1873_v35, %v1872_v10 }
 0x225   : > { %v1975_v53 = vsel %vm656_vm1, %v1922_v28, 0.0 }
 0x226   : > { %v1976_v63 = vadd.f32 %v1975_v53, %v1974_v40  ;;  %v1876_v5 = vadd.f32 %v1875_v2, %v1874_v14 }
 0x228   : > { %v1978_v27 = vadd.f32 %v1977_v61, %v1976_v63 }
 0x22c   : > { %v4531_v17 = vpop.f32.mrf.mxu0 }
 0x22d   : > { %1243 = vst.msk [vmem:[%s5588_s11 + $0xc8] sm:$0xff] %vm656_vm1, %v4531_v17  ;;  %v1141_v30 = vmul.f32 %v4531_v17, %v4531_v17  ;;  %v1095_v1 = vsel %vm656_vm1, %v4531_v17, 0.0 }
 0x22e   : > { %v1007_v19 = vpop.f32.mrf.mxu0 }
 0x22f   : > { %v1093_v51 = vsel %vm656_vm1, %v1007_v19, 0.0  ;;  %v1140_v23 = vmul.f32 %v1007_v19, %v1007_v19  ;;  %1242 = vst.msk [vmem:[%s5588_s11 + $0xc0] sm:$0xff] %vm656_vm1, %v1007_v19  ;;  %v1197_v50 = vsel %vm656_vm1, %v1141_v30, 0.0 }
 0x230   : > { %v1094_v32 = vadd.f32 %v1093_v51, %v1092_v12 }
 0x231   : > { %v1195_v33 = vsel %vm656_vm1, %v1140_v23, 0.0 }
 0x232   : > { %v1196_v26 = vadd.f32 %v1195_v33, %v1194_v62  ;;  %v1096_v42 = vadd.f32 %v1095_v1, %v1094_v32 }
 0x233   : > { %v4583_v15 = vpop.f32.mrf.mxu1 }
 0x234   : > { %4019 = vst.msk [vmem:[%s5588_s11 + $0x1c8] sm:$0xff] %vm656_vm1, %v4583_v15  ;;  %v1198_v16 = vadd.f32 %v1197_v50, %v1196_v26  ;;  %v1925_v54 = vmul.f32 %v4583_v15, %v4583_v15  ;;  %v1879_v6 = vsel %vm656_vm1, %v4583_v15, 0.0 }
 0x235   : > { %v1791_v59 = vpop.f32.mrf.mxu1 }
 0x236   : > { %v1877_v4 = vsel %vm656_vm1, %v1791_v59, 0.0  ;;  %v1924_v22 = vmul.f32 %v1791_v59, %v1791_v59  ;;  %4018 = vst.msk [vmem:[%s5588_s11 + $0x1c0] sm:$0xff] %vm656_vm1, %v1791_v59  ;;  %v1981_v31 = vsel %vm656_vm1, %v1925_v54, 0.0 }
 0x237   : > { %v1878_v8 = vadd.f32 %v1877_v4, %v1876_v5 }
 0x238   : > { %v1979_v25 = vsel %vm656_vm1, %v1924_v22, 0.0 }
 0x239   : > { %v1980_v60 = vadd.f32 %v1979_v25, %v1978_v27  ;;  %v1880_v20 = vadd.f32 %v1879_v6, %v1878_v8 }
 0x23b   : > { %v1982_v0 = vadd.f32 %v1981_v31, %v1980_v60 }
 0x23d   : > { %v4534_v36 = vpop.f32.mrf.mxu0 }
 0x23e   : > { %1245 = vst.msk [vmem:[%s5588_s11 + $0xd8] sm:$0xff] %vm656_vm1, %v4534_v36  ;;  %v1143_v18 = vmul.f32 %v4534_v36, %v4534_v36  ;;  %v1099_v57 = vsel %vm656_vm1, %v4534_v36, 0.0 }
 0x23f   : > { %v1017_v13 = vpop.f32.mrf.mxu0 }
 0x240   : > { %v1097_v21 = vsel %vm656_vm1, %v1017_v13, 0.0  ;;  %v1142_v29 = vmul.f32 %v1017_v13, %v1017_v13  ;;  %1244 = vst.msk [vmem:[%s5588_s11 + $0xd0] sm:$0xff] %vm656_vm1, %v1017_v13  ;;  %v1201_v48 = vsel %vm656_vm1, %v1143_v18, 0.0 }
 0x241   : > { %v1098_v7 = vadd.f32 %v1097_v21, %v1096_v42 }
 0x242   : > { %v1199_v49 = vsel %vm656_vm1, %v1142_v29, 0.0 }
 0x243   : > { %v1200_v52 = vadd.f32 %v1199_v49, %v1198_v16  ;;  %v1100_v3 = vadd.f32 %v1099_v57, %v1098_v7 }
 0x244   : > { %v4586_v34 = vpop.f32.mrf.mxu1 }
 0x245   : > { %4021 = vst.msk [vmem:[%s5588_s11 + $0x1d8] sm:$0xff] %vm656_vm1, %v4586_v34  ;;  %v1202_v38 = vadd.f32 %v1201_v48, %v1200_v52  ;;  %v1927_v44 = vmul.f32 %v4586_v34, %v4586_v34  ;;  %v1883_v55 = vsel %vm656_vm1, %v4586_v34, 0.0 }
 0x246   : > { %v1801_v10 = vpop.f32.mrf.mxu1 }
 0x247   : > { %v1881_v40 = vsel %vm656_vm1, %v1801_v10, 0.0  ;;  %v1926_v39 = vmul.f32 %v1801_v10, %v1801_v10  ;;  %4020 = vst.msk [vmem:[%s5588_s11 + $0x1d0] sm:$0xff] %vm656_vm1, %v1801_v10  ;;  %v1985_v37 = vsel %vm656_vm1, %v1927_v44, 0.0 }
 0x248   : > { %v1882_v58 = vadd.f32 %v1881_v40, %v1880_v20 }
 0x249   : > { %v1983_v9 = vsel %vm656_vm1, %v1926_v39, 0.0 }
 0x24a   : > { %v1984_v24 = vadd.f32 %v1983_v9, %v1982_v0  ;;  %v1884_v56 = vadd.f32 %v1883_v55, %v1882_v58 }
 0x24c   : > { %v1986_v45 = vadd.f32 %v1985_v37, %v1984_v24 }
 0x250   : > { %v4537_v43 = vpop.f32.mrf.mxu0 }
 0x251   : > { %1247 = vst.msk [vmem:[%s5588_s11 + $0xe8] sm:$0xff] %vm656_vm1, %v4537_v43  ;;  %v1145_v11 = vmul.f32 %v4537_v43, %v4537_v43  ;;  %v1103_v47 = vsel %vm656_vm1, %v4537_v43, 0.0 }
 0x252   : > { %v1027_v12 = vpop.f32.mrf.mxu0 }
 0x253   : > { %v1101_v41 = vsel %vm656_vm1, %v1027_v12, 0.0  ;;  %v1144_v62 = vmul.f32 %v1027_v12, %v1027_v12  ;;  %1246 = vst.msk [vmem:[%s5588_s11 + $0xe0] sm:$0xff] %vm656_vm1, %v1027_v12  ;;  %v1205_v2 = vsel %vm656_vm1, %v1145_v11, 0.0 }
 0x254   : > { %v1102_v46 = vadd.f32 %v1101_v41, %v1100_v3 }
 0x255   : > { %v1203_v35 = vsel %vm656_vm1, %v1144_v62, 0.0 }
 0x256   : > { %v1204_v28 = vadd.f32 %v1203_v35, %v1202_v38  ;;  %v1104_v14 = vadd.f32 %v1103_v47, %v1102_v46 }
 0x257   : > { %v4589_v53 = vpop.f32.mrf.mxu1 }
 0x258   : > { %4023 = vst.msk [vmem:[%s5588_s11 + $0x1e8] sm:$0xff] %vm656_vm1, %v4589_v53  ;;  %v1206_v63 = vadd.f32 %v1205_v2, %v1204_v28  ;;  %v1929_v61 = vmul.f32 %v4589_v53, %v4589_v53  ;;  %v1887_v30 = vsel %vm656_vm1, %v4589_v53, 0.0 }
 0x259   : > { %v1811_v5 = vpop.f32.mrf.mxu1 }
 0x25a   : > { %v1885_v27 = vsel %vm656_vm1, %v1811_v5, 0.0  ;;  %v1928_v17 = vmul.f32 %v1811_v5, %v1811_v5  ;;  %4022 = vst.msk [vmem:[%s5588_s11 + $0x1e0] sm:$0xff] %vm656_vm1, %v1811_v5  ;;  %v1989_v1 = vsel %vm656_vm1, %v1929_v61, 0.0 }
 0x25b   : > { %v1886_v19 = vadd.f32 %v1885_v27, %v1884_v56 }
 0x25c   : > { %v1987_v51 = vsel %vm656_vm1, %v1928_v17, 0.0 }
 0x25d   : > { %v1988_v23 = vadd.f32 %v1987_v51, %v1986_v45  ;;  %v1888_v32 = vadd.f32 %v1887_v30, %v1886_v19 }
 0x25f   : > { %v1990_v33 = vadd.f32 %v1989_v1, %v1988_v23 }
 0x261   : > { %v4540_v26 = vpop.f32.mrf.mxu0 }
 0x262   : > { %1249 = vst.msk [vmem:[%s5588_s11 + $0xf8] sm:$0xff] %vm656_vm1, %v4540_v26  ;;  %v1147_v50 = vmul.f32 %v4540_v26, %v4540_v26  ;;  %v1107_v4 = vsel %vm656_vm1, %v4540_v26, 0.0 }
 0x263   : > { %v1037_v42 = vpop.f32.mrf.mxu0 }
 0x264   : > { %v1105_v15 = vsel %vm656_vm1, %v1037_v42, 0.0  ;;  %v1146_v16 = vmul.f32 %v1037_v42, %v1037_v42  ;;  %1248 = vst.msk [vmem:[%s5588_s11 + $0xf0] sm:$0xff] %vm656_vm1, %v1037_v42  ;;  %v1209_v20 = vsel %vm656_vm1, %v1147_v50, 0.0 }
 0x265   : > { %v1106_v59 = vadd.f32 %v1105_v15, %v1104_v14  ;;  %v4599_v54 = vpop.f32.mrf.mxu0 }
 0x266   : > { %v1207_v22 = vsel %vm656_vm1, %v1146_v16, 0.0  ;;  %v2372_v8 = vmul.f32 %v4599_v54, %v4599_v54  ;;  %4061 = vst.msk [vmem:[%s5588_s11 + $0x208] sm:$0xff] %vm656_vm1, %v4599_v54  ;;  %v2302_v21 = vsel %vm656_vm1, %v4599_v54, 0.0 }
 0x267   : > { %v1108_v6 = vadd.f32 %v1107_v4, %v1106_v59  ;;  %v1208_v25 = vadd.f32 %v1207_v22, %v1206_v63  ;;  %v2142_v60 = vpop.f32.mrf.mxu0 }
 0x268   : > { %v2301_v31 = vsel %vm656_vm1, %v2142_v60, 0.0  ;;  %v2371_v0 = vmul.f32 %v2142_v60, %v2142_v60  ;;  %4060 = vst.msk [vmem:[%s5588_s11 + $0x200] sm:$0xff] %vm656_vm1, %v2142_v60  ;;  %v4592_v36 = vpop.f32.mrf.mxu1  ;;  %v2404_v29 = vsel %vm656_vm1, %v2372_v8, 0.0 }
 0x269   : > { %v1109_v13 = vrot.slane %v1108_v6, 4  ;;  %v1210_v18 = vadd.f32 %v1209_v20, %v1208_v25  ;;  %4025 = vst.msk [vmem:[%s5588_s11 + $0x1f8] sm:$0xff] %vm656_vm1, %v4592_v36  ;;  %v4602_v7 = vpop.f32.mrf.mxu0  ;;  %v2303_v57 = vadd.f32 %v2302_v21, %v2301_v31  ;;  %v1931_v52 = vmul.f32 %v4592_v36, %v4592_v36 }
 0x26a   : > { %v2403_v49 = vsel %vm656_vm1, %v2371_v0, 0.0  ;;  %v2374_v3 = vmul.f32 %v4602_v7, %v4602_v7  ;;  %4063 = vst.msk [vmem:[%s5588_s11 + $0x218] sm:$0xff] %vm656_vm1, %v4602_v7  ;;  %v1821_v48 = vpop.f32.mrf.mxu1  ;;  %v1891_v10 = vsel %vm656_vm1, %v4592_v36, 0.0  ;;  %v2306_v58 = vsel %vm656_vm1, %v4602_v7, 0.0 }
 0x26b   : > { %v1110_v34 = vadd.f32 %v1109_v13, %v1108_v6  ;;  %v1211_v38 = vrot.slane %v1210_v18, 4  ;;  %v1889_v44 = vsel %vm656_vm1, %v1821_v48, 0.0  ;;  %4024 = vst.msk [vmem:[%s5588_s11 + $0x1f0] sm:$0xff] %vm656_vm1, %v1821_v48  ;;  %v2152_v40 = vpop.f32.mrf.mxu0  ;;  %v2405_v39 = vadd.f32 %v2404_v29, %v2403_v49 }
 0x26c   : > { %v1890_v55 = vadd.f32 %v1889_v44, %v1888_v32  ;;  %v1930_v9 = vmul.f32 %v1821_v48, %v1821_v48  ;;  %4062 = vst.msk [vmem:[%s5588_s11 + $0x210] sm:$0xff] %vm656_vm1, %v2152_v40  ;;  %v4651_v24 = vpop.f32.mrf.mxu1  ;;  %v2304_v45 = vsel %vm656_vm1, %v2152_v40, 0.0  ;;  %v2373_v43 = vmul.f32 %v2152_v40, %v2152_v40 }
 0x26d   : > { %v1111_v56 = vrot.slane %v1110_v34, 2  ;;  %v1212_v37 = vadd.f32 %v1211_v38, %v1210_v18  ;;  %4127 = vst.msk [vmem:[%s5588_s11 + $0x308] sm:$0xff] %vm656_vm1, %v4651_v24  ;;  %v4605_v12 = vpop.f32.mrf.mxu0  ;;  %v1993_v11 = vsel %vm656_vm1, %v1931_v52, 0.0  ;;  %v2408_v41 = vsel %vm656_vm1, %v2374_v3, 0.0 }
 0x26e   : > { %v1892_v62 = vadd.f32 %v1891_v10, %v1890_v55  ;;  %v1991_v46 = vsel %vm656_vm1, %v1930_v9, 0.0  ;;  %4065 = vst.msk [vmem:[%s5588_s11 + $0x228] sm:$0xff] %vm656_vm1, %v4605_v12  ;;  %v2597_v47 = vpop.f32.mrf.mxu1  ;;  %v2406_v2 = vsel %vm656_vm1, %v2373_v43, 0.0  ;;  %v2305_v5 = vadd.f32 %v2304_v45, %v2303_v57 }
 0x26f   : > { %v1112_v35 = vadd.f32 %v1111_v56, %v1110_v34  ;;  %v1213_v28 = vrot.slane %v1212_v37, 2  ;;  %v1992_v14 = vadd.f32 %v1991_v46, %v1990_v33  ;;  %4126 = vst.msk [vmem:[%s5588_s11 + $0x300] sm:$0xff] %vm656_vm1, %v2597_v47  ;;  %v2162_v53 = vpop.f32.mrf.mxu0  ;;  %v2757_v61 = vsel %vm656_vm1, %v4651_v24, 0.0 }
 0x270   : > { %v1893_v63 = vrot.slane %v1892_v62, 4  ;;  %v2827_v27 = vmul.f32 %v4651_v24, %v4651_v24  ;;  %4064 = vst.msk [vmem:[%s5588_s11 + $0x220] sm:$0xff] %vm656_vm1, %v2162_v53  ;;  %v4654_v17 = vpop.f32.mrf.mxu1  ;;  %v2376_v23 = vmul.f32 %v4605_v12, %v4605_v12  ;;  %v2407_v33 = vadd.f32 %v2406_v2, %v2405_v39 }
 0x271   : > { %v1113_v19 = vrot.slane %v1112_v35, 1  ;;  %v1214_v30 = vadd.f32 %v1213_v28, %v1212_v37  ;;  %v1994_v51 = vadd.f32 %v1993_v11, %v1992_v14  ;;  %4129 = vst.msk [vmem:[%s5588_s11 + $0x318] sm:$0xff] %vm656_vm1, %v4654_v17  ;;  %v4608_v32 = vpop.f32.mrf.mxu0  ;;  %v2756_v26 = vsel %vm656_vm1, %v2597_v47, 0.0 }
 0x272   : > { %v1894_v1 = vadd.f32 %v1893_v63, %v1892_v62  ;;  %v2826_v42 = vmul.f32 %v2597_v47, %v2597_v47  ;;  %4067 = vst.msk [vmem:[%s5588_s11 + $0x238] sm:$0xff] %vm656_vm1, %v4608_v32  ;;  %v2607_v50 = vpop.f32.mrf.mxu1  ;;  %v2859_v59 = vsel %vm656_vm1, %v2827_v27, 0.0  ;;  %v2310_v54 = vsel %vm656_vm1, %v4605_v12, 0.0 }
 0x273   : > { %v1215_v15 = vrot.slane %v1214_v30, 1  ;;  %v1995_v16 = vrot.slane %v1994_v51, 4  ;;  %4128 = vst.msk [vmem:[%s5588_s11 + $0x310] sm:$0xff] %vm656_vm1, %v2607_v50  ;;  %v2172_v4 = vpop.f32.mrf.mxu0  ;;  %v1114_v22 = vadd.f32 %v1113_v19, %v1112_v35  ;;  %v2307_v25 = vadd.f32 %v2306_v58, %v2305_v5 }
 0x274   : > { %v1895_v8 = vrot.slane %v1894_v1, 2  ;;  %v2858_v6 = vsel %vm656_vm1, %v2826_v42, 0.0  ;;  %4066 = vst.msk [vmem:[%s5588_s11 + $0x230] sm:$0xff] %vm656_vm1, %v2172_v4  ;;  %v4657_v60 = vpop.f32.mrf.mxu1  ;;  %v2412_v31 = vsel %vm656_vm1, %v2376_v23, 0.0  ;;  %v2758_v0 = vadd.f32 %v2757_v61, %v2756_v26 }
 0x275   : > { %v1996_v20 = vadd.f32 %v1995_v16, %v1994_v51  ;;  %v2308_v36 = vsel %vm656_vm1, %v2162_v53, 0.0  ;;  %4131 = vst.msk [vmem:[%s5588_s11 + $0x328] sm:$0xff] %vm656_vm1, %v4657_v60  ;;  %v4611_v13 = vpop.f32.mrf.mxu0  ;;  %v2375_v29 = vmul.f32 %v2162_v53, %v2162_v53  ;;  %v2409_v7 = vadd.f32 %v2408_v41, %v2407_v33 }
 0x276   : > { %v1896_v18 = vadd.f32 %v1895_v8, %v1894_v1  ;;  %v2309_v21 = vadd.f32 %v2308_v36, %v2307_v25  ;;  %4069 = vst.msk [vmem:[%s5588_s11 + $0x248] sm:$0xff] %vm656_vm1, %v4611_v13  ;;  %v2617_v57 = vpop.f32.mrf.mxu1  ;;  %v1216_v49 = vadd.f32 %v1215_v15, %v1214_v30  ;;  %v2860_v3 = vadd.f32 %v2859_v59, %v2858_v6 }
 0x277   : > { %v1997_v52 = vrot.slane %v1996_v20, 2  ;;  %v2761_v48 = vsel %vm656_vm1, %v4654_v17, 0.0  ;;  %4130 = vst.msk [vmem:[%s5588_s11 + $0x320] sm:$0xff] %vm656_vm1, %v2617_v57  ;;  %v2182_v34 = vpop.f32.mrf.mxu0  ;;  %v2410_v10 = vsel %vm656_vm1, %v2375_v29, 0.0  ;;  %v2829_v44 = vmul.f32 %v4654_v17, %v4654_v17 }
 0x278   : > { %v1897_v38 = vrot.slane %v1896_v18, 1  ;;  %v2759_v40 = vsel %vm656_vm1, %v2607_v50, 0.0  ;;  %4068 = vst.msk [vmem:[%s5588_s11 + $0x240] sm:$0xff] %vm656_vm1, %v2182_v34  ;;  %v6194_v39 = vpop.f32.mrf.mxu1  ;;  %v2411_v55 = vadd.f32 %v2410_v10, %v2409_v7  ;;  %v2314_v9 = vsel %vm656_vm1, %v4608_v32, 0.0 }
 0x279   : > { %v1998_v58 = vadd.f32 %v1997_v52, %v1996_v20  ;;  %v2378_v24 = vmul.f32 %v4608_v32, %v4608_v32  ;;  %4133 = vst.msk [vmem:[%s5588_s11 + $0x338] sm:$0xff] %vm656_vm1, %v6194_v39  ;;  %v6200_v56 = vpop.f32.mrf.mxu0  ;;  %v2760_v45 = vadd.f32 %v2759_v40, %v2758_v0  ;;  %v2828_v43 = vmul.f32 %v2607_v50, %v2607_v50 }
 0x27a   : > { %v1898_v37 = vadd.f32 %v1897_v38, %v1896_v18  ;;  %v2311_v12 = vadd.f32 %v2310_v54, %v2309_v21  ;;  %4071 = vst.msk [vmem:[%s5588_s11 + $0x258] sm:$0xff] %vm656_vm1, %v6200_v56  ;;  %v2627_v11 = vpop.f32.mrf.mxu1  ;;  %v2312_v62 = vsel %vm656_vm1, %v2172_v4, 0.0  ;;  %v2377_v46 = vmul.f32 %v2172_v4, %v2172_v4 }
 0x27b   : > { %v1999_v41 = vrot.slane %v1998_v58, 1  ;;  %v2413_v47 = vadd.f32 %v2412_v31, %v2411_v55  ;;  %4132 = vst.msk [vmem:[%s5588_s11 + $0x330] sm:$0xff] %vm656_vm1, %v2627_v11  ;;  %v2192_v35 = vpop.f32.mrf.mxu0  ;;  %v2863_v14 = vsel %vm656_vm1, %v2829_v44, 0.0  ;;  %v2861_v2 = vsel %vm656_vm1, %v2828_v43, 0.0 }
 0x27c   : > { %v6208_v28 = vadd.f32 %v1898_v37, %v1114_v22  ;;  %v2313_v53 = vadd.f32 %v2312_v62, %v2311_v12  ;;  %4070 = vst.msk [vmem:[%s5588_s11 + $0x250] sm:$0xff] %vm656_vm1, %v2192_v35  ;;  %v6214_v63 = vpop.f32.mrf.mxu1  ;;  %v2416_v61 = vsel %vm656_vm1, %v2378_v24, 0.0  ;;  %v2862_v27 = vadd.f32 %v2861_v2, %v2860_v3 }
 0x27d   : > { %v2000_v5 = vadd.f32 %v1999_v41, %v1998_v58  ;;  %v2414_v17 = vsel %vm656_vm1, %v2377_v46, 0.0  ;;  %4135 = vst.msk [vmem:[%s5588_s11 + $0x348] sm:$0xff] %vm656_vm1, %v6214_v63  ;;  %v6221_v19 = vpop.f32.mrf.mxu0  ;;  %v2831_v51 = vmul.f32 %v4657_v60, %v4657_v60  ;;  %v2380_v23 = vmul.f32 %v4611_v13, %v4611_v13 }
 0x27e   : > { %v2415_v30 = vadd.f32 %v2414_v17, %v2413_v47  ;;  %v2762_v32 = vadd.f32 %v2761_v48, %v2760_v45  ;;  %4073 = vst.msk [vmem:[%s5588_s11 + $0x268] sm:$0xff] %vm656_vm1, %v6221_v19  ;;  %v6226_v1 = vpop.f32.mrf.mxu1  ;;  %v2765_v26 = vsel %vm656_vm1, %v4657_v60, 0.0  ;;  %v2763_v42 = vsel %vm656_vm1, %v2617_v57, 0.0 }
 0x27f   : > { %v6228_v33 = vadd.f32 %v2000_v5, %v1216_v49  ;;  %v2830_v50 = vmul.f32 %v2617_v57, %v2617_v57  ;;  %4134 = vst.msk [vmem:[%s5588_s11 + $0x340] sm:$0xff] %vm656_vm1, %v6226_v1  ;;  %v6235_v15 = vpop.f32.mrf.mxu0  ;;  %v2318_v16 = vsel %vm656_vm1, %v4611_v13, 0.0  ;;  %v2864_v54 = vadd.f32 %v2863_v14, %v2862_v27 }
 0x280   : > { %v2764_v59 = vadd.f32 %v2763_v42, %v2762_v32  ;;  %v2315_v4 = vadd.f32 %v2314_v9, %v2313_v53  ;;  %4072 = vst.msk [vmem:[%s5588_s11 + $0x260] sm:$0xff] %vm656_vm1, %v6235_v15  ;;  %v6241_v22 = vpop.f32.mrf.mxu1  ;;  %v2316_v6 = vsel %vm656_vm1, %v2182_v34, 0.0  ;;  %v2379_v25 = vmul.f32 %v2182_v34, %v2182_v34 }
 0x281   : > { %v2865_v8 = vsel %vm656_vm1, %v2830_v50, 0.0  ;;  %v2417_v60 = vadd.f32 %v2416_v61, %v2415_v30  ;;  %4137 = vst.msk [vmem:[%s5588_s11 + $0x358] sm:$0xff] %vm656_vm1, %v6241_v22  ;;  %v6248_v20 = vpop.f32.mrf.mxu0  ;;  %v2867_v31 = vsel %vm656_vm1, %v2831_v51, 0.0  ;;  %v2420_v0 = vsel %vm656_vm1, %v2380_v23, 0.0 }
 0x282   : > { %v2866_v36 = vadd.f32 %v2865_v8, %v2864_v54  ;;  %v2317_v13 = vadd.f32 %v2316_v6, %v2315_v4  ;;  %4075 = vst.msk [vmem:[%s5588_s11 + $0x278] sm:$0xff] %vm656_vm1, %v6248_v20  ;;  %v6255_v18 = vpop.f32.mrf.mxu1  ;;  %v2418_v21 = vsel %vm656_vm1, %v2379_v25, 0.0  ;;  %v2833_v29 = vmul.f32 %v6194_v39, %v6194_v39 }
 0x283   : > { %v2382_v7 = vmul.f32 %v6200_v56, %v6200_v56  ;;  %v2766_v57 = vadd.f32 %v2765_v26, %v2764_v59  ;;  %4136 = vst.msk [vmem:[%s5588_s11 + $0x350] sm:$0xff] %vm656_vm1, %v6255_v18  ;;  %v6265_v49 = vpop.f32.mrf.mxu0  ;;  %v2419_v52 = vadd.f32 %v2418_v21, %v2417_v60  ;;  %v2769_v3 = vsel %vm656_vm1, %v6194_v39, 0.0 }
 0x284   : > { %v2767_v48 = vsel %vm656_vm1, %v2627_v11, 0.0  ;;  %v2832_v34 = vmul.f32 %v2627_v11, %v2627_v11  ;;  %4074 = vst.msk [vmem:[%s5588_s11 + $0x270] sm:$0xff] %vm656_vm1, %v6265_v49  ;;  %v6273_v38 = vpop.f32.mrf.mxu1  ;;  %v2322_v10 = vsel %vm656_vm1, %v6200_v56, 0.0  ;;  %v2868_v40 = vadd.f32 %v2867_v31, %v2866_v36 }
 0x285   : > { %v2768_v44 = vadd.f32 %v2767_v48, %v2766_v57  ;;  %v2319_v58 = vadd.f32 %v2318_v16, %v2317_v13  ;;  %4139 = vst.msk [vmem:[%s5588_s11 + $0x368] sm:$0xff] %vm656_vm1, %v6273_v38  ;;  %v6280_v55 = vpop.f32.mrf.mxu0  ;;  %v2320_v9 = vsel %vm656_vm1, %v2192_v35, 0.0  ;;  %v2381_v24 = vmul.f32 %v2192_v35, %v2192_v35 }
 0x286   : > { %v2869_v39 = vsel %vm656_vm1, %v2832_v34, 0.0  ;;  %v2421_v37 = vadd.f32 %v2420_v0, %v2419_v52  ;;  %4077 = vst.msk [vmem:[%s5588_s11 + $0x288] sm:$0xff] %vm656_vm1, %v6280_v55  ;;  %v6287_v56 = vpop.f32.mrf.mxu1  ;;  %v2871_v45 = vsel %vm656_vm1, %v2833_v29, 0.0  ;;  %v2424_v43 = vsel %vm656_vm1, %v2382_v7, 0.0 }
 0x287   : > { %v2870_v12 = vadd.f32 %v2869_v39, %v2868_v40  ;;  %v2321_v11 = vadd.f32 %v2320_v9, %v2319_v58  ;;  %4138 = vst.msk [vmem:[%s5588_s11 + $0x360] sm:$0xff] %vm656_vm1, %v6287_v56  ;;  %v6294_v41 = vpop.f32.mrf.mxu0  ;;  %v2422_v62 = vsel %vm656_vm1, %v2381_v24, 0.0  ;;  %v2835_v46 = vmul.f32 %v6214_v63, %v6214_v63 }
 0x288   : > { %v2384_v47 = vmul.f32 %v6221_v19, %v6221_v19  ;;  %v2770_v35 = vadd.f32 %v2769_v3, %v2768_v44  ;;  %4076 = vst.msk [vmem:[%s5588_s11 + $0x280] sm:$0xff] %vm656_vm1, %v6294_v41  ;;  %v6304_v14 = vpop.f32.mrf.mxu1  ;;  %v2423_v2 = vadd.f32 %v2422_v62, %v2421_v37  ;;  %v2773_v53 = vsel %vm656_vm1, %v6214_v63, 0.0 }
 0x289   : > { %v2771_v5 = vsel %vm656_vm1, %v6226_v1, 0.0  ;;  %v2834_v61 = vmul.f32 %v6226_v1, %v6226_v1  ;;  %4141 = vst.msk [vmem:[%s5588_s11 + $0x378] sm:$0xff] %vm656_vm1, %v6304_v14  ;;  %v6315_v27 = vpop.f32.mrf.mxu0  ;;  %v2326_v17 = vsel %vm656_vm1, %v6221_v19, 0.0  ;;  %v2872_v51 = vadd.f32 %v2871_v45, %v2870_v12 }
 0x28a   : > { %v2772_v30 = vadd.f32 %v2771_v5, %v2770_v35  ;;  %v2323_v23 = vadd.f32 %v2322_v10, %v2321_v11  ;;  %4079 = vst.msk [vmem:[%s5588_s11 + $0x298] sm:$0xff] %vm656_vm1, %v6315_v27  ;;  %v6322_v63 = vpop.f32.mrf.mxu1  ;;  %v2324_v1 = vsel %vm656_vm1, %v6235_v15, 0.0  ;;  %v2383_v26 = vmul.f32 %v6235_v15, %v6235_v15 }
 0x28b   : > { %v2873_v32 = vsel %vm656_vm1, %v2834_v61, 0.0  ;;  %v2425_v42 = vadd.f32 %v2424_v43, %v2423_v2  ;;  %4140 = vst.msk [vmem:[%s5588_s11 + $0x370] sm:$0xff] %vm656_vm1, %v6322_v63  ;;  %v6332_v19 = vpop.f32.mrf.mxu0  ;;  %v2875_v50 = vsel %vm656_vm1, %v2835_v46, 0.0  ;;  %v2428_v16 = vsel %vm656_vm1, %v2384_v47, 0.0 }
 0x28c   : > { %v2874_v59 = vadd.f32 %v2873_v32, %v2872_v51  ;;  %v2325_v54 = vadd.f32 %v2324_v1, %v2323_v23  ;;  %4078 = vst.msk [vmem:[%s5588_s11 + $0x290] sm:$0xff] %vm656_vm1, %v6332_v19  ;;  %v6339_v4 = vpop.f32.mrf.mxu1  ;;  %v2426_v15 = vsel %vm656_vm1, %v2383_v26, 0.0  ;;  %v2837_v8 = vmul.f32 %v6241_v22, %v6241_v22 }
 0x28d   : > { %v2386_v6 = vmul.f32 %v6248_v20, %v6248_v20  ;;  %v2774_v25 = vadd.f32 %v2773_v53, %v2772_v30  ;;  %4143 = vst.msk [vmem:[%s5588_s11 + $0x388] sm:$0xff] %vm656_vm1, %v6339_v4  ;;  %v6349_v60 = vpop.f32.mrf.mxu0  ;;  %v2427_v31 = vadd.f32 %v2426_v15, %v2425_v42  ;;  %v2777_v0 = vsel %vm656_vm1, %v6241_v22, 0.0 }
 0x28e   : > { %v2775_v36 = vsel %vm656_vm1, %v6255_v18, 0.0  ;;  %v2836_v13 = vmul.f32 %v6255_v18, %v6255_v18  ;;  %4081 = vst.msk [vmem:[%s5588_s11 + $0x2a8] sm:$0xff] %vm656_vm1, %v6349_v60  ;;  %v6360_v21 = vpop.f32.mrf.mxu1  ;;  %v2330_v29 = vsel %vm656_vm1, %v6248_v20, 0.0  ;;  %v2876_v57 = vadd.f32 %v2875_v50, %v2874_v59 }
 0x28f   : > { %v2776_v7 = vadd.f32 %v2775_v36, %v2774_v25  ;;  %v2327_v52 = vadd.f32 %v2326_v17, %v2325_v54  ;;  %4142 = vst.msk [vmem:[%s5588_s11 + $0x380] sm:$0xff] %vm656_vm1, %v6360_v21  ;;  %v6367_v22 = vpop.f32.mrf.mxu0  ;;  %v2328_v18 = vsel %vm656_vm1, %v6265_v49, 0.0  ;;  %v2385_v48 = vmul.f32 %v6265_v49, %v6265_v49 }
 0x290   : > { %v2877_v3 = vsel %vm656_vm1, %v2836_v13, 0.0  ;;  %v2429_v34 = vadd.f32 %v2428_v16, %v2427_v31  ;;  %4080 = vst.msk [vmem:[%s5588_s11 + $0x2a0] sm:$0xff] %vm656_vm1, %v6367_v22  ;;  %v6377_v20 = vpop.f32.mrf.mxu1  ;;  %v2879_v10 = vsel %vm656_vm1, %v2837_v8, 0.0  ;;  %v2432_v44 = vsel %vm656_vm1, %v2386_v6, 0.0 }
 0x291   : > { %v2878_v40 = vadd.f32 %v2877_v3, %v2876_v57  ;;  %v2329_v58 = vadd.f32 %v2328_v18, %v2327_v52  ;;  %4145 = vst.msk [vmem:[%s5588_s11 + $0x398] sm:$0xff] %vm656_vm1, %v6377_v20  ;;  %v6384_v39 = vpop.f32.mrf.mxu0  ;;  %v2430_v49 = vsel %vm656_vm1, %v2385_v48, 0.0  ;;  %v2839_v9 = vmul.f32 %v6273_v38, %v6273_v38 }
 0x292   : > { %v2388_v24 = vmul.f32 %v6280_v55, %v6280_v55  ;;  %v2778_v37 = vadd.f32 %v2777_v0, %v2776_v7  ;;  %4083 = vst.msk [vmem:[%s5588_s11 + $0x2b8] sm:$0xff] %vm656_vm1, %v6384_v39  ;;  %v6394_v45 = vpop.f32.mrf.mxu1  ;;  %v2431_v43 = vadd.f32 %v2430_v49, %v2429_v34  ;;  %v2781_v12 = vsel %vm656_vm1, %v6273_v38, 0.0 }
 0x293   : > { %v2779_v11 = vsel %vm656_vm1, %v6287_v56, 0.0  ;;  %v2838_v62 = vmul.f32 %v6287_v56, %v6287_v56  ;;  %4144 = vst.msk [vmem:[%s5588_s11 + $0x390] sm:$0xff] %vm656_vm1, %v6394_v45  ;;  %v6405_v46 = vpop.f32.mrf.mxu0  ;;  %v2334_v47 = vsel %vm656_vm1, %v6280_v55, 0.0  ;;  %v2880_v2 = vadd.f32 %v2879_v10, %v2878_v40 }
 0x294   : > { %v2780_v35 = vadd.f32 %v2779_v11, %v2778_v37  ;;  %v2331_v53 = vadd.f32 %v2330_v29, %v2329_v58  ;;  %4082 = vst.msk [vmem:[%s5588_s11 + $0x2b0] sm:$0xff] %vm656_vm1, %v6405_v46  ;;  %v6412_v38 = vpop.f32.mrf.mxu1  ;;  %v2332_v56 = vsel %vm656_vm1, %v6294_v41, 0.0  ;;  %v2387_v61 = vmul.f32 %v6294_v41, %v6294_v41 }
 0x295   : > { %v2881_v5 = vsel %vm656_vm1, %v2838_v62, 0.0  ;;  %v2433_v17 = vadd.f32 %v2432_v44, %v2431_v43  ;;  %4147 = vst.msk [vmem:[%s5588_s11 + $0x3a8] sm:$0xff] %vm656_vm1, %v6412_v38  ;;  %v6422_v55 = vpop.f32.mrf.mxu0  ;;  %v2883_v30 = vsel %vm656_vm1, %v2839_v9, 0.0  ;;  %v2436_v51 = vsel %vm656_vm1, %v2388_v24, 0.0 }
 0x296   : > { %v2882_v23 = vadd.f32 %v2881_v5, %v2880_v2  ;;  %v2333_v32 = vadd.f32 %v2332_v56, %v2331_v53  ;;  %4085 = vst.msk [vmem:[%s5588_s11 + $0x2c8] sm:$0xff] %vm656_vm1, %v6422_v55  ;;  %v6429_v1 = vpop.f32.mrf.mxu1  ;;  %v2434_v41 = vsel %vm656_vm1, %v2387_v61, 0.0  ;;  %v2841_v26 = vmul.f32 %v6304_v14, %v6304_v14 }
 0x297   : > { %v2390_v42 = vmul.f32 %v6315_v27, %v6315_v27  ;;  %v2782_v50 = vadd.f32 %v2781_v12, %v2780_v35  ;;  %4146 = vst.msk [vmem:[%s5588_s11 + $0x3a0] sm:$0xff] %vm656_vm1, %v6429_v1  ;;  %v6439_v16 = vpop.f32.mrf.mxu0  ;;  %v2435_v59 = vadd.f32 %v2434_v41, %v2433_v17  ;;  %v2785_v54 = vsel %vm656_vm1, %v6304_v14, 0.0 }
 0x298   : > { %v2783_v15 = vsel %vm656_vm1, %v6322_v63, 0.0  ;;  %v2840_v8 = vmul.f32 %v6322_v63, %v6322_v63  ;;  %4084 = vst.msk [vmem:[%s5588_s11 + $0x2c0] sm:$0xff] %vm656_vm1, %v6439_v16  ;;  %v6450_v6 = vpop.f32.mrf.mxu1  ;;  %v2338_v25 = vsel %vm656_vm1, %v6315_v27, 0.0  ;;  %v2884_v0 = vadd.f32 %v2883_v30, %v2882_v23 }
 0x299   : > { %v2784_v31 = vadd.f32 %v2783_v15, %v2782_v50  ;;  %v2335_v36 = vadd.f32 %v2334_v47, %v2333_v32  ;;  %4149 = vst.msk [vmem:[%s5588_s11 + $0x3b8] sm:$0xff] %vm656_vm1, %v6450_v6  ;;  %v6457_v14 = vpop.f32.mrf.mxu0  ;;  %v2336_v63 = vsel %vm656_vm1, %v6332_v19, 0.0  ;;  %v2389_v29 = vmul.f32 %v6332_v19, %v6332_v19 }
 0x29a   : > { %v2885_v13 = vsel %vm656_vm1, %v2840_v8, 0.0  ;;  %v2437_v7 = vadd.f32 %v2436_v51, %v2435_v59  ;;  %4087 = vst.msk [vmem:[%s5588_s11 + $0x2d8] sm:$0xff] %vm656_vm1, %v6457_v14  ;;  %v6467_v27 = vpop.f32.mrf.mxu1  ;;  %v2887_v57 = vsel %vm656_vm1, %v2841_v26, 0.0  ;;  %v2440_v52 = vsel %vm656_vm1, %v2390_v42, 0.0 }
 0x29b   : > { %v2886_v3 = vadd.f32 %v2885_v13, %v2884_v0  ;;  %v2337_v18 = vadd.f32 %v2336_v63, %v2335_v36  ;;  %4148 = vst.msk [vmem:[%s5588_s11 + $0x3b0] sm:$0xff] %vm656_vm1, %v6467_v27  ;;  %v6474_v48 = vpop.f32.mrf.mxu0  ;;  %v2438_v19 = vsel %vm656_vm1, %v2389_v29, 0.0  ;;  %v2843_v34 = vmul.f32 %v6339_v4, %v6339_v4 }
 0x29c   : > { %v2392_v10 = vmul.f32 %v6349_v60, %v6349_v60  ;;  %v2786_v44 = vadd.f32 %v2785_v54, %v2784_v31  ;;  %4086 = vst.msk [vmem:[%s5588_s11 + $0x2d0] sm:$0xff] %vm656_vm1, %v6474_v48  ;;  %v6484_v40 = vpop.f32.mrf.mxu1  ;;  %v2439_v58 = vadd.f32 %v2438_v19, %v2437_v7  ;;  %v2789_v49 = vsel %vm656_vm1, %v6339_v4, 0.0 }
 0x29d   : > { %v2787_v9 = vsel %vm656_vm1, %v6360_v21, 0.0  ;;  %v2842_v24 = vmul.f32 %v6360_v21, %v6360_v21  ;;  %4151 = vst.msk [vmem:[%s5588_s11 + $0x3c8] sm:$0xff] %vm656_vm1, %v6484_v40  ;;  %v6495_v37 = vpop.f32.mrf.mxu0  ;;  %v2342_v43 = vsel %vm656_vm1, %v6349_v60, 0.0  ;;  %v2888_v11 = vadd.f32 %v2887_v57, %v2886_v3 }
 0x29e   : > { %v2788_v12 = vadd.f32 %v2787_v9, %v2786_v44  ;;  %v2339_v62 = vadd.f32 %v2338_v25, %v2337_v18  ;;  %4089 = vst.msk [vmem:[%s5588_s11 + $0x2e8] sm:$0xff] %vm656_vm1, %v6495_v37  ;;  %v6502_v4 = vpop.f32.mrf.mxu1  ;;  %v2340_v21 = vsel %vm656_vm1, %v6367_v22, 0.0  ;;  %v2391_v35 = vmul.f32 %v6367_v22, %v6367_v22 }
 0x29f   : > { %v2889_v47 = vsel %vm656_vm1, %v2842_v24, 0.0  ;;  %v2441_v2 = vadd.f32 %v2440_v52, %v2439_v58  ;;  %4150 = vst.msk [vmem:[%s5588_s11 + $0x3c0] sm:$0xff] %vm656_vm1, %v6502_v4  ;;  %v6512_v60 = vpop.f32.mrf.mxu0  ;;  %v2891_v53 = vsel %vm656_vm1, %v2843_v34, 0.0  ;;  %v2444_v5 = vsel %vm656_vm1, %v2392_v10, 0.0 }
 0x2a0   : > { %v2890_v56 = vadd.f32 %v2889_v47, %v2888_v11  ;;  %v2341_v61 = vadd.f32 %v2340_v21, %v2339_v62  ;;  %4088 = vst.msk [vmem:[%s5588_s11 + $0x2e0] sm:$0xff] %vm656_vm1, %v6512_v60  ;;  %v6519_v17 = vpop.f32.mrf.mxu1  ;;  %v2442_v22 = vsel %vm656_vm1, %v2391_v35, 0.0  ;;  %v2845_v30 = vmul.f32 %v6377_v20, %v6377_v20 }
 0x2a1   : > { %v2394_v51 = vmul.f32 %v6384_v39, %v6384_v39  ;;  %v2790_v23 = vadd.f32 %v2789_v49, %v2788_v12  ;;  %4153 = vst.msk [vmem:[%s5588_s11 + $0x3d8] sm:$0xff] %vm656_vm1, %v6519_v17  ;;  %v6529_v32 = vpop.f32.mrf.mxu0  ;;  %v2443_v41 = vadd.f32 %v2442_v22, %v2441_v2  ;;  %v2793_v26 = vsel %vm656_vm1, %v6377_v20, 0.0 }
 0x2a2   : > { %v2791_v42 = vsel %vm656_vm1, %v6394_v45, 0.0  ;;  %v2844_v50 = vmul.f32 %v6394_v45, %v6394_v45  ;;  %4091 = vst.msk [vmem:[%s5588_s11 + $0x2f8] sm:$0xff] %vm656_vm1, %v6529_v32  ;;  %v6540_v59 = vpop.f32.mrf.mxu1  ;;  %v2346_v54 = vsel %vm656_vm1, %v6384_v39, 0.0  ;;  %v2892_v8 = vadd.f32 %v2891_v53, %v2890_v56 }
 0x2a3   : > { %v2792_v15 = vadd.f32 %v2791_v42, %v2790_v23  ;;  %v2343_v25 = vadd.f32 %v2342_v43, %v2341_v61  ;;  %4152 = vst.msk [vmem:[%s5588_s11 + $0x3d0] sm:$0xff] %vm656_vm1, %v6540_v59  ;;  %v6547_v20 = vpop.f32.mrf.mxu0  ;;  %v2344_v45 = vsel %vm656_vm1, %v6405_v46, 0.0  ;;  %v2393_v0 = vmul.f32 %v6405_v46, %v6405_v46 }
 0x2a4   : > { %v2893_v31 = vsel %vm656_vm1, %v2844_v50, 0.0  ;;  %v2445_v36 = vadd.f32 %v2444_v5, %v2443_v41  ;;  %4090 = vst.msk [vmem:[%s5588_s11 + $0x2f0] sm:$0xff] %vm656_vm1, %v6547_v20  ;;  %v6557_v39 = vpop.f32.mrf.mxu1  ;;  %v2895_v13 = vsel %vm656_vm1, %v2845_v30, 0.0  ;;  %v2448_v63 = vsel %vm656_vm1, %v2394_v51, 0.0 }
 0x2a5   : > { %v2894_v29 = vadd.f32 %v2893_v31, %v2892_v8  ;;  %v2345_v7 = vadd.f32 %v2344_v45, %v2343_v25  ;;  %4155 = vst.msk [vmem:[%s5588_s11 + $0x3e8] sm:$0xff] %vm656_vm1, %v6557_v39  ;;  %v2446_v57 = vsel %vm656_vm1, %v2393_v0, 0.0  ;;  %v2847_v46 = vmul.f32 %v6412_v38, %v6412_v38 }
 0x2a6   : > { %v2396_v52 = vmul.f32 %v6422_v55, %v6422_v55  ;;  %v2794_v3 = vadd.f32 %v2793_v26, %v2792_v15  ;;  %v6569_v18 = vpop.f32.mrf.mxu1  ;;  %v2447_v19 = vadd.f32 %v2446_v57, %v2445_v36  ;;  %v2797_v34 = vsel %vm656_vm1, %v6412_v38, 0.0 }
 0x2a7   : > { %v2795_v10 = vsel %vm656_vm1, %v6429_v1, 0.0  ;;  %v2846_v44 = vmul.f32 %v6429_v1, %v6429_v1  ;;  %4154 = vst.msk [vmem:[%s5588_s11 + $0x3e0] sm:$0xff] %vm656_vm1, %v6569_v18  ;;  %v2350_v58 = vsel %vm656_vm1, %v6422_v55, 0.0  ;;  %v2896_v9 = vadd.f32 %v2895_v13, %v2894_v29 }
 0x2a8   : > { %v2796_v49 = vadd.f32 %v2795_v10, %v2794_v3  ;;  %v2347_v24 = vadd.f32 %v2346_v54, %v2345_v7  ;;  %v6582_v43 = vpop.f32.mrf.mxu1  ;;  %v2348_v12 = vsel %vm656_vm1, %v6439_v16, 0.0  ;;  %v2395_v1 = vmul.f32 %v6439_v16, %v6439_v16 }
 0x2a9   : > { %v2897_v38 = vsel %vm656_vm1, %v2846_v44, 0.0  ;;  %v2449_v11 = vadd.f32 %v2448_v63, %v2447_v19  ;;  %4157 = vst.msk [vmem:[%s5588_s11 + $0x3f8] sm:$0xff] %vm656_vm1, %v6582_v43  ;;  %v2899_v55 = vsel %vm656_vm1, %v2847_v46, 0.0  ;;  %v2452_v62 = vsel %vm656_vm1, %v2396_v52, 0.0 }
 0x2aa   : > { %v2898_v47 = vadd.f32 %v2897_v38, %v2896_v9  ;;  %v2349_v21 = vadd.f32 %v2348_v12, %v2347_v24  ;;  %v6594_v35 = vpop.f32.mrf.mxu1  ;;  %v2450_v2 = vsel %vm656_vm1, %v2395_v1, 0.0  ;;  %v2849_v53 = vmul.f32 %v6450_v6, %v6450_v6 }
 0x2ab   : > { %v2398_v16 = vmul.f32 %v6457_v14, %v6457_v14  ;;  %v2798_v5 = vadd.f32 %v2797_v34, %v2796_v49  ;;  %4156 = vst.msk [vmem:[%s5588_s11 + $0x3f0] sm:$0xff] %vm656_vm1, %v6594_v35  ;;  %v2451_v56 = vadd.f32 %v2450_v2, %v2449_v11  ;;  %v2801_v61 = vsel %vm656_vm1, %v6450_v6, 0.0 }
 0x2ac   : > { %v2799_v22 = vsel %vm656_vm1, %v6467_v27, 0.0  ;;  %v2848_v30 = vmul.f32 %v6467_v27, %v6467_v27  ;;  %v2354_v51 = vsel %vm656_vm1, %v6457_v14, 0.0  ;;  %v2900_v41 = vadd.f32 %v2899_v55, %v2898_v47 }
 0x2ad   : > { %v2800_v23 = vadd.f32 %v2799_v22, %v2798_v5  ;;  %v2351_v26 = vadd.f32 %v2350_v58, %v2349_v21  ;;  %v2352_v50 = vsel %vm656_vm1, %v6474_v48, 0.0  ;;  %v2397_v6 = vmul.f32 %v6474_v48, %v6474_v48 }
 0x2ae   : > { %v2901_v42 = vsel %vm656_vm1, %v2848_v30, 0.0  ;;  %v2453_v54 = vadd.f32 %v2452_v62, %v2451_v56  ;;  %v2903_v15 = vsel %vm656_vm1, %v2849_v53, 0.0  ;;  %v2456_v8 = vsel %vm656_vm1, %v2398_v16, 0.0 }
 0x2af   : > { %v2902_v27 = vadd.f32 %v2901_v42, %v2900_v41  ;;  %v2353_v25 = vadd.f32 %v2352_v50, %v2351_v26  ;;  %v2454_v14 = vsel %vm656_vm1, %v2397_v6, 0.0  ;;  %v2851_v31 = vmul.f32 %v6484_v40, %v6484_v40 }
 0x2b0   : > { %v2400_v45 = vmul.f32 %v6495_v37, %v6495_v37  ;;  %v2802_v0 = vadd.f32 %v2801_v61, %v2800_v23  ;;  %v2455_v36 = vadd.f32 %v2454_v14, %v2453_v54  ;;  %v2805_v48 = vsel %vm656_vm1, %v6484_v40, 0.0 }
 0x2b1   : > { %v2803_v13 = vsel %vm656_vm1, %v6502_v4, 0.0  ;;  %v2850_v63 = vmul.f32 %v6502_v4, %v6502_v4  ;;  %v2358_v29 = vsel %vm656_vm1, %v6495_v37, 0.0  ;;  %v2904_v57 = vadd.f32 %v2903_v15, %v2902_v27 }
 0x2b2   : > { %v2804_v7 = vadd.f32 %v2803_v13, %v2802_v0  ;;  %v2355_v46 = vadd.f32 %v2354_v51, %v2353_v25  ;;  %v2356_v3 = vsel %vm656_vm1, %v6512_v60, 0.0  ;;  %v2399_v40 = vmul.f32 %v6512_v60, %v6512_v60 }
 0x2b3   : > { %v2905_v52 = vsel %vm656_vm1, %v2850_v63, 0.0  ;;  %v2457_v19 = vadd.f32 %v2456_v8, %v2455_v36  ;;  %v2907_v34 = vsel %vm656_vm1, %v2851_v31, 0.0  ;;  %v2460_v10 = vsel %vm656_vm1, %v2400_v45, 0.0 }
 0x2b4   : > { %v2906_v4 = vadd.f32 %v2905_v52, %v2904_v57  ;;  %v2357_v44 = vadd.f32 %v2356_v3, %v2355_v46  ;;  %v2458_v37 = vsel %vm656_vm1, %v2399_v40, 0.0  ;;  %v2809_v58 = vsel %vm656_vm1, %v6519_v17, 0.0 }
 0x2b5   : > { %v2853_v49 = vmul.f32 %v6519_v17, %v6519_v17  ;;  %v2806_v9 = vadd.f32 %v2805_v48, %v2804_v7  ;;  %v2459_v24 = vadd.f32 %v2458_v37, %v2457_v19  ;;  %v2362_v60 = vsel %vm656_vm1, %v6529_v32, 0.0 }
 0x2b6   : > { %v2807_v38 = vsel %vm656_vm1, %v6540_v59, 0.0  ;;  %v2852_v12 = vmul.f32 %v6540_v59, %v6540_v59  ;;  %v2402_v1 = vmul.f32 %v6529_v32, %v6529_v32  ;;  %v2908_v55 = vadd.f32 %v2907_v34, %v2906_v4 }
 0x2b7   : > { %v2808_v11 = vadd.f32 %v2807_v38, %v2806_v9  ;;  %v2359_v62 = vadd.f32 %v2358_v29, %v2357_v44  ;;  %v2360_v17 = vsel %vm656_vm1, %v6547_v20, 0.0  ;;  %v2401_v21 = vmul.f32 %v6547_v20, %v6547_v20 }
 0x2b8   : > { %v2909_v47 = vsel %vm656_vm1, %v2852_v12, 0.0  ;;  %v2461_v2 = vadd.f32 %v2460_v10, %v2459_v24  ;;  %v2911_v53 = vsel %vm656_vm1, %v2853_v49, 0.0  ;;  %v2855_v59 = vmul.f32 %v6557_v39, %v6557_v39 }
 0x2b9   : > { %v2910_v16 = vadd.f32 %v2909_v47, %v2908_v55  ;;  %v2361_v5 = vadd.f32 %v2360_v17, %v2359_v62  ;;  %v2462_v32 = vsel %vm656_vm1, %v2401_v21, 0.0  ;;  %v2810_v56 = vadd.f32 %v2809_v58, %v2808_v11 }
 0x2ba   : > { %v2811_v61 = vsel %vm656_vm1, %v6569_v18, 0.0  ;;  %v2854_v22 = vmul.f32 %v6569_v18, %v6569_v18  ;;  %v2463_v51 = vadd.f32 %v2462_v32, %v2461_v2  ;;  %v2464_v23 = vsel %vm656_vm1, %v2402_v1, 0.0  ;;  %v2974_v32 = vld [vmem:[%s5588_s11 + $0x28] sm:$0xff] }
 0x2bb   : > { %v2363_v30 = vadd.f32 %v2362_v60, %v2361_v5  ;;  %v2912_v20 = vadd.f32 %v2911_v53, %v2910_v16  ;;  %v2813_v41 = vsel %vm656_vm1, %v6557_v39, 0.0  ;;  %v2812_v26 = vadd.f32 %v2811_v61, %v2810_v56  ;;  %v2969_v16 = vld [vmem:[%s5588_s11] sm:$0xff]  ;;  %v2972_v5 = vld [vmem:[%s5588_s11 + $0x18] sm:$0xff] }
 0x2bc   : > { %v2913_v42 = vsel %vm656_vm1, %v2854_v22, 0.0  ;;  %v2465_v6 = vadd.f32 %v2464_v23, %v2463_v51  ;;  %v2815_v15 = vsel %vm656_vm1, %v6594_v35, 0.0  ;;  %v2915_v8 = vsel %vm656_vm1, %v2855_v59, 0.0  ;;  %v2971_v59 = vld [vmem:[%s5588_s11 + $0x10] sm:$0xff]  ;;  %v2973_v56 = vld [vmem:[%s5588_s11 + $0x20] sm:$0xff]  ;;  %v2976_v61 = vld [vmem:[%s5588_s11 + $0x38] sm:$0xff] }
 0x2bd   : > { %v2364_v50 = vrot.slane %v2363_v30, 4  ;;  %v2914_v54 = vadd.f32 %v2913_v42, %v2912_v20  ;;  %v2857_v18 = vmul.f32 %v6582_v43, %v6582_v43  ;;  %v2814_v27 = vadd.f32 %v2813_v41, %v2812_v26  ;;  %v2975_v22 = vld [vmem:[%s5588_s11 + $0x30] sm:$0xff]  ;;  %v2977_v51 = vld [vmem:[%s5588_s11 + $0x40] sm:$0xff]  ;;  %v2980_v20 = vld [vmem:[%s5588_s11 + $0x58] sm:$0xff] }
 0x2be   : > { %v2856_v25 = vmul.f32 %v6594_v35, %v6594_v35  ;;  %v2466_v39 = vrot.slane %v2465_v6, 4  ;;  %v2817_v13 = vsel %vm656_vm1, %v6582_v43, 0.0  ;;  %v2979_v41 = vld [vmem:[%s5588_s11 + $0x50] sm:$0xff]  ;;  %v2982_v26 = vld [vmem:[%s5588_s11 + $0x68] sm:$0xff]  ;;  %v2981_v42 = vld [vmem:[%s5588_s11 + $0x60] sm:$0xff] }
 0x2bf   : > { %v2365_v14 = vadd.f32 %v2364_v50, %v2363_v30  ;;  %v2916_v31 = vadd.f32 %v2915_v8, %v2914_v54  ;;  %v2816_v45 = vadd.f32 %v2815_v15, %v2814_v27  ;;  %v2919_v29 = vsel %vm656_vm1, %v2857_v18, 0.0  ;;  %v2978_v30 = vld [vmem:[%s5588_s11 + $0x48] sm:$0xff]  ;;  %v2984_v8 = vld [vmem:[%s5588_s11 + $0x78] sm:$0xff]  ;;  %v2983_v18 = vld [vmem:[%s5588_s11 + $0x70] sm:$0xff] }
 0x2c0   : > { %v2917_v0 = vsel %vm656_vm1, %v2856_v25, 0.0  ;;  %v2467_v48 = vadd.f32 %v2466_v39, %v2465_v6  ;;  %v2986_v27 = vld [vmem:[%s5588_s11 + $0x88] sm:$0xff] }
 0x2c1   : > { %v2366_v36 = vrot.slane %v2365_v14, 2  ;;  %v2918_v63 = vadd.f32 %v2917_v0, %v2916_v31  ;;  %v2818_v7 = vadd.f32 %v2817_v13, %v2816_v45  ;;  %v2985_v45 = vld [vmem:[%s5588_s11 + $0x80] sm:$0xff]  ;;  %v2988_v0 = vld [vmem:[%s5588_s11 + $0x98] sm:$0xff] }
 0x2c2   : > { %v2468_v46 = vrot.slane %v2467_v48, 2 }
 0x2c3   : > { %v2367_v57 = vadd.f32 %v2366_v36, %v2365_v14  ;;  %v2920_v52 = vadd.f32 %v2919_v29, %v2918_v63  ;;  %v2819_v3 = vrot.slane %v2818_v7, 4  ;;  %v2987_v36 = vld [vmem:[%s5588_s11 + $0x90] sm:$0xff] }
 0x2c4   : > { %v2469_v35 = vadd.f32 %v2468_v46, %v2467_v48  ;;  %v2992_v46 = vld [vmem:[%s5588_s11 + $0xb8] sm:$0xff] }
 0x2c5   : > { %v2921_v40 = vrot.slane %v2920_v52, 4  ;;  %v2368_v19 = vrot.slane %v2367_v57, 1  ;;  %v2820_v34 = vadd.f32 %v2819_v3, %v2818_v7  ;;  %v2990_v7 = vld [vmem:[%s5588_s11 + $0xa8] sm:$0xff] }
 0x2c6   : > { %v2470_v10 = vrot.slane %v2469_v35, 1 }
 0x2c7   : > { %v2922_v4 = vadd.f32 %v2921_v40, %v2920_v52  ;;  %v2821_v44 = vrot.slane %v2820_v34, 2  ;;  %v2369_v58 = vadd.f32 %v2368_v19, %v2367_v57  ;;  %v2989_v57 = vld [vmem:[%s5588_s11 + $0xa0] sm:$0xff]  ;;  %v2991_v19 = vld [vmem:[%s5588_s11 + $0xb0] sm:$0xff] }
 0x2c8   : > { %v2471_v9 = vadd.f32 %v2470_v10, %v2469_v35  ;;  %v2993_v10 = vld [vmem:[%s5588_s11 + $0xc0] sm:$0xff] }
 0x2c9   : > { %v2923_v37 = vrot.slane %v2922_v4, 2  ;;  %v2822_v49 = vadd.f32 %v2821_v44, %v2820_v34  ;;  %v2370_v38 = vadd.f32 %v2369_v58, %v6208_v28  ;;  %v2994_v34 = vld [vmem:[%s5588_s11 + $0xc8] sm:$0xff] }
 0x2ca   : > { %v2472_v1 = vadd.f32 %v2471_v9, %v6228_v33  ;;  %v2970_v33 = vld [vmem:[%s5588_s11 + $0x8] sm:$0xff]  ;;  %v2995_v9 = vld [vmem:[%s5588_s11 + $0xd0] sm:$0xff] }
 0x2cb   : > { %v2924_v43 = vadd.f32 %v2923_v37, %v2922_v4  ;;  %v2823_v24 = vrot.slane %v2822_v49, 1 }
 0x2cd   : > { %v2925_v60 = vrot.slane %v2924_v43, 1  ;;  %v2824_v12 = vadd.f32 %v2823_v24, %v2822_v49  ;;  %v2996_v49 = vld [vmem:[%s5588_s11 + $0xd8] sm:$0xff] }
 0x2cf   : > { %v2926_v11 = vadd.f32 %v2925_v60, %v2924_v43  ;;  %v2825_v55 = vadd.f32 %v2824_v12, %v2370_v38  ;;  %v2998_v43 = vld [vmem:[%s5588_s11 + $0xe8] sm:$0xff] }
 0x2d1   : > { %v2927_v62 = vadd.f32 %v2926_v11, %v2472_v1  ;;  %v2962_v47 = vmul.f32 0.0009765625, %v2825_v55  ;;  %v2997_v1 = vld [vmem:[%s5588_s11 + $0xe0] sm:$0xff]  ;;  %v3000_v11 = vld [vmem:[%s5588_s11 + $0xf8] sm:$0xff]  ;;  %v2999_v55 = vld [vmem:[%s5588_s11 + $0xf0] sm:$0xff] }
 0x2d3   : > { %v2963_v17 = vmul.f32 0.0009765625, %v2927_v62  ;;  %v2964_v21 = vmul.f32 %v2962_v47, %v2962_v47 }
 0x2d5   : > { %v2965_v2 = vsub.f32 %v2963_v17, %v2964_v21 }
 0x2d7   : > { %v2966_v28 = vadd.f32 1e-05, %v2965_v2 }
 0x2d9   : > { %4709 = vrsqrt.f32 %v2966_v28 }
 0x2e6   : > { %v6682_v53 = vpop.eup %4709 }
 0x2e7   : > { %v6696_v23 = vmul.f32 %v6682_v53, %v2962_v47  ;;  %v3001_v50 = vmul.f32 %v6682_v53, %v2969_v16  ;;  %v3002_v6 = vmul.f32 %v6682_v53, %v2970_v33  ;;  %v3003_v54 = vmul.f32 %v6682_v53, %v2971_v59 }
 0x2e8   : > { %v3004_v15 = vmul.f32 %v6682_v53, %v2972_v5  ;;  %v3005_v25 = vmul.f32 %v6682_v53, %v2973_v56  ;;  %v3006_v14 = vmul.f32 %v6682_v53, %v2974_v32  ;;  %v3007_v39 = vmul.f32 %v6682_v53, %v2975_v22 }
 0x2e9   : > { %v3008_v31 = vmul.f32 %v6682_v53, %v2976_v61  ;;  %v3009_v48 = vmul.f32 %v6682_v53, %v2977_v51  ;;  %v3010_v13 = vmul.f32 %v6682_v53, %v2978_v30  ;;  %v3011_v63 = vmul.f32 %v6682_v53, %v2979_v41 }
 0x2ea   : > { %v3012_v29 = vmul.f32 %v6682_v53, %v2980_v20  ;;  %v3013_v52 = vmul.f32 %v6682_v53, %v2981_v42  ;;  %v3014_v3 = vmul.f32 %v6682_v53, %v2982_v26  ;;  %v3015_v35 = vmul.f32 %v6682_v53, %v2983_v18 }
 0x2eb   : > { %v3016_v40 = vmul.f32 %v6682_v53, %v2984_v8  ;;  %v3017_v4 = vmul.f32 %v6682_v53, %v2985_v45  ;;  %v3018_v44 = vmul.f32 %v6682_v53, %v2986_v27  ;;  %v3019_v37 = vmul.f32 %v6682_v53, %v2987_v36 }
 0x2ec   : > { %v3020_v58 = vmul.f32 %v6682_v53, %v2988_v0  ;;  %v3021_v24 = vmul.f32 %v6682_v53, %v2989_v57  ;;  %v3022_v60 = vmul.f32 %v6682_v53, %v2990_v7  ;;  %v3023_v38 = vmul.f32 %v6682_v53, %v2991_v19 }
 0x2ed   : > { %v3024_v12 = vmul.f32 %v6682_v53, %v2992_v46  ;;  %v3025_v62 = vmul.f32 %v6682_v53, %v2993_v10  ;;  %v3026_v47 = vmul.f32 %v6682_v53, %v2994_v34  ;;  %v3027_v17 = vmul.f32 %v6682_v53, %v2995_v9 }
 0x2ee   : > { %v3028_v21 = vmul.f32 %v6682_v53, %v2996_v49  ;;  %v3029_v2 = vmul.f32 %v6682_v53, %v2997_v1  ;;  %v3030_v28 = vmul.f32 %v6682_v53, %v2998_v43  ;;  %v3031_v33 = vmul.f32 %v6682_v53, %v2999_v55 }
 0x2ef   : > { %v3032_v16 = vmul.f32 %v6682_v53, %v3000_v11  ;;  %v3033_v5 = vsub.f32 %v3001_v50, %v6696_v23  ;;  %v6753_v59 = vsub.f32 %v3002_v6, %v6696_v23  ;;  %v6756_v32 = vsub.f32 %v3003_v54, %v6696_v23 }
 0x2f0   : > { %v6759_v56 = vsub.f32 %v3004_v15, %v6696_v23  ;;  %v6762_v61 = vsub.f32 %v3005_v25, %v6696_v23  ;;  %v6765_v22 = vsub.f32 %v3006_v14, %v6696_v23  ;;  %v6768_v30 = vsub.f32 %v3007_v39, %v6696_v23 }
 0x2f1   : > { %v6771_v51 = vsub.f32 %v3008_v31, %v6696_v23  ;;  %v6774_v20 = vsub.f32 %v3009_v48, %v6696_v23  ;;  %v6777_v41 = vsub.f32 %v3010_v13, %v6696_v23  ;;  %v6780_v26 = vsub.f32 %v3011_v63, %v6696_v23 }
 0x2f2   : > { %v6783_v42 = vsub.f32 %v3012_v29, %v6696_v23  ;;  %v6786_v50 = vsub.f32 %v3013_v52, %v6696_v23  ;;  %v6789_v6 = vsub.f32 %v3014_v3, %v6696_v23  ;;  %v6792_v54 = vsub.f32 %v3015_v35, %v6696_v23 }
 0x2f3   : > { %v6795_v15 = vsub.f32 %v3016_v40, %v6696_v23  ;;  %v6798_v8 = vsub.f32 %v3017_v4, %v6696_v23  ;;  %v6801_v18 = vsub.f32 %v3018_v44, %v6696_v23  ;;  %v6804_v27 = vsub.f32 %v3019_v37, %v6696_v23 }
 0x2f4   : > { %v6807_v25 = vsub.f32 %v3020_v58, %v6696_v23  ;;  %v6810_v14 = vsub.f32 %v3021_v24, %v6696_v23  ;;  %v6813_v39 = vsub.f32 %v3022_v60, %v6696_v23  ;;  %v6816_v31 = vsub.f32 %v3023_v38, %v6696_v23 }
 0x2f5   : > { %v6819_v45 = vsub.f32 %v3024_v12, %v6696_v23  ;;  %v6822_v0 = vsub.f32 %v3025_v62, %v6696_v23  ;;  %v6825_v36 = vsub.f32 %v3026_v47, %v6696_v23  ;;  %v6828_v48 = vsub.f32 %v3027_v17, %v6696_v23 }
 0x2f6   : > { %v6831_v13 = vsub.f32 %v3028_v21, %v6696_v23  ;;  %v6834_v63 = vsub.f32 %v3029_v2, %v6696_v23  ;;  %v6837_v29 = vsub.f32 %v3030_v28, %v6696_v23  ;;  %v6840_v7 = vsub.f32 %v3031_v33, %v6696_v23 }
 0x2f7   : > { %vm3065_vm5 = vcmp.ge.f32.partialorder %v3033_v5, 0.0  ;;  %vm3066_vm6 = vcmp.ge.f32.partialorder %v6753_v59, 0.0  ;;  %vm3067_vm7 = vcmp.ge.f32.partialorder %v6756_v32, 0.0  ;;  %vm3068_vm8 = vcmp.ge.f32.partialorder %v6759_v56, 0.0 }
 0x2f8   : > { %vm3069_vm9 = vcmp.ge.f32.partialorder %v6762_v61, 0.0  ;;  %vm3070_vm10 = vcmp.ge.f32.partialorder %v6765_v22, 0.0  ;;  %vm3071_vm11 = vcmp.ge.f32.partialorder %v6768_v30, 0.0  ;;  %vm3072_vm12 = vcmp.ge.f32.partialorder %v6771_v51, 0.0 }
 0x2f9   : > { %v3097_v57 = vmul.f32 0.2, %v3033_v5  ;;  %v3098_v46 = vmul.f32 0.2, %v6753_v59  ;;  %v6856_v52 = vsub.f32 %v3032_v16, %v6696_v23  ;;  %vm3079_vm4 = vcmp.ge.f32.partialorder %v6792_v54, 0.0 }
 0x2fa   : > { %v3099_v3 = vmul.f32 0.2, %v6756_v32  ;;  %v3100_v35 = vmul.f32 0.2, %v6759_v56  ;;  %v3101_v40 = vmul.f32 0.2, %v6762_v61 }
 0x2fb   : > { %vm3084_vm15 = vcmp.ge.f32.partialorder %v6807_v25, 0.0  ;;  %vm3085_vm3 = vcmp.ge.f32.partialorder %v6810_v14, 0.0  ;;  %v3102_v19 = vmul.f32 0.2, %v6765_v22  ;;  %v3103_v34 = vmul.f32 0.2, %v6768_v30 }
 0x2fc   : > { %v3104_v10 = vmul.f32 0.2, %v6771_v51  ;;  %v3129_v4 = vsel %vm3065_vm5, %v3033_v5, %v3097_v57  ;;  %vm3086_vm14 = vcmp.ge.f32.partialorder %v6813_v39, 0.0  ;;  %v3105_v44 = vmul.f32 0.2, %v6774_v20 }
 0x2fd   : > { %v3106_v37 = vmul.f32 0.2, %v6777_v41  ;;  %v3107_v58 = vmul.f32 0.2, %v6780_v26  ;;  %v3130_v49 = vsel %vm3066_vm6, %v6753_v59, %v3098_v46  ;;  %3161 = vst.msk [vmem:[%s5588_s11] sm:$0xff] %vm656_vm1, %v3129_v4  ;;  %vm3090_vm5 = vcmp.ge.f32.partialorder %v6825_v36, 0.0 }
 0x2fe   : > { %vm3092_vm2 = vcmp.ge.f32.partialorder %v6831_v13, 0.0  ;;  %v3108_v9 = vmul.f32 0.2, %v6783_v42  ;;  %v3109_v43 = vmul.f32 0.2, %v6786_v50  ;;  %v3131_v60 = vsel %vm3067_vm7, %v6756_v32, %v3099_v3  ;;  %3162 = vst.msk [vmem:[%s5588_s11 + $0x8] sm:$0xff] %vm656_vm1, %v3130_v49 }
 0x2ff   : > { %v3110_v24 = vmul.f32 0.2, %v6789_v6  ;;  %vm3094_vm6 = vcmp.ge.f32.partialorder %v6837_v29, 0.0  ;;  %vm3095_vm13 = vcmp.ge.f32.partialorder %v6840_v7, 0.0  ;;  %vm3096_vm0 = vcmp.ge.f32.partialorder %v6856_v52, 0.0  ;;  %3163 = vst.msk [vmem:[%s5588_s11 + $0x10] sm:$0xff] %vm656_vm1, %v3131_v60 }
 0x300   : > { %v3111_v38 = vmul.f32 0.2, %v6792_v54  ;;  %v3112_v12 = vmul.f32 0.2, %v6795_v15  ;;  %v3113_v1 = vmul.f32 0.2, %v6798_v8  ;;  %v3132_v11 = vsel %vm3068_vm8, %v6759_v56, %v3100_v35 }
 0x301   : > { %v3114_v55 = vmul.f32 0.2, %v6801_v18  ;;  %v3115_v62 = vmul.f32 0.2, %v6804_v27  ;;  %v3116_v47 = vmul.f32 0.2, %v6807_v25  ;;  %v3133_v17 = vsel %vm3069_vm9, %v6762_v61, %v3101_v40 }
 0x302   : > { %3164 = vst.msk [vmem:[%s5588_s11 + $0x18] sm:$0xff] %vm656_vm1, %v3132_v11  ;;  %v3117_v21 = vmul.f32 0.2, %v6810_v14  ;;  %v3118_v2 = vmul.f32 0.2, %v6813_v39  ;;  %v3134_v33 = vsel %vm3070_vm10, %v6765_v22, %v3102_v19  ;;  %3165 = vst.msk [vmem:[%s5588_s11 + $0x20] sm:$0xff] %vm656_vm1, %v3133_v17  ;;  %v3135_v32 = vsel %vm3071_vm11, %v6768_v30, %v3103_v34 }
 0x303   : > { %v3119_v28 = vmul.f32 0.2, %v6816_v31  ;;  %v3120_v16 = vmul.f32 0.2, %v6819_v45  ;;  %v3121_v5 = vmul.f32 0.2, %v6822_v0  ;;  %v3136_v57 = vsel %vm3072_vm12, %v6771_v51, %v3104_v10 }
 0x304   : > { %v3122_v59 = vmul.f32 0.2, %v6825_v36  ;;  %3166 = vst.msk [vmem:[%s5588_s11 + $0x28] sm:$0xff] %vm656_vm1, %v3134_v33  ;;  %v3123_v56 = vmul.f32 0.2, %v6828_v48  ;;  %3167 = vst.msk [vmem:[%s5588_s11 + $0x30] sm:$0xff] %vm656_vm1, %v3135_v32 }
 0x305   : > { %v3124_v61 = vmul.f32 0.2, %v6831_v13  ;;  %v3125_v22 = vmul.f32 0.2, %v6834_v63  ;;  %v3126_v46 = vmul.f32 0.2, %v6837_v29 }
 0x306   : > { %v3127_v30 = vmul.f32 0.2, %v6840_v7  ;;  %v3128_v3 = vmul.f32 0.2, %v6856_v52  ;;  %vm8265_vm7 = vcmp.ge.f32.partialorder %v6774_v20, 0.0  ;;  %3168 = vst.msk [vmem:[%s5588_s11 + $0x38] sm:$0xff] %vm656_vm1, %v3136_v57 }
 0x307   : > { %v3137_v35 = vsel %vm8265_vm7, %v6774_v20, %v3105_v44  ;;  %vm8266_vm8 = vcmp.ge.f32.partialorder %v6777_v41, 0.0  ;;  %vm8267_vm9 = vcmp.ge.f32.partialorder %v6780_v26, 0.0  ;;  %vm8268_vm10 = vcmp.ge.f32.partialorder %v6783_v42, 0.0  ;;  %v4163_v34 = vld [vmem:[%s5588_s11 + $0x128] sm:$0xff]  ;;  %v4162_v10 = vld [vmem:[%s5588_s11 + $0x120] sm:$0xff]  ;;  %v4165_v4 = vld [vmem:[%s5588_s11 + $0x138] sm:$0xff] }
 0x308   : > { %v3138_v51 = vsel %vm8266_vm8, %v6777_v41, %v3106_v37  ;;  %v3139_v40 = vsel %vm8267_vm9, %v6780_v26, %v3107_v58  ;;  %v3140_v19 = vsel %vm8268_vm10, %v6783_v42, %v3108_v9  ;;  %vm8269_vm11 = vcmp.ge.f32.partialorder %v6786_v50, 0.0  ;;  %3169 = vst.msk [vmem:[%s5588_s11 + $0x40] sm:$0xff] %vm656_vm1, %v3137_v35  ;;  %v4164_v44 = vld [vmem:[%s5588_s11 + $0x130] sm:$0xff]  ;;  %v4167_v37 = vld [vmem:[%s5588_s11 + $0x148] sm:$0xff]  ;;  %v4166_v58 = vld [vmem:[%s5588_s11 + $0x140] sm:$0xff] }
 0x309   : > { %v3141_v20 = vsel %vm8269_vm11, %v6786_v50, %v3109_v43  ;;  %vm8270_vm12 = vcmp.ge.f32.partialorder %v6789_v6, 0.0  ;;  %v3143_v26 = vsel %vm3079_vm4, %v6792_v54, %v3111_v38  ;;  %vm8271_vm7 = vcmp.ge.f32.partialorder %v6795_v15, 0.0  ;;  %3170 = vst.msk [vmem:[%s5588_s11 + $0x48] sm:$0xff] %vm656_vm1, %v3138_v51  ;;  %3171 = vst.msk [vmem:[%s5588_s11 + $0x50] sm:$0xff] %vm656_vm1, %v3139_v40  ;;  %v4169_v49 = vld [vmem:[%s5588_s11 + $0x158] sm:$0xff]  ;;  %v4168_v9 = vld [vmem:[%s5588_s11 + $0x150] sm:$0xff] }
 0x30a   : > { %v3142_v41 = vsel %vm8270_vm12, %v6789_v6, %v3110_v24  ;;  %v3144_v42 = vsel %vm8271_vm7, %v6795_v15, %v3112_v12  ;;  %vm8272_vm8 = vcmp.ge.f32.partialorder %v6798_v8, 0.0  ;;  %3172 = vst.msk [vmem:[%s5588_s11 + $0x58] sm:$0xff] %vm656_vm1, %v3140_v19  ;;  %3173 = vst.msk [vmem:[%s5588_s11 + $0x60] sm:$0xff] %vm656_vm1, %v3141_v20  ;;  %vm8273_vm4 = vcmp.ge.f32.partialorder %v6801_v18, 0.0  ;;  %v4171_v43 = vld [vmem:[%s5588_s11 + $0x168] sm:$0xff]  ;;  %v4170_v24 = vld [vmem:[%s5588_s11 + $0x160] sm:$0xff] }
 0x30b   : > { %v3145_v50 = vsel %vm8272_vm8, %v6798_v8, %v3113_v1  ;;  %v3146_v6 = vsel %vm8273_vm4, %v6801_v18, %v3114_v55  ;;  %vm8274_vm9 = vcmp.ge.f32.partialorder %v6804_v27, 0.0  ;;  %v3148_v15 = vsel %vm3084_vm15, %v6807_v25, %v3116_v47  ;;  %3174 = vst.msk [vmem:[%s5588_s11 + $0x68] sm:$0xff] %vm656_vm1, %v3142_v41  ;;  %3175 = vst.msk [vmem:[%s5588_s11 + $0x70] sm:$0xff] %vm656_vm1, %v3143_v26  ;;  %v4173_v11 = vld [vmem:[%s5588_s11 + $0x178] sm:$0xff]  ;;  %v4172_v55 = vld [vmem:[%s5588_s11 + $0x170] sm:$0xff] }
 0x30c   : > { %v3147_v54 = vsel %vm8274_vm9, %v6804_v27, %v3115_v62  ;;  %v3149_v8 = vsel %vm3085_vm3, %v6810_v14, %v3117_v21  ;;  %3176 = vst.msk [vmem:[%s5588_s11 + $0x78] sm:$0xff] %vm656_vm1, %v3144_v42  ;;  %3177 = vst.msk [vmem:[%s5588_s11 + $0x80] sm:$0xff] %vm656_vm1, %v3145_v50  ;;  %v3150_v18 = vsel %vm3086_vm14, %v6813_v39, %v3118_v2  ;;  %vm8275_vm15 = vcmp.ge.f32.partialorder %v6816_v31, 0.0  ;;  %v4175_v62 = vld [vmem:[%s5588_s11 + $0x188] sm:$0xff]  ;;  %v4177_v33 = vld [vmem:[%s5588_s11 + $0x198] sm:$0xff] }
 0x30d   : > { %v3151_v27 = vsel %vm8275_vm15, %v6816_v31, %v3119_v28  ;;  %vm8276_vm3 = vcmp.ge.f32.partialorder %v6819_v45, 0.0  ;;  %vm8277_vm10 = vcmp.ge.f32.partialorder %v6822_v0, 0.0  ;;  %3178 = vst.msk [vmem:[%s5588_s11 + $0x88] sm:$0xff] %vm656_vm1, %v3146_v6  ;;  %3179 = vst.msk [vmem:[%s5588_s11 + $0x90] sm:$0xff] %vm656_vm1, %v3147_v54  ;;  %v3154_v39 = vsel %vm3090_vm5, %v6825_v36, %v3122_v59  ;;  %v4174_v28 = vld [vmem:[%s5588_s11 + $0x180] sm:$0xff]  ;;  %v4181_v57 = vld [vmem:[%s5588_s11 + $0x1b8] sm:$0xff] }
 0x30e   : > { %v3152_v25 = vsel %vm8276_vm3, %v6819_v45, %v3120_v16  ;;  %v3153_v14 = vsel %vm8277_vm10, %v6822_v0, %v3121_v5  ;;  %3180 = vst.msk [vmem:[%s5588_s11 + $0x98] sm:$0xff] %vm656_vm1, %v3148_v15  ;;  %3181 = vst.msk [vmem:[%s5588_s11 + $0xa0] sm:$0xff] %vm656_vm1, %v3149_v8  ;;  %vm8278_vm14 = vcmp.ge.f32.partialorder %v6828_v48, 0.0  ;;  %v3156_v45 = vsel %vm3092_vm2, %v6831_v13, %v3124_v61  ;;  %v4176_v16 = vld [vmem:[%s5588_s11 + $0x190] sm:$0xff]  ;;  %v4179_v61 = vld [vmem:[%s5588_s11 + $0x1a8] sm:$0xff] }
 0x30f   : > { %v3155_v31 = vsel %vm8278_vm14, %v6828_v48, %v3123_v56  ;;  %vm8279_vm11 = vcmp.ge.f32.partialorder %v6834_v63, 0.0  ;;  %3182 = vst.msk [vmem:[%s5588_s11 + $0xa8] sm:$0xff] %vm656_vm1, %v3150_v18  ;;  %3183 = vst.msk [vmem:[%s5588_s11 + $0xb0] sm:$0xff] %vm656_vm1, %v3151_v27  ;;  %v3158_v36 = vsel %vm3094_vm6, %v6837_v29, %v3126_v46  ;;  %v3159_v48 = vsel %vm3095_vm13, %v6840_v7, %v3127_v30  ;;  %v4158_v29 = vld [vmem:[%s5588_s11 + $0x100] sm:$0xff]  ;;  %v4161_v7 = vld [vmem:[%s5588_s11 + $0x118] sm:$0xff] }
 0x310   : > { %v3157_v0 = vsel %vm8279_vm11, %v6834_v63, %v3125_v22  ;;  %3184 = vst.msk [vmem:[%s5588_s11 + $0xb8] sm:$0xff] %vm656_vm1, %v3152_v25  ;;  %3185 = vst.msk [vmem:[%s5588_s11 + $0xc0] sm:$0xff] %vm656_vm1, %v3153_v14  ;;  %v3160_v13 = vsel %vm3096_vm0, %v6856_v52, %v3128_v3  ;;  %v4159_v63 = vld [vmem:[%s5588_s11 + $0x108] sm:$0xff]  ;;  %v4160_v52 = vld [vmem:[%s5588_s11 + $0x110] sm:$0xff]  ;;  %v3225_v60 = vmul.f32 %v6682_v53, %v4158_v29 }
 0x311   : > { %3186 = vst.msk [vmem:[%s5588_s11 + $0xc8] sm:$0xff] %vm656_vm1, %v3154_v39  ;;  %3187 = vst.msk [vmem:[%s5588_s11 + $0xd0] sm:$0xff] %vm656_vm1, %v3155_v31  ;;  %v3226_v38 = vmul.f32 %v6682_v53, %v4159_v63  ;;  %v3227_v12 = vmul.f32 %v6682_v53, %v4160_v52  ;;  %v3228_v1 = vmul.f32 %v6682_v53, %v4161_v7  ;;  %v4178_v22 = vld [vmem:[%s5588_s11 + $0x1a0] sm:$0xff]  ;;  %v4180_v51 = vld [vmem:[%s5588_s11 + $0x1b0] sm:$0xff] }
 0x312   : > { %3188 = vst.msk [vmem:[%s5588_s11 + $0xd8] sm:$0xff] %vm656_vm1, %v3156_v45  ;;  %3189 = vst.msk [vmem:[%s5588_s11 + $0xe0] sm:$0xff] %vm656_vm1, %v3157_v0  ;;  %v3229_v47 = vmul.f32 %v6682_v53, %v4162_v10  ;;  %v3230_v17 = vmul.f32 %v6682_v53, %v4163_v34  ;;  %v3231_v21 = vmul.f32 %v6682_v53, %v4164_v44  ;;  %v4183_v40 = vld [vmem:[%s5588_s11 + $0x1c8] sm:$0xff]  ;;  %v4182_v19 = vld [vmem:[%s5588_s11 + $0x1c0] sm:$0xff] }
 0x313   : > { %3190 = vst.msk [vmem:[%s5588_s11 + $0xe8] sm:$0xff] %vm656_vm1, %v3158_v36  ;;  %3191 = vst.msk [vmem:[%s5588_s11 + $0xf0] sm:$0xff] %vm656_vm1, %v3159_v48  ;;  %v3232_v2 = vmul.f32 %v6682_v53, %v4165_v4  ;;  %v3233_v5 = vmul.f32 %v6682_v53, %v4166_v58  ;;  %v3234_v59 = vmul.f32 %v6682_v53, %v4167_v37  ;;  %v4185_v50 = vld [vmem:[%s5588_s11 + $0x1d8] sm:$0xff]  ;;  %v4184_v6 = vld [vmem:[%s5588_s11 + $0x1d0] sm:$0xff] }
 0x314   : > { %3192 = vst.msk [vmem:[%s5588_s11 + $0xf8] sm:$0xff] %vm656_vm1, %v3160_v13  ;;  %v3235_v32 = vmul.f32 %v6682_v53, %v4168_v9  ;;  %v3236_v56 = vmul.f32 %v6682_v53, %v4169_v49  ;;  %v3237_v46 = vmul.f32 %v6682_v53, %v4170_v24  ;;  %v3238_v30 = vmul.f32 %v6682_v53, %v4171_v43  ;;  %v4187_v54 = vld [vmem:[%s5588_s11 + $0x1e8] sm:$0xff]  ;;  %v4186_v25 = vld [vmem:[%s5588_s11 + $0x1e0] sm:$0xff]  ;;  %v4189_v14 = vld [vmem:[%s5588_s11 + $0x1f8] sm:$0xff] }
 0x315   : > { %v3239_v3 = vmul.f32 %v6682_v53, %v4172_v55  ;;  %v3240_v35 = vmul.f32 %v6682_v53, %v4173_v11  ;;  %v3241_v20 = vmul.f32 %v6682_v53, %v4174_v28  ;;  %v3242_v41 = vmul.f32 %v6682_v53, %v4175_v62  ;;  %v4188_v39 = vld [vmem:[%s5588_s11 + $0x1f0] sm:$0xff] }
 0x316   : > { %v3243_v26 = vmul.f32 %v6682_v53, %v4176_v16  ;;  %v3244_v42 = vmul.f32 %v6682_v53, %v4177_v33  ;;  %v3245_v15 = vmul.f32 %v6682_v53, %v4178_v22  ;;  %v3246_v8 = vmul.f32 %v6682_v53, %v4179_v61 }
 0x317   : > { %v3247_v18 = vmul.f32 %v6682_v53, %v4180_v51  ;;  %v3248_v27 = vmul.f32 %v6682_v53, %v4181_v57  ;;  %v3249_v31 = vmul.f32 %v6682_v53, %v4182_v19  ;;  %v3250_v45 = vmul.f32 %v6682_v53, %v4183_v40 }
 0x318   : > { %v3251_v0 = vmul.f32 %v6682_v53, %v4184_v6  ;;  %v3252_v36 = vmul.f32 %v6682_v53, %v4185_v50  ;;  %v3253_v48 = vmul.f32 %v6682_v53, %v4186_v25  ;;  %v3254_v13 = vmul.f32 %v6682_v53, %v4187_v54 }
 0x319   : > { %v3255_v63 = vmul.f32 %v6682_v53, %v4188_v39  ;;  %v3256_v29 = vmul.f32 %v6682_v53, %v4189_v14  ;;  %v3257_v7 = vsub.f32 %v3225_v60, %v6696_v23  ;;  %v7131_v52 = vsub.f32 %v3226_v38, %v6696_v23 }
 0x31a   : > { %v7134_v34 = vsub.f32 %v3227_v12, %v6696_v23  ;;  %v7137_v10 = vsub.f32 %v3228_v1, %v6696_v23  ;;  %v7140_v4 = vsub.f32 %v3229_v47, %v6696_v23  ;;  %v7143_v44 = vsub.f32 %v3230_v17, %v6696_v23 }
 0x31b   : > { %v7146_v37 = vsub.f32 %v3231_v21, %v6696_v23  ;;  %v7149_v58 = vsub.f32 %v3232_v2, %v6696_v23  ;;  %v7152_v49 = vsub.f32 %v3233_v5, %v6696_v23  ;;  %v7155_v9 = vsub.f32 %v3234_v59, %v6696_v23 }
 0x31c   : > { %v7158_v43 = vsub.f32 %v3235_v32, %v6696_v23  ;;  %v7161_v24 = vsub.f32 %v3236_v56, %v6696_v23  ;;  %v7164_v60 = vsub.f32 %v3237_v46, %v6696_v23  ;;  %v7167_v38 = vsub.f32 %v3238_v30, %v6696_v23 }
 0x31d   : > { %v7170_v12 = vsub.f32 %v3239_v3, %v6696_v23  ;;  %v7173_v1 = vsub.f32 %v3240_v35, %v6696_v23  ;;  %v7176_v11 = vsub.f32 %v3241_v20, %v6696_v23  ;;  %v7179_v55 = vsub.f32 %v3242_v41, %v6696_v23 }
 0x31e   : > { %v7182_v62 = vsub.f32 %v3243_v26, %v6696_v23  ;;  %v7185_v47 = vsub.f32 %v3244_v42, %v6696_v23  ;;  %v7188_v17 = vsub.f32 %v3245_v15, %v6696_v23  ;;  %v7191_v21 = vsub.f32 %v3246_v8, %v6696_v23 }
 0x31f   : > { %v7194_v2 = vsub.f32 %v3247_v18, %v6696_v23  ;;  %v7197_v28 = vsub.f32 %v3248_v27, %v6696_v23  ;;  %v7200_v33 = vsub.f32 %v3249_v31, %v6696_v23  ;;  %v7203_v16 = vsub.f32 %v3250_v45, %v6696_v23 }
 0x320   : > { %v7206_v5 = vsub.f32 %v3251_v0, %v6696_v23  ;;  %v7209_v59 = vsub.f32 %v3252_v36, %v6696_v23  ;;  %v7212_v32 = vsub.f32 %v3253_v48, %v6696_v23  ;;  %v7215_v56 = vsub.f32 %v3254_v13, %v6696_v23 }
 0x321   : > { %v7218_v61 = vsub.f32 %v3255_v63, %v6696_v23  ;;  %vm3289_vm13 = vcmp.ge.f32.partialorder %v3257_v7, 0.0  ;;  %vm3290_vm0 = vcmp.ge.f32.partialorder %v7131_v52, 0.0  ;;  %vm3291_vm2 = vcmp.ge.f32.partialorder %v7134_v34, 0.0 }
 0x322   : > { %vm3292_vm5 = vcmp.ge.f32.partialorder %v7137_v10, 0.0  ;;  %vm3293_vm6 = vcmp.ge.f32.partialorder %v7140_v4, 0.0  ;;  %vm3294_vm12 = vcmp.ge.f32.partialorder %v7143_v44, 0.0  ;;  %vm3295_vm7 = vcmp.ge.f32.partialorder %v7146_v37, 0.0 }
 0x323   : > { %vm3296_vm8 = vcmp.ge.f32.partialorder %v7149_v58, 0.0  ;;  %v3321_v22 = vmul.f32 0.2, %v3257_v7  ;;  %v3322_v57 = vmul.f32 0.2, %v7131_v52  ;;  %v7234_v46 = vsub.f32 %v3256_v29, %v6696_v23 }
 0x324   : > { %vm3303_vm11 = vcmp.ge.f32.partialorder %v7170_v12, 0.0  ;;  %v3323_v30 = vmul.f32 0.2, %v7134_v34  ;;  %v3324_v3 = vmul.f32 0.2, %v7137_v10  ;;  %vm3308_vm15 = vcmp.ge.f32.partialorder %v7185_v47, 0.0 }
 0x325   : > { %v3325_v35 = vmul.f32 0.2, %v7140_v4  ;;  %vm3309_vm14 = vcmp.ge.f32.partialorder %v7188_v17, 0.0  ;;  %v3326_v51 = vmul.f32 0.2, %v7143_v44  ;;  %v3353_v20 = vsel %vm3289_vm13, %v3257_v7, %v3321_v22 }
 0x326   : > { %v3327_v40 = vmul.f32 0.2, %v7146_v37  ;;  %v3328_v19 = vmul.f32 0.2, %v7149_v58  ;;  %vm3310_vm9 = vcmp.ge.f32.partialorder %v7191_v21, 0.0  ;;  %v3354_v50 = vsel %vm3290_vm0, %v7131_v52, %v3322_v57  ;;  %4190 = vst.msk [vmem:[%s5588_s11 + $0x100] sm:$0xff] %vm656_vm1, %v3353_v20 }
 0x327   : > { %v3329_v41 = vmul.f32 0.2, %v7152_v49  ;;  %v3330_v26 = vmul.f32 0.2, %v7155_v9  ;;  %v3331_v42 = vmul.f32 0.2, %v7158_v43  ;;  %v3355_v8 = vsel %vm3291_vm2, %v7134_v34, %v3323_v30 }
 0x328   : > { %vm3314_vm13 = vcmp.ge.f32.partialorder %v7203_v16, 0.0  ;;  %vm3316_vm10 = vcmp.ge.f32.partialorder %v7209_v59, 0.0  ;;  %v3332_v6 = vmul.f32 0.2, %v7161_v24  ;;  %v3333_v54 = vmul.f32 0.2, %v7164_v60 }
 0x329   : > { %v3334_v15 = vmul.f32 0.2, %v7167_v38  ;;  %4191 = vst.msk [vmem:[%s5588_s11 + $0x108] sm:$0xff] %vm656_vm1, %v3354_v50  ;;  %vm3318_vm0 = vcmp.ge.f32.partialorder %v7215_v56, 0.0  ;;  %vm3319_vm4 = vcmp.ge.f32.partialorder %v7218_v61, 0.0  ;;  %vm3320_vm3 = vcmp.ge.f32.partialorder %v7234_v46, 0.0 }
 0x32a   : > { %v3335_v18 = vmul.f32 0.2, %v7170_v12  ;;  %v3336_v27 = vmul.f32 0.2, %v7173_v1  ;;  %v3337_v25 = vmul.f32 0.2, %v7176_v11  ;;  %v3356_v14 = vsel %vm3292_vm5, %v7137_v10, %v3324_v3 }
 0x32b   : > { %4192 = vst.msk [vmem:[%s5588_s11 + $0x110] sm:$0xff] %vm656_vm1, %v3355_v8  ;;  %v3338_v39 = vmul.f32 0.2, %v7179_v55  ;;  %v3339_v31 = vmul.f32 0.2, %v7182_v62  ;;  %v3357_v0 = vsel %vm3293_vm6, %v7140_v4, %v3325_v35  ;;  %4193 = vst.msk [vmem:[%s5588_s11 + $0x118] sm:$0xff] %vm656_vm1, %v3356_v14  ;;  %v3358_v63 = vsel %vm3294_vm12, %v7143_v44, %v3326_v51 }
 0x32c   : > { %v3340_v45 = vmul.f32 0.2, %v7185_v47  ;;  %v3341_v36 = vmul.f32 0.2, %v7188_v17  ;;  %v3342_v48 = vmul.f32 0.2, %v7191_v21  ;;  %v3359_v34 = vsel %vm3295_vm7, %v7146_v37, %v3327_v40 }
 0x32d   : > { %v3343_v13 = vmul.f32 0.2, %v7194_v2  ;;  %4194 = vst.msk [vmem:[%s5588_s11 + $0x120] sm:$0xff] %vm656_vm1, %v3357_v0  ;;  %v3344_v29 = vmul.f32 0.2, %v7197_v28  ;;  %4195 = vst.msk [vmem:[%s5588_s11 + $0x128] sm:$0xff] %vm656_vm1, %v3358_v63  ;;  %v3360_v22 = vsel %vm3296_vm8, %v7149_v58, %v3328_v19 }
 0x32e   : > { %v3345_v7 = vmul.f32 0.2, %v7200_v33  ;;  %v3346_v52 = vmul.f32 0.2, %v7203_v16  ;;  %v3347_v10 = vmul.f32 0.2, %v7206_v5 }
 0x32f   : > { %v3348_v4 = vmul.f32 0.2, %v7209_v59  ;;  %v3349_v44 = vmul.f32 0.2, %v7212_v32  ;;  %4196 = vst.msk [vmem:[%s5588_s11 + $0x130] sm:$0xff] %vm656_vm1, %v3359_v34  ;;  %vm8280_vm2 = vcmp.ge.f32.partialorder %v7152_v49, 0.0 }
 0x330   : > { %v3350_v57 = vmul.f32 0.2, %v7215_v56  ;;  %v3351_v37 = vmul.f32 0.2, %v7218_v61  ;;  %v3352_v30 = vmul.f32 0.2, %v7234_v46  ;;  %v3361_v3 = vsel %vm8280_vm2, %v7152_v49, %v3329_v41 }
 0x331   : > { %4197 = vst.msk [vmem:[%s5588_s11 + $0x138] sm:$0xff] %vm656_vm1, %v3360_v22  ;;  %vm8281_vm5 = vcmp.ge.f32.partialorder %v7155_v9, 0.0  ;;  %vm8282_vm6 = vcmp.ge.f32.partialorder %v7158_v43, 0.0  ;;  %vm8283_vm12 = vcmp.ge.f32.partialorder %v7161_v24, 0.0  ;;  %vm8284_vm7 = vcmp.ge.f32.partialorder %v7164_v60, 0.0  ;;  %4198 = vst.msk [vmem:[%s5588_s11 + $0x140] sm:$0xff] %vm656_vm1, %v3361_v3 }
 0x332   : > { %v3362_v58 = vsel %vm8281_vm5, %v7155_v9, %v3330_v26  ;;  %v3363_v35 = vsel %vm8282_vm6, %v7158_v43, %v3331_v42  ;;  %v3364_v51 = vsel %vm8283_vm12, %v7161_v24, %v3332_v6  ;;  %v3365_v49 = vsel %vm8284_vm7, %v7164_v60, %v3333_v54  ;;  %v4227_v40 = vld [vmem:[%s5588_s11 + $0x228] sm:$0xff]  ;;  %v4226_v19 = vld [vmem:[%s5588_s11 + $0x220] sm:$0xff]  ;;  %v4229_v20 = vld [vmem:[%s5588_s11 + $0x238] sm:$0xff] }
 0x333   : > { %vm8285_vm8 = vcmp.ge.f32.partialorder %v7167_v38, 0.0  ;;  %v3367_v43 = vsel %vm3303_vm11, %v7170_v12, %v3335_v18  ;;  %vm8286_vm2 = vcmp.ge.f32.partialorder %v7173_v1, 0.0  ;;  %vm8287_vm5 = vcmp.ge.f32.partialorder %v7176_v11, 0.0  ;;  %4199 = vst.msk [vmem:[%s5588_s11 + $0x148] sm:$0xff] %vm656_vm1, %v3362_v58  ;;  %4200 = vst.msk [vmem:[%s5588_s11 + $0x150] sm:$0xff] %vm656_vm1, %v3363_v35  ;;  %v4228_v41 = vld [vmem:[%s5588_s11 + $0x230] sm:$0xff] }
 0x334   : > { %v3366_v9 = vsel %vm8285_vm8, %v7167_v38, %v3334_v15  ;;  %v3368_v24 = vsel %vm8286_vm2, %v7173_v1, %v3336_v27  ;;  %v3369_v60 = vsel %vm8287_vm5, %v7176_v11, %v3337_v25  ;;  %4201 = vst.msk [vmem:[%s5588_s11 + $0x158] sm:$0xff] %vm656_vm1, %v3364_v51  ;;  %4202 = vst.msk [vmem:[%s5588_s11 + $0x160] sm:$0xff] %vm656_vm1, %v3365_v49  ;;  %vm8288_vm11 = vcmp.ge.f32.partialorder %v7179_v55, 0.0  ;;  %v4231_v26 = vld [vmem:[%s5588_s11 + $0x248] sm:$0xff]  ;;  %v4230_v42 = vld [vmem:[%s5588_s11 + $0x240] sm:$0xff] }
 0x335   : > { %v3370_v38 = vsel %vm8288_vm11, %v7179_v55, %v3338_v39  ;;  %vm8289_vm6 = vcmp.ge.f32.partialorder %v7182_v62, 0.0  ;;  %v3372_v1 = vsel %vm3308_vm15, %v7185_v47, %v3340_v45  ;;  %v3373_v11 = vsel %vm3309_vm14, %v7188_v17, %v3341_v36  ;;  %4203 = vst.msk [vmem:[%s5588_s11 + $0x168] sm:$0xff] %vm656_vm1, %v3366_v9  ;;  %4204 = vst.msk [vmem:[%s5588_s11 + $0x170] sm:$0xff] %vm656_vm1, %v3367_v43  ;;  %v4233_v50 = vld [vmem:[%s5588_s11 + $0x258] sm:$0xff]  ;;  %v4232_v6 = vld [vmem:[%s5588_s11 + $0x250] sm:$0xff] }
 0x336   : > { %v3371_v12 = vsel %vm8289_vm6, %v7182_v62, %v3339_v31  ;;  %4205 = vst.msk [vmem:[%s5588_s11 + $0x178] sm:$0xff] %vm656_vm1, %v3368_v24  ;;  %4206 = vst.msk [vmem:[%s5588_s11 + $0x180] sm:$0xff] %vm656_vm1, %v3369_v60  ;;  %v3374_v55 = vsel %vm3310_vm9, %v7191_v21, %v3342_v48  ;;  %vm8290_vm15 = vcmp.ge.f32.partialorder %v7194_v2, 0.0  ;;  %vm8291_vm14 = vcmp.ge.f32.partialorder %v7197_v28, 0.0  ;;  %v4235_v54 = vld [vmem:[%s5588_s11 + $0x268] sm:$0xff]  ;;  %v4234_v15 = vld [vmem:[%s5588_s11 + $0x260] sm:$0xff] }
 0x337   : > { %v3375_v62 = vsel %vm8290_vm15, %v7194_v2, %v3343_v13  ;;  %v3376_v47 = vsel %vm8291_vm14, %v7197_v28, %v3344_v29  ;;  %vm8292_vm12 = vcmp.ge.f32.partialorder %v7200_v33, 0.0  ;;  %4207 = vst.msk [vmem:[%s5588_s11 + $0x188] sm:$0xff] %vm656_vm1, %v3370_v38  ;;  %4208 = vst.msk [vmem:[%s5588_s11 + $0x190] sm:$0xff] %vm656_vm1, %v3371_v12  ;;  %v3378_v21 = vsel %vm3314_vm13, %v7203_v16, %v3346_v52  ;;  %v4237_v14 = vld [vmem:[%s5588_s11 + $0x278] sm:$0xff]  ;;  %v4236_v39 = vld [vmem:[%s5588_s11 + $0x270] sm:$0xff] }
 0x338   : > { %v3377_v17 = vsel %vm8292_vm12, %v7200_v33, %v3345_v7  ;;  %4209 = vst.msk [vmem:[%s5588_s11 + $0x198] sm:$0xff] %vm656_vm1, %v3372_v1  ;;  %4210 = vst.msk [vmem:[%s5588_s11 + $0x1a0] sm:$0xff] %vm656_vm1, %v3373_v11  ;;  %vm8293_vm9 = vcmp.ge.f32.partialorder %v7206_v5, 0.0  ;;  %v3380_v28 = vsel %vm3316_vm10, %v7209_v59, %v3348_v4  ;;  %vm8294_vm7 = vcmp.ge.f32.partialorder %v7212_v32, 0.0  ;;  %v4239_v31 = vld [vmem:[%s5588_s11 + $0x288] sm:$0xff]  ;;  %v4238_v13 = vld [vmem:[%s5588_s11 + $0x280] sm:$0xff] }
 0x339   : > { %v3379_v2 = vsel %vm8293_vm9, %v7206_v5, %v3347_v10  ;;  %v3381_v33 = vsel %vm8294_vm7, %v7212_v32, %v3349_v44  ;;  %4211 = vst.msk [vmem:[%s5588_s11 + $0x1a8] sm:$0xff] %vm656_vm1, %v3374_v55  ;;  %4212 = vst.msk [vmem:[%s5588_s11 + $0x1b0] sm:$0xff] %vm656_vm1, %v3375_v62  ;;  %v3382_v16 = vsel %vm3318_vm0, %v7215_v56, %v3350_v57  ;;  %v4223_v32 = vld [vmem:[%s5588_s11 + $0x208] sm:$0xff]  ;;  %v4222_v56 = vld [vmem:[%s5588_s11 + $0x200] sm:$0xff] }
 0x33a   : > { %4213 = vst.msk [vmem:[%s5588_s11 + $0x1b8] sm:$0xff] %vm656_vm1, %v3376_v47  ;;  %4214 = vst.msk [vmem:[%s5588_s11 + $0x1c0] sm:$0xff] %vm656_vm1, %v3377_v17  ;;  %v3383_v5 = vsel %vm3319_vm4, %v7218_v61, %v3351_v37  ;;  %v3384_v59 = vsel %vm3320_vm3, %v7234_v46, %v3352_v30  ;;  %v4225_v61 = vld [vmem:[%s5588_s11 + $0x218] sm:$0xff]  ;;  %v4224_v46 = vld [vmem:[%s5588_s11 + $0x210] sm:$0xff]  ;;  %v3449_v8 = vmul.f32 %v6682_v53, %v4222_v56 }
 0x33b   : > { %4215 = vst.msk [vmem:[%s5588_s11 + $0x1c8] sm:$0xff] %vm656_vm1, %v3378_v21  ;;  %4216 = vst.msk [vmem:[%s5588_s11 + $0x1d0] sm:$0xff] %vm656_vm1, %v3379_v2  ;;  %v3450_v18 = vmul.f32 %v6682_v53, %v4223_v32  ;;  %v3451_v27 = vmul.f32 %v6682_v53, %v4224_v46  ;;  %v3452_v25 = vmul.f32 %v6682_v53, %v4225_v61  ;;  %v4241_v63 = vld [vmem:[%s5588_s11 + $0x298] sm:$0xff]  ;;  %v4240_v29 = vld [vmem:[%s5588_s11 + $0x290] sm:$0xff] }
 0x33c   : > { %4217 = vst.msk [vmem:[%s5588_s11 + $0x1d8] sm:$0xff] %vm656_vm1, %v3380_v28  ;;  %4218 = vst.msk [vmem:[%s5588_s11 + $0x1e0] sm:$0xff] %vm656_vm1, %v3381_v33  ;;  %v3453_v45 = vmul.f32 %v6682_v53, %v4226_v19  ;;  %v3454_v0 = vmul.f32 %v6682_v53, %v4227_v40  ;;  %v3455_v36 = vmul.f32 %v6682_v53, %v4228_v41  ;;  %v4243_v4 = vld [vmem:[%s5588_s11 + $0x2a8] sm:$0xff]  ;;  %v4242_v44 = vld [vmem:[%s5588_s11 + $0x2a0] sm:$0xff] }
 0x33d   : > { %4219 = vst.msk [vmem:[%s5588_s11 + $0x1e8] sm:$0xff] %vm656_vm1, %v3382_v16  ;;  %4220 = vst.msk [vmem:[%s5588_s11 + $0x1f0] sm:$0xff] %vm656_vm1, %v3383_v5  ;;  %v3456_v48 = vmul.f32 %v6682_v53, %v4229_v20  ;;  %v3457_v7 = vmul.f32 %v6682_v53, %v4230_v42  ;;  %v3458_v52 = vmul.f32 %v6682_v53, %v4231_v26  ;;  %v4245_v22 = vld [vmem:[%s5588_s11 + $0x2b8] sm:$0xff]  ;;  %v4244_v58 = vld [vmem:[%s5588_s11 + $0x2b0] sm:$0xff] }
 0x33e   : > { %4221 = vst.msk [vmem:[%s5588_s11 + $0x1f8] sm:$0xff] %vm656_vm1, %v3384_v59  ;;  %v3459_v34 = vmul.f32 %v6682_v53, %v4232_v6  ;;  %v3460_v10 = vmul.f32 %v6682_v53, %v4233_v50  ;;  %v3461_v57 = vmul.f32 %v6682_v53, %v4234_v15  ;;  %v3462_v37 = vmul.f32 %v6682_v53, %v4235_v54  ;;  %v4247_v35 = vld [vmem:[%s5588_s11 + $0x2c8] sm:$0xff]  ;;  %v4246_v51 = vld [vmem:[%s5588_s11 + $0x2c0] sm:$0xff]  ;;  %v4249_v60 = vld [vmem:[%s5588_s11 + $0x2d8] sm:$0xff] }
 0x33f   : > { %v3463_v30 = vmul.f32 %v6682_v53, %v4236_v39  ;;  %v3464_v3 = vmul.f32 %v6682_v53, %v4237_v14  ;;  %v3465_v49 = vmul.f32 %v6682_v53, %v4238_v13  ;;  %v3466_v9 = vmul.f32 %v6682_v53, %v4239_v31  ;;  %v4248_v38 = vld [vmem:[%s5588_s11 + $0x2d0] sm:$0xff]  ;;  %v4251_v12 = vld [vmem:[%s5588_s11 + $0x2e8] sm:$0xff]  ;;  %v4250_v47 = vld [vmem:[%s5588_s11 + $0x2e0] sm:$0xff] }
 0x340   : > { %v3467_v43 = vmul.f32 %v6682_v53, %v4240_v29  ;;  %v3468_v24 = vmul.f32 %v6682_v53, %v4241_v63  ;;  %v3469_v1 = vmul.f32 %v6682_v53, %v4242_v44  ;;  %v3470_v11 = vmul.f32 %v6682_v53, %v4243_v4  ;;  %v4253_v17 = vld [vmem:[%s5588_s11 + $0x2f8] sm:$0xff]  ;;  %v4252_v21 = vld [vmem:[%s5588_s11 + $0x2f0] sm:$0xff] }
 0x341   : > { %v3471_v55 = vmul.f32 %v6682_v53, %v4244_v58  ;;  %v3472_v62 = vmul.f32 %v6682_v53, %v4245_v22  ;;  %v3473_v2 = vmul.f32 %v6682_v53, %v4246_v51  ;;  %v3474_v28 = vmul.f32 %v6682_v53, %v4247_v35 }
 0x342   : > { %v3475_v33 = vmul.f32 %v6682_v53, %v4248_v38  ;;  %v3476_v16 = vmul.f32 %v6682_v53, %v4249_v60  ;;  %v3477_v5 = vmul.f32 %v6682_v53, %v4250_v47  ;;  %v3478_v59 = vmul.f32 %v6682_v53, %v4251_v12 }
 0x343   : > { %v3479_v32 = vmul.f32 %v6682_v53, %v4252_v21  ;;  %v3480_v56 = vmul.f32 %v6682_v53, %v4253_v17  ;;  %v3481_v61 = vsub.f32 %v3449_v8, %v6696_v23  ;;  %v7509_v46 = vsub.f32 %v3450_v18, %v6696_v23 }
 0x344   : > { %v7512_v40 = vsub.f32 %v3451_v27, %v6696_v23  ;;  %v7515_v19 = vsub.f32 %v3452_v25, %v6696_v23  ;;  %v7518_v20 = vsub.f32 %v3453_v45, %v6696_v23  ;;  %v7521_v41 = vsub.f32 %v3454_v0, %v6696_v23 }
 0x345   : > { %v7524_v26 = vsub.f32 %v3455_v36, %v6696_v23  ;;  %v7527_v42 = vsub.f32 %v3456_v48, %v6696_v23  ;;  %v7530_v50 = vsub.f32 %v3457_v7, %v6696_v23  ;;  %v7533_v6 = vsub.f32 %v3458_v52, %v6696_v23 }
 0x346   : > { %v7536_v54 = vsub.f32 %v3459_v34, %v6696_v23  ;;  %v7539_v15 = vsub.f32 %v3460_v10, %v6696_v23  ;;  %v7542_v8 = vsub.f32 %v3461_v57, %v6696_v23  ;;  %v7545_v18 = vsub.f32 %v3462_v37, %v6696_v23 }
 0x347   : > { %v7548_v27 = vsub.f32 %v3463_v30, %v6696_v23  ;;  %v7551_v25 = vsub.f32 %v3464_v3, %v6696_v23  ;;  %v7554_v14 = vsub.f32 %v3465_v49, %v6696_v23  ;;  %v7557_v39 = vsub.f32 %v3466_v9, %v6696_v23 }
 0x348   : > { %v7560_v31 = vsub.f32 %v3467_v43, %v6696_v23  ;;  %v7563_v45 = vsub.f32 %v3468_v24, %v6696_v23  ;;  %v7566_v0 = vsub.f32 %v3469_v1, %v6696_v23  ;;  %v7569_v36 = vsub.f32 %v3470_v11, %v6696_v23 }
 0x349   : > { %v7572_v48 = vsub.f32 %v3471_v55, %v6696_v23  ;;  %v7575_v13 = vsub.f32 %v3472_v62, %v6696_v23  ;;  %v7578_v63 = vsub.f32 %v3473_v2, %v6696_v23  ;;  %v7581_v29 = vsub.f32 %v3474_v28, %v6696_v23 }
 0x34a   : > { %v7584_v7 = vsub.f32 %v3475_v33, %v6696_v23  ;;  %v7587_v52 = vsub.f32 %v3476_v16, %v6696_v23  ;;  %v7590_v34 = vsub.f32 %v3477_v5, %v6696_v23  ;;  %v7593_v10 = vsub.f32 %v3478_v59, %v6696_v23 }
 0x34b   : > { %v7596_v4 = vsub.f32 %v3479_v32, %v6696_v23  ;;  %vm3513_vm4 = vcmp.ge.f32.partialorder %v3481_v61, 0.0  ;;  %vm3514_vm3 = vcmp.ge.f32.partialorder %v7509_v46, 0.0  ;;  %vm3515_vm10 = vcmp.ge.f32.partialorder %v7512_v40, 0.0 }
 0x34c   : > { %vm3516_vm13 = vcmp.ge.f32.partialorder %v7515_v19, 0.0  ;;  %vm3517_vm0 = vcmp.ge.f32.partialorder %v7518_v20, 0.0  ;;  %vm3518_vm8 = vcmp.ge.f32.partialorder %v7521_v41, 0.0  ;;  %vm3519_vm2 = vcmp.ge.f32.partialorder %v7524_v26, 0.0 }
 0x34d   : > { %vm3520_vm5 = vcmp.ge.f32.partialorder %v7527_v42, 0.0  ;;  %v3545_v44 = vmul.f32 0.2, %v3481_v61  ;;  %v3546_v22 = vmul.f32 0.2, %v7509_v46  ;;  %v7612_v57 = vsub.f32 %v3480_v56, %v6696_v23 }
 0x34e   : > { %vm3527_vm7 = vcmp.ge.f32.partialorder %v7548_v27, 0.0  ;;  %v3547_v37 = vmul.f32 0.2, %v7512_v40  ;;  %v3548_v30 = vmul.f32 0.2, %v7515_v19  ;;  %vm3532_vm15 = vcmp.ge.f32.partialorder %v7563_v45, 0.0 }
 0x34f   : > { %v3549_v3 = vmul.f32 0.2, %v7518_v20  ;;  %vm3533_vm9 = vcmp.ge.f32.partialorder %v7566_v0, 0.0  ;;  %v3550_v58 = vmul.f32 0.2, %v7521_v41  ;;  %v3577_v49 = vsel %vm3513_vm4, %v3481_v61, %v3545_v44 }
 0x350   : > { %v3551_v35 = vmul.f32 0.2, %v7524_v26  ;;  %v3552_v51 = vmul.f32 0.2, %v7527_v42  ;;  %vm3534_vm6 = vcmp.ge.f32.partialorder %v7569_v36, 0.0  ;;  %v3578_v60 = vsel %vm3514_vm3, %v7509_v46, %v3546_v22  ;;  %4254 = vst.msk [vmem:[%s5588_s11 + $0x200] sm:$0xff] %vm656_vm1, %v3577_v49 }
 0x351   : > { %v3553_v9 = vmul.f32 0.2, %v7530_v50  ;;  %v3554_v43 = vmul.f32 0.2, %v7533_v6  ;;  %v3555_v24 = vmul.f32 0.2, %v7536_v54  ;;  %v3579_v11 = vsel %vm3515_vm10, %v7512_v40, %v3547_v37 }
 0x352   : > { %vm3538_vm4 = vcmp.ge.f32.partialorder %v7581_v29, 0.0  ;;  %vm3540_vm12 = vcmp.ge.f32.partialorder %v7587_v52, 0.0  ;;  %v3556_v38 = vmul.f32 0.2, %v7539_v15  ;;  %v3557_v12 = vmul.f32 0.2, %v7542_v8 }
 0x353   : > { %v3558_v1 = vmul.f32 0.2, %v7545_v18  ;;  %4255 = vst.msk [vmem:[%s5588_s11 + $0x208] sm:$0xff] %vm656_vm1, %v3578_v60  ;;  %vm3542_vm3 = vcmp.ge.f32.partialorder %v7593_v10, 0.0  ;;  %vm3543_vm11 = vcmp.ge.f32.partialorder %v7596_v4, 0.0  ;;  %vm3544_vm14 = vcmp.ge.f32.partialorder %v7612_v57, 0.0 }
 0x354   : > { %v3559_v55 = vmul.f32 0.2, %v7548_v27  ;;  %v3560_v62 = vmul.f32 0.2, %v7551_v25  ;;  %v3561_v47 = vmul.f32 0.2, %v7554_v14  ;;  %v3580_v17 = vsel %vm3516_vm13, %v7515_v19, %v3548_v30 }
 0x355   : > { %4256 = vst.msk [vmem:[%s5588_s11 + $0x210] sm:$0xff] %vm656_vm1, %v3579_v11  ;;  %v3562_v21 = vmul.f32 0.2, %v7557_v39  ;;  %v3563_v2 = vmul.f32 0.2, %v7560_v31  ;;  %v3581_v33 = vsel %vm3517_vm0, %v7518_v20, %v3549_v3  ;;  %4257 = vst.msk [vmem:[%s5588_s11 + $0x218] sm:$0xff] %vm656_vm1, %v3580_v17  ;;  %v3582_v32 = vsel %vm3518_vm8, %v7521_v41, %v3550_v58 }
 0x356   : > { %v3564_v28 = vmul.f32 0.2, %v7563_v45  ;;  %v3565_v16 = vmul.f32 0.2, %v7566_v0  ;;  %v3566_v5 = vmul.f32 0.2, %v7569_v36  ;;  %v3583_v40 = vsel %vm3519_vm2, %v7524_v26, %v3551_v35 }
 0x357   : > { %v3567_v59 = vmul.f32 0.2, %v7572_v48  ;;  %4258 = vst.msk [vmem:[%s5588_s11 + $0x220] sm:$0xff] %vm656_vm1, %v3581_v33  ;;  %v3568_v56 = vmul.f32 0.2, %v7575_v13  ;;  %4259 = vst.msk [vmem:[%s5588_s11 + $0x228] sm:$0xff] %vm656_vm1, %v3582_v32  ;;  %v3584_v44 = vsel %vm3520_vm5, %v7527_v42, %v3552_v51 }
 0x358   : > { %v3569_v61 = vmul.f32 0.2, %v7578_v63  ;;  %v3570_v46 = vmul.f32 0.2, %v7581_v29  ;;  %v3571_v19 = vmul.f32 0.2, %v7584_v7 }
 0x359   : > { %v3572_v20 = vmul.f32 0.2, %v7587_v52  ;;  %v3573_v41 = vmul.f32 0.2, %v7590_v34  ;;  %4260 = vst.msk [vmem:[%s5588_s11 + $0x230] sm:$0xff] %vm656_vm1, %v3583_v40  ;;  %vm8295_vm10 = vcmp.ge.f32.partialorder %v7530_v50, 0.0 }
 0x35a   : > { %v3574_v22 = vmul.f32 0.2, %v7593_v10  ;;  %v3575_v26 = vmul.f32 0.2, %v7596_v4  ;;  %v3576_v37 = vmul.f32 0.2, %v7612_v57  ;;  %v3585_v30 = vsel %vm8295_vm10, %v7530_v50, %v3553_v9 }
 0x35b   : > { %4261 = vst.msk [vmem:[%s5588_s11 + $0x238] sm:$0xff] %vm656_vm1, %v3584_v44  ;;  %vm8296_vm13 = vcmp.ge.f32.partialorder %v7533_v6, 0.0  ;;  %vm8297_vm0 = vcmp.ge.f32.partialorder %v7536_v54, 0.0  ;;  %vm8298_vm8 = vcmp.ge.f32.partialorder %v7539_v15, 0.0  ;;  %vm8299_vm2 = vcmp.ge.f32.partialorder %v7542_v8, 0.0  ;;  %4262 = vst.msk [vmem:[%s5588_s11 + $0x240] sm:$0xff] %vm656_vm1, %v3585_v30 }
 0x35c   : > { %v3586_v42 = vsel %vm8296_vm13, %v7533_v6, %v3554_v43  ;;  %v3587_v3 = vsel %vm8297_vm0, %v7536_v54, %v3555_v24  ;;  %v3588_v58 = vsel %vm8298_vm8, %v7539_v15, %v3556_v38  ;;  %v3589_v50 = vsel %vm8299_vm2, %v7542_v8, %v3557_v12  ;;  %v4291_v35 = vld [vmem:[%s5588_s11 + $0x328] sm:$0xff]  ;;  %v4290_v51 = vld [vmem:[%s5588_s11 + $0x320] sm:$0xff]  ;;  %v4293_v49 = vld [vmem:[%s5588_s11 + $0x338] sm:$0xff] }
 0x35d   : > { %vm8300_vm5 = vcmp.ge.f32.partialorder %v7545_v18, 0.0  ;;  %v3591_v54 = vsel %vm3527_vm7, %v7548_v27, %v3559_v55  ;;  %vm8301_vm10 = vcmp.ge.f32.partialorder %v7551_v25, 0.0  ;;  %vm8302_vm13 = vcmp.ge.f32.partialorder %v7554_v14, 0.0  ;;  %4263 = vst.msk [vmem:[%s5588_s11 + $0x248] sm:$0xff] %vm656_vm1, %v3586_v42  ;;  %4264 = vst.msk [vmem:[%s5588_s11 + $0x250] sm:$0xff] %vm656_vm1, %v3587_v3  ;;  %v4292_v9 = vld [vmem:[%s5588_s11 + $0x330] sm:$0xff] }
 0x35e   : > { %v3590_v6 = vsel %vm8300_vm5, %v7545_v18, %v3558_v1  ;;  %v3592_v15 = vsel %vm8301_vm10, %v7551_v25, %v3560_v62  ;;  %v3593_v8 = vsel %vm8302_vm13, %v7554_v14, %v3561_v47  ;;  %4265 = vst.msk [vmem:[%s5588_s11 + $0x258] sm:$0xff] %vm656_vm1, %v3588_v58  ;;  %4266 = vst.msk [vmem:[%s5588_s11 + $0x260] sm:$0xff] %vm656_vm1, %v3589_v50  ;;  %vm8303_vm7 = vcmp.ge.f32.partialorder %v7557_v39, 0.0  ;;  %v4295_v43 = vld [vmem:[%s5588_s11 + $0x348] sm:$0xff]  ;;  %v4294_v24 = vld [vmem:[%s5588_s11 + $0x340] sm:$0xff] }
 0x35f   : > { %v3594_v18 = vsel %vm8303_vm7, %v7557_v39, %v3562_v21  ;;  %vm8304_vm0 = vcmp.ge.f32.partialorder %v7560_v31, 0.0  ;;  %v3596_v25 = vsel %vm3532_vm15, %v7563_v45, %v3564_v28  ;;  %v3597_v14 = vsel %vm3533_vm9, %v7566_v0, %v3565_v16  ;;  %4267 = vst.msk [vmem:[%s5588_s11 + $0x268] sm:$0xff] %vm656_vm1, %v3590_v6  ;;  %4268 = vst.msk [vmem:[%s5588_s11 + $0x270] sm:$0xff] %vm656_vm1, %v3591_v54  ;;  %v4297_v60 = vld [vmem:[%s5588_s11 + $0x358] sm:$0xff]  ;;  %v4296_v38 = vld [vmem:[%s5588_s11 + $0x350] sm:$0xff] }
 0x360   : > { %v3595_v27 = vsel %vm8304_vm0, %v7560_v31, %v3563_v2  ;;  %4269 = vst.msk [vmem:[%s5588_s11 + $0x278] sm:$0xff] %vm656_vm1, %v3592_v15  ;;  %4270 = vst.msk [vmem:[%s5588_s11 + $0x280] sm:$0xff] %vm656_vm1, %v3593_v8  ;;  %v3598_v39 = vsel %vm3534_vm6, %v7569_v36, %v3566_v5  ;;  %vm8305_vm15 = vcmp.ge.f32.partialorder %v7572_v48, 0.0  ;;  %vm8306_vm9 = vcmp.ge.f32.partialorder %v7575_v13, 0.0  ;;  %v4299_v12 = vld [vmem:[%s5588_s11 + $0x368] sm:$0xff]  ;;  %v4298_v1 = vld [vmem:[%s5588_s11 + $0x360] sm:$0xff] }
 0x361   : > { %v3599_v31 = vsel %vm8305_vm15, %v7572_v48, %v3567_v59  ;;  %v3600_v45 = vsel %vm8306_vm9, %v7575_v13, %v3568_v56  ;;  %vm8307_vm8 = vcmp.ge.f32.partialorder %v7578_v63, 0.0  ;;  %4271 = vst.msk [vmem:[%s5588_s11 + $0x288] sm:$0xff] %vm656_vm1, %v3594_v18  ;;  %4272 = vst.msk [vmem:[%s5588_s11 + $0x290] sm:$0xff] %vm656_vm1, %v3595_v27  ;;  %v3602_v36 = vsel %vm3538_vm4, %v7581_v29, %v3570_v46  ;;  %v4301_v17 = vld [vmem:[%s5588_s11 + $0x378] sm:$0xff]  ;;  %v4300_v21 = vld [vmem:[%s5588_s11 + $0x370] sm:$0xff] }
 0x362   : > { %v3601_v0 = vsel %vm8307_vm8, %v7578_v63, %v3569_v61  ;;  %4273 = vst.msk [vmem:[%s5588_s11 + $0x298] sm:$0xff] %vm656_vm1, %v3596_v25  ;;  %4274 = vst.msk [vmem:[%s5588_s11 + $0x2a0] sm:$0xff] %vm656_vm1, %v3597_v14  ;;  %vm8308_vm6 = vcmp.ge.f32.partialorder %v7584_v7, 0.0  ;;  %v3604_v13 = vsel %vm3540_vm12, %v7587_v52, %v3572_v20  ;;  %vm8309_vm2 = vcmp.ge.f32.partialorder %v7590_v34, 0.0  ;;  %v4303_v2 = vld [vmem:[%s5588_s11 + $0x388] sm:$0xff]  ;;  %v4302_v59 = vld [vmem:[%s5588_s11 + $0x380] sm:$0xff] }
 0x363   : > { %v3603_v48 = vsel %vm8308_vm6, %v7584_v7, %v3571_v19  ;;  %v3605_v63 = vsel %vm8309_vm2, %v7590_v34, %v3573_v41  ;;  %4275 = vst.msk [vmem:[%s5588_s11 + $0x2a8] sm:$0xff] %vm656_vm1, %v3598_v39  ;;  %4276 = vst.msk [vmem:[%s5588_s11 + $0x2b0] sm:$0xff] %vm656_vm1, %v3599_v31  ;;  %v3606_v29 = vsel %vm3542_vm3, %v7593_v10, %v3574_v22  ;;  %v4287_v34 = vld [vmem:[%s5588_s11 + $0x308] sm:$0xff]  ;;  %v4286_v10 = vld [vmem:[%s5588_s11 + $0x300] sm:$0xff] }
 0x364   : > { %4277 = vst.msk [vmem:[%s5588_s11 + $0x2b8] sm:$0xff] %vm656_vm1, %v3600_v45  ;;  %4278 = vst.msk [vmem:[%s5588_s11 + $0x2c0] sm:$0xff] %vm656_vm1, %v3601_v0  ;;  %v3607_v7 = vsel %vm3543_vm11, %v7596_v4, %v3575_v26  ;;  %v3608_v52 = vsel %vm3544_vm14, %v7612_v57, %v3576_v37  ;;  %v4289_v4 = vld [vmem:[%s5588_s11 + $0x318] sm:$0xff]  ;;  %v4288_v57 = vld [vmem:[%s5588_s11 + $0x310] sm:$0xff]  ;;  %v3673_v11 = vmul.f32 %v6682_v53, %v4286_v10 }
 0x365   : > { %4279 = vst.msk [vmem:[%s5588_s11 + $0x2c8] sm:$0xff] %vm656_vm1, %v3602_v36  ;;  %4280 = vst.msk [vmem:[%s5588_s11 + $0x2d0] sm:$0xff] %vm656_vm1, %v3603_v48  ;;  %v3674_v55 = vmul.f32 %v6682_v53, %v4287_v34  ;;  %v3675_v62 = vmul.f32 %v6682_v53, %v4288_v57  ;;  %v3676_v47 = vmul.f32 %v6682_v53, %v4289_v4  ;;  %v4305_v32 = vld [vmem:[%s5588_s11 + $0x398] sm:$0xff]  ;;  %v4304_v56 = vld [vmem:[%s5588_s11 + $0x390] sm:$0xff] }
 0x366   : > { %4281 = vst.msk [vmem:[%s5588_s11 + $0x2d8] sm:$0xff] %vm656_vm1, %v3604_v13  ;;  %4282 = vst.msk [vmem:[%s5588_s11 + $0x2e0] sm:$0xff] %vm656_vm1, %v3605_v63  ;;  %v3677_v28 = vmul.f32 %v6682_v53, %v4290_v51  ;;  %v3678_v33 = vmul.f32 %v6682_v53, %v4291_v35  ;;  %v3679_v16 = vmul.f32 %v6682_v53, %v4292_v9  ;;  %v4307_v20 = vld [vmem:[%s5588_s11 + $0x3a8] sm:$0xff]  ;;  %v4306_v41 = vld [vmem:[%s5588_s11 + $0x3a0] sm:$0xff] }
 0x367   : > { %4283 = vst.msk [vmem:[%s5588_s11 + $0x2e8] sm:$0xff] %vm656_vm1, %v3606_v29  ;;  %4284 = vst.msk [vmem:[%s5588_s11 + $0x2f0] sm:$0xff] %vm656_vm1, %v3607_v7  ;;  %v3680_v5 = vmul.f32 %v6682_v53, %v4293_v49  ;;  %v3681_v61 = vmul.f32 %v6682_v53, %v4294_v24  ;;  %v3682_v46 = vmul.f32 %v6682_v53, %v4295_v43  ;;  %v4309_v44 = vld [vmem:[%s5588_s11 + $0x3b8] sm:$0xff]  ;;  %v4308_v42 = vld [vmem:[%s5588_s11 + $0x3b0] sm:$0xff] }
 0x368   : > { %4285 = vst.msk [vmem:[%s5588_s11 + $0x2f8] sm:$0xff] %vm656_vm1, %v3608_v52  ;;  %v3683_v40 = vmul.f32 %v6682_v53, %v4296_v38  ;;  %v3684_v19 = vmul.f32 %v6682_v53, %v4297_v60  ;;  %v3685_v22 = vmul.f32 %v6682_v53, %v4298_v1  ;;  %v3686_v26 = vmul.f32 %v6682_v53, %v4299_v12  ;;  %v4311_v3 = vld [vmem:[%s5588_s11 + $0x3c8] sm:$0xff]  ;;  %v4310_v58 = vld [vmem:[%s5588_s11 + $0x3c0] sm:$0xff]  ;;  %v4313_v8 = vld [vmem:[%s5588_s11 + $0x3d8] sm:$0xff] }
 0x369   : > { %v3687_v37 = vmul.f32 %v6682_v53, %v4300_v21  ;;  %v3688_v30 = vmul.f32 %v6682_v53, %v4301_v17  ;;  %v3689_v50 = vmul.f32 %v6682_v53, %v4302_v59  ;;  %v3690_v6 = vmul.f32 %v6682_v53, %v4303_v2  ;;  %v4312_v18 = vld [vmem:[%s5588_s11 + $0x3d0] sm:$0xff]  ;;  %v4315_v27 = vld [vmem:[%s5588_s11 + $0x3e8] sm:$0xff]  ;;  %v4314_v45 = vld [vmem:[%s5588_s11 + $0x3e0] sm:$0xff] }
 0x36a   : > { %v3691_v54 = vmul.f32 %v6682_v53, %v4304_v56  ;;  %v3692_v15 = vmul.f32 %v6682_v53, %v4305_v32  ;;  %v3693_v25 = vmul.f32 %v6682_v53, %v4306_v41  ;;  %v3694_v14 = vmul.f32 %v6682_v53, %v4307_v20  ;;  %v4317_v0 = vld [vmem:[%s5588_s11 + $0x3f8] sm:$0xff]  ;;  %v4316_v36 = vld [vmem:[%s5588_s11 + $0x3f0] sm:$0xff] }
 0x36b   : > { %v3695_v39 = vmul.f32 %v6682_v53, %v4308_v42  ;;  %v3696_v31 = vmul.f32 %v6682_v53, %v4309_v44  ;;  %v3697_v48 = vmul.f32 %v6682_v53, %v4310_v58  ;;  %v3698_v13 = vmul.f32 %v6682_v53, %v4311_v3 }
 0x36c   : > { %v3699_v63 = vmul.f32 %v6682_v53, %v4312_v18  ;;  %v3700_v29 = vmul.f32 %v6682_v53, %v4313_v8  ;;  %v3701_v7 = vmul.f32 %v6682_v53, %v4314_v45  ;;  %v3702_v52 = vmul.f32 %v6682_v53, %v4315_v27 }
 0x36d   : > { %v3703_v34 = vmul.f32 %v6682_v53, %v4316_v36  ;;  %v3704_v10 = vmul.f32 %v6682_v53, %v4317_v0  ;;  %v3705_v4 = vsub.f32 %v3673_v11, %v6696_v23  ;;  %v7887_v57 = vsub.f32 %v3674_v55, %v6696_v23 }
 0x36e   : > { %v7890_v35 = vsub.f32 %v3675_v62, %v6696_v23  ;;  %v7893_v51 = vsub.f32 %v3676_v47, %v6696_v23  ;;  %v7896_v49 = vsub.f32 %v3677_v28, %v6696_v23  ;;  %v7899_v9 = vsub.f32 %v3678_v33, %v6696_v23 }
 0x36f   : > { %v7902_v43 = vsub.f32 %v3679_v16, %v6696_v23  ;;  %v7905_v53 = vsub.f32 %v3680_v5, %v6696_v23  ;;  %v7908_v24 = vsub.f32 %v3681_v61, %v6696_v23  ;;  %v7911_v60 = vsub.f32 %v3682_v46, %v6696_v23 }
 0x370   : > { %v7914_v38 = vsub.f32 %v3683_v40, %v6696_v23  ;;  %v7917_v12 = vsub.f32 %v3684_v19, %v6696_v23  ;;  %v7920_v1 = vsub.f32 %v3685_v22, %v6696_v23  ;;  %v7923_v11 = vsub.f32 %v3686_v26, %v6696_v23 }
 0x371   : > { %v7926_v55 = vsub.f32 %v3687_v37, %v6696_v23  ;;  %v7929_v62 = vsub.f32 %v3688_v30, %v6696_v23  ;;  %v7932_v47 = vsub.f32 %v3689_v50, %v6696_v23  ;;  %v7935_v17 = vsub.f32 %v3690_v6, %v6696_v23 }
 0x372   : > { %v7938_v21 = vsub.f32 %v3691_v54, %v6696_v23  ;;  %v7941_v2 = vsub.f32 %v3692_v15, %v6696_v23  ;;  %v7944_v28 = vsub.f32 %v3693_v25, %v6696_v23  ;;  %v7947_v33 = vsub.f32 %v3694_v14, %v6696_v23 }
 0x373   : > { %v7950_v16 = vsub.f32 %v3695_v39, %v6696_v23  ;;  %v7953_v5 = vsub.f32 %v3696_v31, %v6696_v23  ;;  %v7956_v59 = vsub.f32 %v3697_v48, %v6696_v23  ;;  %v7959_v32 = vsub.f32 %v3698_v13, %v6696_v23 }
 0x374   : > { %v7962_v56 = vsub.f32 %v3699_v63, %v6696_v23  ;;  %v7965_v61 = vsub.f32 %v3700_v29, %v6696_v23  ;;  %v7968_v46 = vsub.f32 %v3701_v7, %v6696_v23  ;;  %v7971_v40 = vsub.f32 %v3702_v52, %v6696_v23 }
 0x375   : > { %v7974_v19 = vsub.f32 %v3703_v34, %v6696_v23  ;;  %vm3737_vm11 = vcmp.ge.f32.partialorder %v3705_v4, 0.0  ;;  %vm3738_vm14 = vcmp.ge.f32.partialorder %v7887_v57, 0.0  ;;  %vm3739_vm12 = vcmp.ge.f32.partialorder %v7890_v35, 0.0 }
 0x376   : > { %vm3740_vm4 = vcmp.ge.f32.partialorder %v7893_v51, 0.0  ;;  %vm3741_vm3 = vcmp.ge.f32.partialorder %v7896_v49, 0.0  ;;  %vm3742_vm5 = vcmp.ge.f32.partialorder %v7899_v9, 0.0  ;;  %vm3743_vm10 = vcmp.ge.f32.partialorder %v7902_v43, 0.0 }
 0x377   : > { %vm3744_vm13 = vcmp.ge.f32.partialorder %v7905_v53, 0.0  ;;  %v3769_v20 = vmul.f32 0.2, %v3705_v4  ;;  %v3770_v41 = vmul.f32 0.2, %v7887_v57  ;;  %v7990_v44 = vsub.f32 %v3704_v10, %v6696_v23 }
 0x378   : > { %vm3751_vm2 = vcmp.ge.f32.partialorder %v7926_v55, 0.0  ;;  %v3771_v22 = vmul.f32 0.2, %v7890_v35  ;;  %v3772_v26 = vmul.f32 0.2, %v7893_v51  ;;  %vm3756_vm15 = vcmp.ge.f32.partialorder %v7941_v2, 0.0 }
 0x379   : > { %v3773_v37 = vmul.f32 0.2, %v7896_v49  ;;  %vm3757_vm6 = vcmp.ge.f32.partialorder %v7944_v28, 0.0  ;;  %v3774_v23 = vmul.f32 0.2, %v7899_v9  ;;  %v3801_v3 = vsel %vm3737_vm11, %v3705_v4, %v3769_v20 }
 0x37a   : > { %v3775_v30 = vmul.f32 0.2, %v7902_v43  ;;  %v3776_v42 = vmul.f32 0.2, %v7905_v53  ;;  %vm3758_vm0 = vcmp.ge.f32.partialorder %v7947_v33, 0.0  ;;  %v3802_v54 = vsel %vm3738_vm14, %v7887_v57, %v3770_v41  ;;  %4318 = vst.msk [vmem:[%s5588_s11 + $0x300] sm:$0xff] %vm656_vm1, %v3801_v3 }
 0x37b   : > { %v3777_v58 = vmul.f32 0.2, %v7908_v24  ;;  %v3778_v50 = vmul.f32 0.2, %v7911_v60  ;;  %v3779_v6 = vmul.f32 0.2, %v7914_v38  ;;  %v3803_v27 = vsel %vm3739_vm12, %v7890_v35, %v3771_v22 }
 0x37c   : > { %vm3762_vm11 = vcmp.ge.f32.partialorder %v7959_v32, 0.0  ;;  %vm3764_vm8 = vcmp.ge.f32.partialorder %v7965_v61, 0.0  ;;  %v3780_v15 = vmul.f32 0.2, %v7917_v12  ;;  %v3781_v8 = vmul.f32 0.2, %v7920_v1 }
 0x37d   : > { %v3782_v18 = vmul.f32 0.2, %v7923_v11  ;;  %4319 = vst.msk [vmem:[%s5588_s11 + $0x308] sm:$0xff] %vm656_vm1, %v3802_v54  ;;  %vm3766_vm14 = vcmp.ge.f32.partialorder %v7971_v40, 0.0  ;;  %vm3767_vm7 = vcmp.ge.f32.partialorder %v7974_v19, 0.0  ;;  %vm3768_vm9 = vcmp.ge.f32.partialorder %v7990_v44, 0.0 }
 0x37e   : > { %v3783_v25 = vmul.f32 0.2, %v7926_v55  ;;  %v3784_v14 = vmul.f32 0.2, %v7929_v62  ;;  %v3785_v39 = vmul.f32 0.2, %v7932_v47  ;;  %v3804_v31 = vsel %vm3740_vm4, %v7893_v51, %v3772_v26 }
 0x37f   : > { %4320 = vst.msk [vmem:[%s5588_s11 + $0x310] sm:$0xff] %vm656_vm1, %v3803_v27  ;;  %v3786_v45 = vmul.f32 0.2, %v7935_v17  ;;  %v3787_v0 = vmul.f32 0.2, %v7938_v21  ;;  %v3805_v48 = vsel %vm3741_vm3, %v7896_v49, %v3773_v37  ;;  %4321 = vst.msk [vmem:[%s5588_s11 + $0x318] sm:$0xff] %vm656_vm1, %v3804_v31  ;;  %v3806_v7 = vsel %vm3742_vm5, %v7899_v9, %v3774_v23 }
 0x380   : > { %v3788_v36 = vmul.f32 0.2, %v7941_v2  ;;  %v3789_v13 = vmul.f32 0.2, %v7944_v28  ;;  %v3790_v63 = vmul.f32 0.2, %v7947_v33  ;;  %v3807_v4 = vsel %vm3743_vm10, %v7902_v43, %v3775_v30 }
 0x381   : > { %v3791_v29 = vmul.f32 0.2, %v7950_v16  ;;  %4322 = vst.msk [vmem:[%s5588_s11 + $0x320] sm:$0xff] %vm656_vm1, %v3805_v48  ;;  %v3792_v52 = vmul.f32 0.2, %v7953_v5  ;;  %4323 = vst.msk [vmem:[%s5588_s11 + $0x328] sm:$0xff] %vm656_vm1, %v3806_v7  ;;  %v3808_v49 = vsel %vm3744_vm13, %v7905_v53, %v3776_v42 }
 0x382   : > { %v3793_v34 = vmul.f32 0.2, %v7956_v59  ;;  %v3794_v10 = vmul.f32 0.2, %v7959_v32  ;;  %v3795_v57 = vmul.f32 0.2, %v7962_v56 }
 0x383   : > { %v3796_v35 = vmul.f32 0.2, %v7965_v61  ;;  %v3797_v51 = vmul.f32 0.2, %v7968_v46  ;;  %4324 = vst.msk [vmem:[%s5588_s11 + $0x330] sm:$0xff] %vm656_vm1, %v3807_v4  ;;  %vm8310_vm12 = vcmp.ge.f32.partialorder %v7908_v24, 0.0 }
 0x384   : > { %v3798_v9 = vmul.f32 0.2, %v7971_v40  ;;  %v3799_v43 = vmul.f32 0.2, %v7974_v19  ;;  %v3800_v20 = vmul.f32 0.2, %v7990_v44  ;;  %v3809_v41 = vsel %vm8310_vm12, %v7908_v24, %v3777_v58 }
 0x385   : > { %4325 = vst.msk [vmem:[%s5588_s11 + $0x338] sm:$0xff] %vm656_vm1, %v3808_v49  ;;  %vm8311_vm4 = vcmp.ge.f32.partialorder %v7911_v60, 0.0  ;;  %vm8312_vm3 = vcmp.ge.f32.partialorder %v7914_v38, 0.0  ;;  %vm8313_vm5 = vcmp.ge.f32.partialorder %v7917_v12, 0.0  ;;  %vm8314_vm10 = vcmp.ge.f32.partialorder %v7920_v1, 0.0  ;;  %4326 = vst.msk [vmem:[%s5588_s11 + $0x340] sm:$0xff] %vm656_vm1, %v3809_v41 }
 0x386   : > { %v3810_v53 = vsel %vm8311_vm4, %v7911_v60, %v3778_v50  ;;  %v3811_v22 = vsel %vm8312_vm3, %v7914_v38, %v3779_v6  ;;  %v3812_v26 = vsel %vm8313_vm5, %v7917_v12, %v3780_v15  ;;  %v3813_v24 = vsel %vm8314_vm10, %v7920_v1, %v3781_v8 }
 0x387   : > { %vm8315_vm13 = vcmp.ge.f32.partialorder %v7923_v11, 0.0  ;;  %v3815_v38 = vsel %vm3751_vm2, %v7926_v55, %v3783_v25  ;;  %vm8316_vm12 = vcmp.ge.f32.partialorder %v7929_v62, 0.0  ;;  %vm8317_vm4 = vcmp.ge.f32.partialorder %v7932_v47, 0.0  ;;  %4327 = vst.msk [vmem:[%s5588_s11 + $0x348] sm:$0xff] %vm656_vm1, %v3810_v53  ;;  %4328 = vst.msk [vmem:[%s5588_s11 + $0x350] sm:$0xff] %vm656_vm1, %v3811_v22 }
 0x388   : > { %v3814_v60 = vsel %vm8315_vm13, %v7923_v11, %v3782_v18  ;;  %v3816_v12 = vsel %vm8316_vm12, %v7929_v62, %v3784_v14  ;;  %v3817_v1 = vsel %vm8317_vm4, %v7932_v47, %v3785_v39  ;;  %4329 = vst.msk [vmem:[%s5588_s11 + $0x358] sm:$0xff] %vm656_vm1, %v3812_v26  ;;  %4330 = vst.msk [vmem:[%s5588_s11 + $0x360] sm:$0xff] %vm656_vm1, %v3813_v24  ;;  %vm8318_vm2 = vcmp.ge.f32.partialorder %v7935_v17, 0.0 }
 0x389   : > { %v3818_v11 = vsel %vm8318_vm2, %v7935_v17, %v3786_v45  ;;  %vm8319_vm3 = vcmp.ge.f32.partialorder %v7938_v21, 0.0  ;;  %v3820_v62 = vsel %vm3756_vm15, %v7941_v2, %v3788_v36  ;;  %v3821_v47 = vsel %vm3757_vm6, %v7944_v28, %v3789_v13  ;;  %4331 = vst.msk [vmem:[%s5588_s11 + $0x368] sm:$0xff] %vm656_vm1, %v3814_v60  ;;  %4332 = vst.msk [vmem:[%s5588_s11 + $0x370] sm:$0xff] %vm656_vm1, %v3815_v38 }
 0x38a   : > { %v3819_v55 = vsel %vm8319_vm3, %v7938_v21, %v3787_v0  ;;  %4333 = vst.msk [vmem:[%s5588_s11 + $0x378] sm:$0xff] %vm656_vm1, %v3816_v12  ;;  %4334 = vst.msk [vmem:[%s5588_s11 + $0x380] sm:$0xff] %vm656_vm1, %v3817_v1  ;;  %v3822_v17 = vsel %vm3758_vm0, %v7947_v33, %v3790_v63  ;;  %vm8320_vm15 = vcmp.ge.f32.partialorder %v7950_v16, 0.0  ;;  %vm8321_vm6 = vcmp.ge.f32.partialorder %v7953_v5, 0.0 }
 0x38b   : > { %v3823_v21 = vsel %vm8320_vm15, %v7950_v16, %v3791_v29  ;;  %v3824_v2 = vsel %vm8321_vm6, %v7953_v5, %v3792_v52  ;;  %vm8322_vm5 = vcmp.ge.f32.partialorder %v7956_v59, 0.0  ;;  %4335 = vst.msk [vmem:[%s5588_s11 + $0x388] sm:$0xff] %vm656_vm1, %v3818_v11  ;;  %4336 = vst.msk [vmem:[%s5588_s11 + $0x390] sm:$0xff] %vm656_vm1, %v3819_v55  ;;  %v3826_v33 = vsel %vm3762_vm11, %v7959_v32, %v3794_v10 }
 0x38c   : > { %v3825_v28 = vsel %vm8322_vm5, %v7956_v59, %v3793_v34  ;;  %4337 = vst.msk [vmem:[%s5588_s11 + $0x398] sm:$0xff] %vm656_vm1, %v3820_v62  ;;  %4338 = vst.msk [vmem:[%s5588_s11 + $0x3a0] sm:$0xff] %vm656_vm1, %v3821_v47  ;;  %vm8323_vm0 = vcmp.ge.f32.partialorder %v7962_v56, 0.0  ;;  %v3828_v5 = vsel %vm3764_vm8, %v7965_v61, %v3796_v35  ;;  %vm8324_vm10 = vcmp.ge.f32.partialorder %v7968_v46, 0.0 }
 0x38d   : > { %v3827_v16 = vsel %vm8323_vm0, %v7962_v56, %v3795_v57  ;;  %v3829_v59 = vsel %vm8324_vm10, %v7968_v46, %v3797_v51  ;;  %4339 = vst.msk [vmem:[%s5588_s11 + $0x3a8] sm:$0xff] %vm656_vm1, %v3822_v17  ;;  %4340 = vst.msk [vmem:[%s5588_s11 + $0x3b0] sm:$0xff] %vm656_vm1, %v3823_v21  ;;  %v3830_v32 = vsel %vm3766_vm14, %v7971_v40, %v3798_v9 }
 0x38e   : > { %4341 = vst.msk [vmem:[%s5588_s11 + $0x3b8] sm:$0xff] %vm656_vm1, %v3824_v2  ;;  %4342 = vst.msk [vmem:[%s5588_s11 + $0x3c0] sm:$0xff] %vm656_vm1, %v3825_v28  ;;  %v3831_v56 = vsel %vm3767_vm7, %v7974_v19, %v3799_v43  ;;  %v3832_v61 = vsel %vm3768_vm9, %v7990_v44, %v3800_v20 }
 0x38f   : > { %4343 = vst.msk [vmem:[%s5588_s11 + $0x3c8] sm:$0xff] %vm656_vm1, %v3826_v33  ;;  %4344 = vst.msk [vmem:[%s5588_s11 + $0x3d0] sm:$0xff] %vm656_vm1, %v3827_v16 }
 0x390   : > { %4345 = vst.msk [vmem:[%s5588_s11 + $0x3d8] sm:$0xff] %vm656_vm1, %v3828_v5  ;;  %4346 = vst.msk [vmem:[%s5588_s11 + $0x3e0] sm:$0xff] %vm656_vm1, %v3829_v59 }
 0x391   : > { %4347 = vst.msk [vmem:[%s5588_s11 + $0x3e8] sm:$0xff] %vm656_vm1, %v3830_v32  ;;  %4348 = vst.msk [vmem:[%s5588_s11 + $0x3f0] sm:$0xff] %vm656_vm1, %v3831_v56 }
 0x392   : > { %4349 = vst.msk [vmem:[%s5588_s11 + $0x3f8] sm:$0xff] %vm656_vm1, %v3832_v61 }
 0x393 PF: > { %s12_s9 = sadd.s32 1, %s4717_s9  }
 0x394   : > { %p9_p4 = scmp.ge.s32.totalorder %s12_s9, 4  }
 0x396   :  { %11 = sbr.rel (!%p9_p4) target bundleno = 1 (0x1), region = 64 }

</bundles_post_ra>
